<compile_context>
chip_gen: v6e
topology: v6e:2x2x1
jax: 0.10.0
libtpu: 0.0.40
codegen_flags: <defaults>
</compile_context>

<pallas_src>
import functools
from types import SimpleNamespace

import numpy as np
import jax
import jax.numpy as jnp
from jax.experimental import pallas as pl
from jax.experimental.pallas import tpu as pltpu

# Real EfficientDet uses MAX_DETECTION_POINTS = 5000; kept small for the demo.
MAX_DETECTION_POINTS = 16


def _round_up(n, m):
    return (n + m - 1) // m * m


# --------------------------------------------------------------------------
# Pallas kernel #1: fused cls+box 1x1-conv head == bf16 matmul + f32 bias (MXU)
# --------------------------------------------------------------------------
def _fused_head_kernel(x_ref, w_ref, b_ref, o_ref):
    # x: (TM, Cin) bf16, w: (Cin, CoutPad) bf16, b: (1, CoutPad) f32
    acc = jnp.dot(x_ref[...], w_ref[...], preferred_element_type=jnp.float32)
    o_ref[...] = acc + b_ref[...]


def fused_head_pallas(x2d, w, b):
    """y = x2d @ w + b.

    bf16 MXU inputs / f32 accumulation; Cout zero-padded to a multiple of 128
    for lane-dense output stores; gridded over M rows (parallel)."""
    M, Cin = x2d.shape
    Cout = w.shape[1]
    cout_pad = _round_up(Cout, 128)
    tm = 512 if M >= 512 else _round_up(M, 16)      # bf16 sublane tile = 16
    m_pad = _round_up(M, tm)

    xb = x2d.astype(jnp.bfloat16)
    if m_pad > M:
        xb = jnp.pad(xb, ((0, m_pad - M), (0, 0)))
    wb = jnp.pad(w, ((0, 0), (0, cout_pad - Cout))).astype(jnp.bfloat16)
    bb = jnp.pad(b.reshape(1, Cout), ((0, 0), (0, cout_pad - Cout))).astype(jnp.float32)

    y = pl.pallas_call(
        _fused_head_kernel,
        out_shape=jax.ShapeDtypeStruct((m_pad, cout_pad), jnp.float32),
        grid=(m_pad // tm,),
        in_specs=[
            pl.BlockSpec((tm, Cin), lambda i: (i, 0)),
            pl.BlockSpec((Cin, cout_pad), lambda i: (0, 0)),
            pl.BlockSpec((1, cout_pad), lambda i: (0, 0)),
        ],
        out_specs=pl.BlockSpec((tm, cout_pad), lambda i: (i, 0)),
        compiler_params=pltpu.CompilerParams(
            dimension_semantics=("parallel",),
            vmem_limit_bytes=32 * 1024 * 1024,
        ),
    )(xb, wb, bb)
    return y[:M, :Cout]


# --------------------------------------------------------------------------
# Pallas kernel #2: per-sample top-k over flattened class logits
#   hierarchical selection: (R,1) row-max vector + single-row argmax + local
#   knock-out in a VMEM scratch.  Box gather is done outside the kernel.
# --------------------------------------------------------------------------
def _topk_kernel(cls_ref, vals_ref, idx_ref, cls_id_ref, work_ref,
                 *, num_classes, k, k_pad):
    # cls_ref:  (1, R, 128) flattened/padded class logits (flat id = r*128 + c)
    # vals_ref: (1, 1, k_pad) f32   selected class logits
    # idx_ref:  (1, 1, k_pad) i32   anchor indices
    # cls_id_ref: (1, 1, k_pad) i32 class ids
    # work_ref: (R, 128) f32 VMEM scratch (mutable copy of the logits)
    _, R, L = cls_ref.shape

    work_ref[...] = cls_ref[0]

    # constants hoisted out of the selection loop (no broadcast re-emission)
    lane_iota = jax.lax.broadcasted_iota(jnp.int32, (1, L), 1)
    row_iota = jax.lax.broadcasted_iota(jnp.int32, (R, 1), 0)
    out_iota = jax.lax.broadcasted_iota(jnp.int32, (1, k_pad), 1)
    big_r = jnp.int32(R)
    big_l = jnp.int32(L)

    # compile-time div/mod specialization (num_classes is static)
    if (num_classes & (num_classes - 1)) == 0:
        shift = num_classes.bit_length() - 1
        mask = num_classes - 1

        def split_fi(fi):
            return fi >> shift, fi & mask
    else:
        def split_fi(fi):
            return fi // num_classes, fi % num_classes

    rowmax0 = jnp.max(work_ref[...], axis=-1, keepdims=True)     # (R, 1)

    def body(i, carry):
        rowmax, vals, idxs, clss = carry
        # (a) global max over the per-row maxima, pick the lowest such row
        m = jnp.max(rowmax)
        r = jnp.min(jnp.where(rowmax == m, row_iota, big_r))
        # (b) argmax (lowest lane) inside the selected 128-lane row only
        row = work_ref[pl.ds(r, 1), :]                            # (1, L)
        c = jnp.min(jnp.where(row == m, lane_iota, big_l))
        fi = r * L + c
        anchor, cid = split_fi(fi)
        # record the selection (k_pad-wide lane row, written once at the end)
        vals = jnp.where(out_iota == i, m, vals)
        idxs = jnp.where(out_iota == i, anchor, idxs)
        clss = jnp.where(out_iota == i, cid, clss)
        # (c) knock out ONLY the selected element and refresh that row's max
        new_row = jnp.where(lane_iota == c, -jnp.inf, row)
        work_ref[pl.ds(r, 1), :] = new_row
        rowmax = jnp.where(row_iota == r, jnp.max(new_row), rowmax)
        return rowmax, vals, idxs, clss

    init = (rowmax0,
            jnp.zeros((1, k_pad), jnp.float32),
            jnp.zeros((1, k_pad), jnp.int32),
            jnp.zeros((1, k_pad), jnp.int32))
    _, vals, idxs, clss = jax.lax.fori_loop(0, k, body, init, unroll=(k <= 32))

    vals_ref[0] = vals
    idx_ref[0] = idxs
    cls_id_ref[0] = clss


def post_process_pallas(config, cls_outputs, box_outputs):
    """Pallas equivalent of effdet _post_process (NHWC level outputs)."""
    B = cls_outputs[0].shape[0]
    C = config.num_classes
    cls_all = jnp.concatenate([c.reshape(B, -1, C) for c in cls_outputs], axis=1)
    box_all = jnp.concatenate([b.reshape(B, -1, 4) for b in box_outputs], axis=1)
    A = cls_all.shape[1]
    N = A * C
    # pad to a multiple of 8*128 so R (sublane count) is aligned
    n_pad = _round_up(N, 8 * 128)
    R = n_pad // 128
    flat = cls_all.reshape(B, N)
    if n_pad > N:
        flat = jnp.pad(flat, ((0, 0), (0, n_pad - N)), constant_values=-jnp.inf)
    flat = flat.reshape(B, R, 128)

    K = MAX_DETECTION_POINTS
    k_pad = _round_up(K, 128)           # lane-dense output stores

    # TODO(synk): at real EfficientDet scale (~4.4M logits, K=5000) the per-image
    # logit block should be streamed in R-chunks with a running top-K merge to
    # fit v7x's 64 MiB VMEM; the single-block form is fine at demo scale.
    kern = functools.partial(_topk_kernel, num_classes=C, k=K, k_pad=k_pad)
    vals, anchors, classes = pl.pallas_call(
        kern,
        grid=(B,),
        in_specs=[pl.BlockSpec((1, R, 128), lambda b: (b, 0, 0))],
        out_specs=[
            pl.BlockSpec((1, 1, k_pad), lambda b: (b, 0, 0)),
            pl.BlockSpec((1, 1, k_pad), lambda b: (b, 0, 0)),
            pl.BlockSpec((1, 1, k_pad), lambda b: (b, 0, 0)),
        ],
        out_shape=(
            jax.ShapeDtypeStruct((B, 1, k_pad), jnp.float32),
            jax.ShapeDtypeStruct((B, 1, k_pad), jnp.int32),
            jax.ShapeDtypeStruct((B, 1, k_pad), jnp.int32),
        ),
        scratch_shapes=[pltpu.VMEM((R, 128), jnp.float32)],
        compiler_params=pltpu.CompilerParams(
            dimension_semantics=("parallel",),
            vmem_limit_bytes=32 * 1024 * 1024,
        ),
    )(flat)

    vals = vals[:, 0, :K]               # (B, K)
    anchors = anchors[:, 0, :K]         # (B, K) int32
    classes = classes[:, 0, :K]         # (B, K) int32
    # box gather moved out of the kernel (one take_along_axis, as in the ref)
    boxes = jnp.take_along_axis(box_all, anchors[..., None], axis=1)   # (B, K, 4)
    return vals[..., None], boxes, anchors, classes


# --------------------------------------------------------------------------
# Synthetic multi-level detection model (fused heads run in the Pallas kernel)
# --------------------------------------------------------------------------
def synthetic_model(x_nchw, params, config):
    x = jnp.transpose(x_nchw, (0, 2, 3, 1))     # NCHW -> NHWC
    B, H, W, Cin = x.shape
    c_cls = config.num_anchors * config.num_classes
    cls_outs, box_outs = [], []
    for lvl in range(config.num_levels):
        s = 2 ** lvl
        # simple average-pool feature pyramid (glue, plain JAX)
        feat = x.reshape(B, H // s, s, W // s, s, Cin).mean(axis=(2, 4))
        f2d = feat.reshape(B * (H // s) * (W // s), Cin)
        # fuse cls + box heads: one matmul, one activation read
        w = jnp.concatenate([params[f"cls_w_{lvl}"], params[f"box_w_{lvl}"]], axis=1)
        b = jnp.concatenate([params[f"cls_b_{lvl}"], params[f"box_b_{lvl}"]], axis=0)
        y = fused_head_pallas(f2d, w, b)
        cls_outs.append(y[:, :c_cls].reshape(B, H // s, W // s, -1))
        box_outs.append(y[:, c_cls:].reshape(B, H // s, W // s, -1))
    return cls_outs, box_outs


def wrapper_forward(x_nchw, params, config):
    """Equivalent of _Wrapper.forward."""
    cls_outputs, box_outputs = synthetic_model(x_nchw, params, config)
    return post_process_pallas(config, cls_outputs, box_outputs)


# --------------------------------------------------------------------------
# Pure-JAX references for validation
# --------------------------------------------------------------------------
def reference_model(x_nchw, params, config):
    x = jnp.transpose(x_nchw, (0, 2, 3, 1))
    B, H, W, Cin = x.shape
    c_cls = config.num_anchors * config.num_classes
    cls_outs, box_outs = [], []
    for lvl in range(config.num_levels):
        s = 2 ** lvl
        feat = x.reshape(B, H // s, s, W // s, s, Cin).mean(axis=(2, 4))
        f2d = feat.reshape(B * (H // s) * (W // s), Cin)
        w = jnp.concatenate([params[f"cls_w_{lvl}"], params[f"box_w_{lvl}"]], axis=1)
        b = jnp.concatenate([params[f"cls_b_{lvl}"], params[f"box_b_{lvl}"]], axis=0)
        y = jnp.dot(f2d.astype(jnp.bfloat16), w.astype(jnp.bfloat16),
                    preferred_element_type=jnp.float32) + b
        cls_outs.append(y[:, :c_cls].reshape(B, H // s, W // s, -1))
        box_outs.append(y[:, c_cls:].reshape(B, H // s, W // s, -1))
    return cls_outs, box_outs


def reference_post_process(config, cls_outputs, box_outputs):
    B = cls_outputs[0].shape[0]
    C = config.num_classes
    cls_all = jnp.concatenate([c.reshape(B, -1, C) for c in cls_outputs], axis=1)
    box_all = jnp.concatenate([b.reshape(B, -1, 4) for b in box_outputs], axis=1)
    vals, idx = jax.lax.top_k(cls_all.reshape(B, -1), MAX_DETECTION_POINTS)
    anchors = idx // C
    classes = idx % C
    boxes = jnp.take_along_axis(box_all, anchors[..., None], axis=1)
    return vals[..., None], boxes, anchors, classes


# --------------------------------------------------------------------------
if __name__ == "__main__":
    key = jax.random.PRNGKey(0)
    B, Cin, H, W = 2, 16, 16, 16
    config = SimpleNamespace(num_levels=3, num_classes=8, num_anchors=3)

    keys = jax.random.split(key, 1 + 4 * config.num_levels)
    x = jax.random.normal(keys[0], (B, Cin, H, W), jnp.float32)

    params = {}
    ki = 1
    for lvl in range(config.num_levels):
        co_cls = config.num_anchors * config.num_classes
        co_box = config.num_anchors * 4
        params[f"cls_w_{lvl}"] = 0.1 * jax.random.normal(keys[ki], (Cin, co_cls), jnp.float32); ki += 1
        params[f"cls_b_{lvl}"] = 0.1 * jax.random.normal(keys[ki], (co_cls,), jnp.float32); ki += 1
        params[f"box_w_{lvl}"] = 0.1 * jax.random.normal(keys[ki], (Cin, co_box), jnp.float32); ki += 1
        params[f"box_b_{lvl}"] = 0.1 * jax.random.normal(keys[ki], (co_box,), jnp.float32); ki += 1

    @jax.jit
    def fwd(xx):
        cls_o, box_o = synthetic_model(xx, params, config)
        return post_process_pallas(config, cls_o, box_o), (cls_o, box_o)

    (outs, (cls_o, box_o)) = jax.block_until_ready(fwd(x))
    cls_topk, box_topk, indices, classes = outs

    # 1) head kernel vs pure-JAX bf16 matmul reference (tolerance for bf16 MXU)
    cls_r, box_r = reference_model(x, params, config)
    for a, b in zip(cls_o, cls_r):
        np.testing.assert_allclose(np.asarray(a), np.asarray(b), rtol=1e-3, atol=1e-3)
    for a, b in zip(box_o, box_r):
        np.testing.assert_allclose(np.asarray(a), np.asarray(b), rtol=1e-3, atol=1e-3)

    # 2) top-k + gather vs jax.lax.top_k on the same (Pallas-produced) logits
    r_cls, r_box, r_idx, r_classes = reference_post_process(config, cls_o, box_o)
    np.testing.assert_allclose(np.asarray(cls_topk), np.asarray(r_cls), rtol=1e-6, atol=1e-6)
    np.testing.assert_allclose(np.asarray(box_topk), np.asarray(r_box), rtol=1e-6, atol=1e-6)
    np.testing.assert_array_equal(np.asarray(indices), np.asarray(r_idx))
    np.testing.assert_array_equal(np.asarray(classes), np.asarray(r_classes))

    # TODO(synk): the wrapped `model` is synthetic (pyramid of fused 1x1-conv
    # heads); a real EfficientDet backbone/BiFPN is out of scope for a kernel.
    print("KERNEL_OK")
</pallas_src>

<mosaic_0001>
module attributes {stable_mosaic.version = 11 : i64} {
  func.func @_fused_head_kernel(%arg0: i32, %arg1: memref<32x16xbf16, #tpu.memory_space<vmem>>, %arg2: memref<16x128xbf16, #tpu.memory_space<vmem>>, %arg3: memref<1x128xf32, #tpu.memory_space<vmem>>, %arg4: memref<32x128xf32, #tpu.memory_space<vmem>>) attributes {dimension_semantics = [#tpu.dimension_semantics<parallel>], iteration_bounds = array<i64: 1>, scalar_prefetch = 0 : i64, scratch_operands = 0 : i64, tpu.core_type = #tpu.core_type<tc>, window_params = [{transform_indices = @transform_0, window_bounds = array<i64: 32, 16>}, {pipeline_mode = #tpu.pipeline_mode<synchronous>, transform_indices = @transform_1, window_bounds = array<i64: 16, 128>}, {pipeline_mode = #tpu.pipeline_mode<synchronous>, transform_indices = @transform_2, window_bounds = array<i64: 1, 128>}, {transform_indices = @transform_3, window_bounds = array<i64: 32, 128>}]} {
    %c0 = arith.constant 0 : index
    %c0_0 = arith.constant 0 : index
    %0 = vector.load %arg1[%c0, %c0_0] : memref<32x16xbf16, #tpu.memory_space<vmem>>, vector<32x16xbf16>
    %c0_1 = arith.constant 0 : index
    %c0_2 = arith.constant 0 : index
    %1 = vector.load %arg2[%c0_1, %c0_2] : memref<16x128xbf16, #tpu.memory_space<vmem>>, vector<16x128xbf16>
    %cst = arith.constant dense<0.000000e+00> : vector<32x128xf32>
    %2 = tpu.matmul %0, %1, %cst {dimension_numbers = #tpu.dot_dimension_numbers<[1], [0], [0], [1], [0, 0, 1, 1], [], []>} : vector<32x16xbf16>, vector<16x128xbf16>, vector<32x128xf32> -> vector<32x128xf32>
    %c0_3 = arith.constant 0 : index
    %c0_4 = arith.constant 0 : index
    %3 = vector.load %arg3[%c0_3, %c0_4] : memref<1x128xf32, #tpu.memory_space<vmem>>, vector<1x128xf32>
    %4 = vector.broadcast %3 : vector<1x128xf32> to vector<32x128xf32>
    %5 = arith.addf %2, %4 : vector<32x128xf32>
    %c0_5 = arith.constant 0 : index
    %c0_6 = arith.constant 0 : index
    %6 = vector.load %arg4[%c0_5, %c0_6] : memref<32x128xf32, #tpu.memory_space<vmem>>, vector<32x128xf32>
    tpu.vector_store %arg4[%c0_5, %c0_6], %5 {strides = array<i32>} : memref<32x128xf32, #tpu.memory_space<vmem>>, vector<32x128xf32>,
    return
  }
  func.func @transform_0(%arg0: i32) -> (i32, i32) {
    %c0_i32 = arith.constant 0 : i32
    %c0_i32_0 = arith.constant 0 : i32
    return %arg0, %c0_i32 : i32, i32
  }
  func.func @transform_1(%arg0: i32) -> (i32, i32) {
    %c0_i32 = arith.constant 0 : i32
    %c0_i32_0 = arith.constant 0 : i32
    %c0_i32_1 = arith.constant 0 : i32
    return %c0_i32, %c0_i32_0 : i32, i32
  }
  func.func @transform_2(%arg0: i32) -> (i32, i32) {
    %c0_i32 = arith.constant 0 : i32
    %c0_i32_0 = arith.constant 0 : i32
    %c0_i32_1 = arith.constant 0 : i32
    return %c0_i32, %c0_i32_0 : i32, i32
  }
  func.func @transform_3(%arg0: i32) -> (i32, i32) {
    %c0_i32 = arith.constant 0 : i32
    %c0_i32_0 = arith.constant 0 : i32
    return %arg0, %c0_i32 : i32, i32
  }
}

module attributes {stable_mosaic.version = 11 : i64} {
  func.func @_fused_head_kernel(%arg0: i32, %arg1: memref<128x16xbf16, #tpu.memory_space<vmem>>, %arg2: memref<16x128xbf16, #tpu.memory_space<vmem>>, %arg3: memref<1x128xf32, #tpu.memory_space<vmem>>, %arg4: memref<128x128xf32, #tpu.memory_space<vmem>>) attributes {dimension_semantics = [#tpu.dimension_semantics<parallel>], iteration_bounds = array<i64: 1>, scalar_prefetch = 0 : i64, scratch_operands = 0 : i64, tpu.core_type = #tpu.core_type<tc>, window_params = [{transform_indices = @transform_0, window_bounds = array<i64: 128, 16>}, {pipeline_mode = #tpu.pipeline_mode<synchronous>, transform_indices = @transform_1, window_bounds = array<i64: 16, 128>}, {pipeline_mode = #tpu.pipeline_mode<synchronous>, transform_indices = @transform_2, window_bounds = array<i64: 1, 128>}, {transform_indices = @transform_3, window_bounds = array<i64: 128, 128>}]} {
    %c0 = arith.constant 0 : index
    %c0_0 = arith.constant 0 : index
    %0 = vector.load %arg1[%c0, %c0_0] : memref<128x16xbf16, #tpu.memory_space<vmem>>, vector<128x16xbf16>
    %c0_1 = arith.constant 0 : index
    %c0_2 = arith.constant 0 : index
    %1 = vector.load %arg2[%c0_1, %c0_2] : memref<16x128xbf16, #tpu.memory_space<vmem>>, vector<16x128xbf16>
    %cst = arith.constant dense<0.000000e+00> : vector<128x128xf32>
    %2 = tpu.matmul %0, %1, %cst {dimension_numbers = #tpu.dot_dimension_numbers<[1], [0], [0], [1], [0, 0, 1, 1], [], []>} : vector<128x16xbf16>, vector<16x128xbf16>, vector<128x128xf32> -> vector<128x128xf32>
    %c0_3 = arith.constant 0 : index
    %c0_4 = arith.constant 0 : index
    %3 = vector.load %arg3[%c0_3, %c0_4] : memref<1x128xf32, #tpu.memory_space<vmem>>, vector<1x128xf32>
    %4 = vector.broadcast %3 : vector<1x128xf32> to vector<128x128xf32>
    %5 = arith.addf %2, %4 : vector<128x128xf32>
    %c0_5 = arith.constant 0 : index
    %c0_6 = arith.constant 0 : index
    %6 = vector.load %arg4[%c0_5, %c0_6] : memref<128x128xf32, #tpu.memory_space<vmem>>, vector<128x128xf32>
    tpu.vector_store %arg4[%c0_5, %c0_6], %5 {strides = array<i32>} : memref<128x128xf32, #tpu.memory_space<vmem>>, vector<128x128xf32>,
    return
  }
  func.func @transform_0(%arg0: i32) -> (i32, i32) {
    %c0_i32 = arith.constant 0 : i32
    %c0_i32_0 = arith.constant 0 : i32
    return %arg0, %c0_i32 : i32, i32
  }
  func.func @transform_1(%arg0: i32) -> (i32, i32) {
    %c0_i32 = arith.constant 0 : i32
    %c0_i32_0 = arith.constant 0 : i32
    %c0_i32_1 = arith.constant 0 : i32
    return %c0_i32, %c0_i32_0 : i32, i32
  }
  func.func @transform_2(%arg0: i32) -> (i32, i32) {
    %c0_i32 = arith.constant 0 : i32
    %c0_i32_0 = arith.constant 0 : i32
    %c0_i32_1 = arith.constant 0 : i32
    return %c0_i32, %c0_i32_0 : i32, i32
  }
  func.func @transform_3(%arg0: i32) -> (i32, i32) {
    %c0_i32 = arith.constant 0 : i32
    %c0_i32_0 = arith.constant 0 : i32
    return %arg0, %c0_i32 : i32, i32
  }
}

module attributes {stable_mosaic.version = 11 : i64} {
  func.func @_fused_head_kernel(%arg0: i32, %arg1: memref<512x16xbf16, #tpu.memory_space<vmem>>, %arg2: memref<16x128xbf16, #tpu.memory_space<vmem>>, %arg3: memref<1x128xf32, #tpu.memory_space<vmem>>, %arg4: memref<512x128xf32, #tpu.memory_space<vmem>>) attributes {dimension_semantics = [#tpu.dimension_semantics<parallel>], iteration_bounds = array<i64: 1>, scalar_prefetch = 0 : i64, scratch_operands = 0 : i64, tpu.core_type = #tpu.core_type<tc>, window_params = [{transform_indices = @transform_0, window_bounds = array<i64: 512, 16>}, {pipeline_mode = #tpu.pipeline_mode<synchronous>, transform_indices = @transform_1, window_bounds = array<i64: 16, 128>}, {pipeline_mode = #tpu.pipeline_mode<synchronous>, transform_indices = @transform_2, window_bounds = array<i64: 1, 128>}, {transform_indices = @transform_3, window_bounds = array<i64: 512, 128>}]} {
    %c0 = arith.constant 0 : index
    %c0_0 = arith.constant 0 : index
    %0 = vector.load %arg1[%c0, %c0_0] : memref<512x16xbf16, #tpu.memory_space<vmem>>, vector<512x16xbf16>
    %c0_1 = arith.constant 0 : index
    %c0_2 = arith.constant 0 : index
    %1 = vector.load %arg2[%c0_1, %c0_2] : memref<16x128xbf16, #tpu.memory_space<vmem>>, vector<16x128xbf16>
    %cst = arith.constant dense<0.000000e+00> : vector<512x128xf32>
    %2 = tpu.matmul %0, %1, %cst {dimension_numbers = #tpu.dot_dimension_numbers<[1], [0], [0], [1], [0, 0, 1, 1], [], []>} : vector<512x16xbf16>, vector<16x128xbf16>, vector<512x128xf32> -> vector<512x128xf32>
    %c0_3 = arith.constant 0 : index
    %c0_4 = arith.constant 0 : index
    %3 = vector.load %arg3[%c0_3, %c0_4] : memref<1x128xf32, #tpu.memory_space<vmem>>, vector<1x128xf32>
    %4 = vector.broadcast %3 : vector<1x128xf32> to vector<512x128xf32>
    %5 = arith.addf %2, %4 : vector<512x128xf32>
    %c0_5 = arith.constant 0 : index
    %c0_6 = arith.constant 0 : index
    %6 = vector.load %arg4[%c0_5, %c0_6] : memref<512x128xf32, #tpu.memory_space<vmem>>, vector<512x128xf32>
    tpu.vector_store %arg4[%c0_5, %c0_6], %5 {strides = array<i32>} : memref<512x128xf32, #tpu.memory_space<vmem>>, vector<512x128xf32>,
    return
  }
  func.func @transform_0(%arg0: i32) -> (i32, i32) {
    %c0_i32 = arith.constant 0 : i32
    %c0_i32_0 = arith.constant 0 : i32
    return %arg0, %c0_i32 : i32, i32
  }
  func.func @transform_1(%arg0: i32) -> (i32, i32) {
    %c0_i32 = arith.constant 0 : i32
    %c0_i32_0 = arith.constant 0 : i32
    %c0_i32_1 = arith.constant 0 : i32
    return %c0_i32, %c0_i32_0 : i32, i32
  }
  func.func @transform_2(%arg0: i32) -> (i32, i32) {
    %c0_i32 = arith.constant 0 : i32
    %c0_i32_0 = arith.constant 0 : i32
    %c0_i32_1 = arith.constant 0 : i32
    return %c0_i32, %c0_i32_0 : i32, i32
  }
  func.func @transform_3(%arg0: i32) -> (i32, i32) {
    %c0_i32 = arith.constant 0 : i32
    %c0_i32_0 = arith.constant 0 : i32
    return %arg0, %c0_i32 : i32, i32
  }
}

module attributes {stable_mosaic.version = 11 : i64} {
  func.func @_topk_kernel(%arg0: i32, %arg1: memref<1x64x128xf32, #tpu.memory_space<vmem>>, %arg2: memref<1x1x128xf32, #tpu.memory_space<vmem>>, %arg3: memref<1x1x128xi32, #tpu.memory_space<vmem>>, %arg4: memref<1x1x128xi32, #tpu.memory_space<vmem>>, %arg5: memref<64x128xf32, #tpu.memory_space<vmem>>) attributes {dimension_semantics = [#tpu.dimension_semantics<parallel>], iteration_bounds = array<i64: 2>, scalar_prefetch = 0 : i64, scratch_operands = 1 : i64, tpu.core_type = #tpu.core_type<tc>, window_params = [{transform_indices = @transform_0, window_bounds = array<i64: 1, 64, 128>}, {transform_indices = @transform_1, window_bounds = array<i64: 1, 1, 128>}, {transform_indices = @transform_2, window_bounds = array<i64: 1, 1, 128>}, {transform_indices = @transform_3, window_bounds = array<i64: 1, 1, 128>}]} {
    %c0 = arith.constant 0 : index
    %c0_0 = arith.constant 0 : index
    %c0_1 = arith.constant 0 : index
    %0 = vector.load %arg1[%c0, %c0_0, %c0_1] : memref<1x64x128xf32, #tpu.memory_space<vmem>>, vector<1x64x128xf32>
    %1 = vector.shape_cast %0 : vector<1x64x128xf32> to vector<64x128xf32>
    %c0_2 = arith.constant 0 : index
    %c0_3 = arith.constant 0 : index
    %2 = vector.load %arg5[%c0_2, %c0_3] : memref<64x128xf32, #tpu.memory_space<vmem>>, vector<64x128xf32>
    tpu.vector_store %arg5[%c0_2, %c0_3], %1 {strides = array<i32>} : memref<64x128xf32, #tpu.memory_space<vmem>>, vector<64x128xf32>,
    %3 = tpu.iota {dimensions = array<i32: 1>} : vector<1x128xi32>
    %4 = tpu.iota {dimensions = array<i32: 0>} : vector<64x1xi32>
    %5 = tpu.iota {dimensions = array<i32: 1>} : vector<1x128xi32>
    %c0_4 = arith.constant 0 : index
    %c0_5 = arith.constant 0 : index
    %6 = vector.load %arg5[%c0_4, %c0_5] : memref<64x128xf32, #tpu.memory_space<vmem>>, vector<64x128xf32>
    %cst = arith.constant dense<0xFF800000> : vector<64xf32>
    %7 = vector.multi_reduction <maximumf>, %6, %cst [1] : vector<64x128xf32> to vector<64xf32>
    %8 = vector.shape_cast %7 : vector<64xf32> to vector<64x1xf32>
    %cst_6 = arith.constant 0.000000e+00 : f32
    %9 = vector.broadcast %cst_6 : f32 to vector<1x128xf32>
    %c0_i32 = arith.constant 0 : i32
    %10 = vector.broadcast %c0_i32 : i32 to vector<1x128xi32>
    %c0_i32_7 = arith.constant 0 : i32
    %11 = vector.broadcast %c0_i32_7 : i32 to vector<1x128xi32>
    %c64_i32 = arith.constant 64 : i32
    %c128_i32 = arith.constant 128 : i32
    %c0_i32_8 = arith.constant 0 : i32
    %12 = vector.shape_cast %8 : vector<64x1xf32> to vector<1x64x1xf32>
    %cst_9 = arith.constant dense<0xFF800000> : vector<1xf32>
    %13 = vector.multi_reduction <maximumf>, %12, %cst_9 [1, 2] : vector<1x64x1xf32> to vector<1xf32>
    %14 = vector.shape_cast %13 : vector<1xf32> to vector<1x1x1xf32>
    %15 = vector.extract %14[0, 0, 0] : f32 from vector<1x1x1xf32>
    %16 = vector.broadcast %15 : f32 to vector<64x1xf32>
    %17 = arith.cmpf oeq, %8, %16 : vector<64x1xf32>
    %18 = vector.broadcast %c64_i32 : i32 to vector<64x1xi32>
    %19 = arith.select %17, %4, %18 : vector<64x1xi1>, vector<64x1xi32>
    %20 = vector.shape_cast %19 : vector<64x1xi32> to vector<1x64x1xi32>
    %cst_10 = arith.constant dense<2147483647> : vector<1xi32>
    %21 = vector.multi_reduction <minsi>, %20, %cst_10 [1, 2] : vector<1x64x1xi32> to vector<1xi32>
    %22 = vector.shape_cast %21 : vector<1xi32> to vector<1x1x1xi32>
    %23 = vector.extract %22[0, 0, 0] : i32 from vector<1x1x1xi32>
    %24 = arith.index_cast %23 : i32 to index
    %c0_11 = arith.constant 0 : index
    %25 = vector.load %arg5[%24, %c0_11] : memref<64x128xf32, #tpu.memory_space<vmem>>, vector<1x128xf32>
    %26 = vector.broadcast %15 : f32 to vector<1x128xf32>
    %27 = arith.cmpf oeq, %25, %26 : vector<1x128xf32>
    %28 = vector.broadcast %c128_i32 : i32 to vector<1x128xi32>
    %29 = arith.select %27, %3, %28 : vector<1x128xi1>, vector<1x128xi32>
    %30 = vector.shape_cast %29 : vector<1x128xi32> to vector<1x1x128xi32>
    %cst_12 = arith.constant dense<2147483647> : vector<1xi32>
    %31 = vector.multi_reduction <minsi>, %30, %cst_12 [1, 2] : vector<1x1x128xi32> to vector<1xi32>
    %32 = vector.shape_cast %31 : vector<1xi32> to vector<1x1x1xi32>
    %33 = vector.extract %32[0, 0, 0] : i32 from vector<1x1x1xi32>
    %c128_i32_13 = arith.constant 128 : i32
    %34 = arith.muli %23, %c128_i32_13 : i32
    %35 = arith.addi %34, %33 : i32
    %c3_i32 = arith.constant 3 : i32
    %36 = arith.shrsi %35, %c3_i32 : i32
    %c7_i32 = arith.constant 7 : i32
    %37 = arith.andi %35, %c7_i32 : i32
    %38 = vector.broadcast %c0_i32_8 : i32 to vector<1x128xi32>
    %39 = arith.cmpi eq, %5, %38 : vector<1x128xi32>
    %40 = vector.broadcast %15 : f32 to vector<1x128xf32>
    %41 = arith.select %39, %40, %9 : vector<1x128xi1>, vector<1x128xf32>
    %42 = vector.broadcast %c0_i32_8 : i32 to vector<1x128xi32>
    %43 = arith.cmpi eq, %5, %42 : vector<1x128xi32>
    %44 = vector.broadcast %36 : i32 to vector<1x128xi32>
    %45 = arith.select %43, %44, %10 : vector<1x128xi1>, vector<1x128xi32>
    %46 = vector.broadcast %c0_i32_8 : i32 to vector<1x128xi32>
    %47 = arith.cmpi eq, %5, %46 : vector<1x128xi32>
    %48 = vector.broadcast %37 : i32 to vector<1x128xi32>
    %49 = arith.select %47, %48, %11 : vector<1x128xi1>, vector<1x128xi32>
    %50 = vector.broadcast %33 : i32 to vector<1x128xi32>
    %51 = arith.cmpi eq, %3, %50 : vector<1x128xi32>
    %cst_14 = arith.constant 0xFF800000 : f32
    %52 = vector.broadcast %cst_14 : f32 to vector<1x128xf32>
    %53 = arith.select %51, %52, %25 : vector<1x128xi1>, vector<1x128xf32>
    %54 = arith.index_cast %23 : i32 to index
    %c0_15 = arith.constant 0 : index
    %55 = vector.load %arg5[%54, %c0_15] : memref<64x128xf32, #tpu.memory_space<vmem>>, vector<1x128xf32>
    tpu.vector_store %arg5[%54, %c0_15], %53 {strides = array<i32>} : memref<64x128xf32, #tpu.memory_space<vmem>>, vector<1x128xf32>,
    %56 = vector.broadcast %23 : i32 to vector<64x1xi32>
    %57 = arith.cmpi eq, %4, %56 : vector<64x1xi32>
    %58 = vector.shape_cast %53 : vector<1x128xf32> to vector<1x1x128xf32>
    %cst_16 = arith.constant dense<0xFF800000> : vector<1xf32>
    %59 = vector.multi_reduction <maximumf>, %58, %cst_16 [1, 2] : vector<1x1x128xf32> to vector<1xf32>
    %60 = vector.shape_cast %59 : vector<1xf32> to vector<1x1x1xf32>
    %61 = vector.extract %60[0, 0, 0] : f32 from vector<1x1x1xf32>
    %62 = vector.broadcast %61 : f32 to vector<64x1xf32>
    %63 = arith.select %57, %62, %8 : vector<64x1xi1>, vector<64x1xf32>
    %c1_i32 = arith.constant 1 : i32
    %64 = vector.shape_cast %63 : vector<64x1xf32> to vector<1x64x1xf32>
    %cst_17 = arith.constant dense<0xFF800000> : vector<1xf32>
    %65 = vector.multi_reduction <maximumf>, %64, %cst_17 [1, 2] : vector<1x64x1xf32> to vector<1xf32>
    %66 = vector.shape_cast %65 : vector<1xf32> to vector<1x1x1xf32>
    %67 = vector.extract %66[0, 0, 0] : f32 from vector<1x1x1xf32>
    %68 = vector.broadcast %67 : f32 to vector<64x1xf32>
    %69 = arith.cmpf oeq, %63, %68 : vector<64x1xf32>
    %70 = vector.broadcast %c64_i32 : i32 to vector<64x1xi32>
    %71 = arith.select %69, %4, %70 : vector<64x1xi1>, vector<64x1xi32>
    %72 = vector.shape_cast %71 : vector<64x1xi32> to vector<1x64x1xi32>
    %cst_18 = arith.constant dense<2147483647> : vector<1xi32>
    %73 = vector.multi_reduction <minsi>, %72, %cst_18 [1, 2] : vector<1x64x1xi32> to vector<1xi32>
    %74 = vector.shape_cast %73 : vector<1xi32> to vector<1x1x1xi32>
    %75 = vector.extract %74[0, 0, 0] : i32 from vector<1x1x1xi32>
    %76 = arith.index_cast %75 : i32 to index
    %c0_19 = arith.constant 0 : index
    %77 = vector.load %arg5[%76, %c0_19] : memref<64x128xf32, #tpu.memory_space<vmem>>, vector<1x128xf32>
    %78 = vector.broadcast %67 : f32 to vector<1x128xf32>
    %79 = arith.cmpf oeq, %77, %78 : vector<1x128xf32>
    %80 = vector.broadcast %c128_i32 : i32 to vector<1x128xi32>
    %81 = arith.select %79, %3, %80 : vector<1x128xi1>, vector<1x128xi32>
    %82 = vector.shape_cast %81 : vector<1x128xi32> to vector<1x1x128xi32>
    %cst_20 = arith.constant dense<2147483647> : vector<1xi32>
    %83 = vector.multi_reduction <minsi>, %82, %cst_20 [1, 2] : vector<1x1x128xi32> to vector<1xi32>
    %84 = vector.shape_cast %83 : vector<1xi32> to vector<1x1x1xi32>
    %85 = vector.extract %84[0, 0, 0] : i32 from vector<1x1x1xi32>
    %c128_i32_21 = arith.constant 128 : i32
    %86 = arith.muli %75, %c128_i32_21 : i32
    %87 = arith.addi %86, %85 : i32
    %c3_i32_22 = arith.constant 3 : i32
    %88 = arith.shrsi %87, %c3_i32_22 : i32
    %c7_i32_23 = arith.constant 7 : i32
    %89 = arith.andi %87, %c7_i32_23 : i32
    %90 = vector.broadcast %c1_i32 : i32 to vector<1x128xi32>
    %91 = arith.cmpi eq, %5, %90 : vector<1x128xi32>
    %92 = vector.broadcast %67 : f32 to vector<1x128xf32>
    %93 = arith.select %91, %92, %41 : vector<1x128xi1>, vector<1x128xf32>
    %94 = vector.broadcast %c1_i32 : i32 to vector<1x128xi32>
    %95 = arith.cmpi eq, %5, %94 : vector<1x128xi32>
    %96 = vector.broadcast %88 : i32 to vector<1x128xi32>
    %97 = arith.select %95, %96, %45 : vector<1x128xi1>, vector<1x128xi32>
    %98 = vector.broadcast %c1_i32 : i32 to vector<1x128xi32>
    %99 = arith.cmpi eq, %5, %98 : vector<1x128xi32>
    %100 = vector.broadcast %89 : i32 to vector<1x128xi32>
    %101 = arith.select %99, %100, %49 : vector<1x128xi1>, vector<1x128xi32>
    %102 = vector.broadcast %85 : i32 to vector<1x128xi32>
    %103 = arith.cmpi eq, %3, %102 : vector<1x128xi32>
    %cst_24 = arith.constant 0xFF800000 : f32
    %104 = vector.broadcast %cst_24 : f32 to vector<1x128xf32>
    %105 = arith.select %103, %104, %77 : vector<1x128xi1>, vector<1x128xf32>
    %106 = arith.index_cast %75 : i32 to index
    %c0_25 = arith.constant 0 : index
    %107 = vector.load %arg5[%106, %c0_25] : memref<64x128xf32, #tpu.memory_space<vmem>>, vector<1x128xf32>
    tpu.vector_store %arg5[%106, %c0_25], %105 {strides = array<i32>} : memref<64x128xf32, #tpu.memory_space<vmem>>, vector<1x128xf32>,
    %108 = vector.broadcast %75 : i32 to vector<64x1xi32>
    %109 = arith.cmpi eq, %4, %108 : vector<64x1xi32>
    %110 = vector.shape_cast %105 : vector<1x128xf32> to vector<1x1x128xf32>
    %cst_26 = arith.constant dense<0xFF800000> : vector<1xf32>
    %111 = vector.multi_reduction <maximumf>, %110, %cst_26 [1, 2] : vector<1x1x128xf32> to vector<1xf32>
    %112 = vector.shape_cast %111 : vector<1xf32> to vector<1x1x1xf32>
    %113 = vector.extract %112[0, 0, 0] : f32 from vector<1x1x1xf32>
    %114 = vector.broadcast %113 : f32 to vector<64x1xf32>
    %115 = arith.select %109, %114, %63 : vector<64x1xi1>, vector<64x1xf32>
    %c2_i32 = arith.constant 2 : i32
    %116 = vector.shape_cast %115 : vector<64x1xf32> to vector<1x64x1xf32>
    %cst_27 = arith.constant dense<0xFF800000> : vector<1xf32>
    %117 = vector.multi_reduction <maximumf>, %116, %cst_27 [1, 2] : vector<1x64x1xf32> to vector<1xf32>
    %118 = vector.shape_cast %117 : vector<1xf32> to vector<1x1x1xf32>
    %119 = vector.extract %118[0, 0, 0] : f32 from vector<1x1x1xf32>
    %120 = vector.broadcast %119 : f32 to vector<64x1xf32>
    %121 = arith.cmpf oeq, %115, %120 : vector<64x1xf32>
    %122 = vector.broadcast %c64_i32 : i32 to vector<64x1xi32>
    %123 = arith.select %121, %4, %122 : vector<64x1xi1>, vector<64x1xi32>
    %124 = vector.shape_cast %123 : vector<64x1xi32> to vector<1x64x1xi32>
    %cst_28 = arith.constant dense<2147483647> : vector<1xi32>
    %125 = vector.multi_reduction <minsi>, %124, %cst_28 [1, 2] : vector<1x64x1xi32> to vector<1xi32>
    %126 = vector.shape_cast %125 : vector<1xi32> to vector<1x1x1xi32>
    %127 = vector.extract %126[0, 0, 0] : i32 from vector<1x1x1xi32>
    %128 = arith.index_cast %127 : i32 to index
    %c0_29 = arith.constant 0 : index
    %129 = vector.load %arg5[%128, %c0_29] : memref<64x128xf32, #tpu.memory_space<vmem>>, vector<1x128xf32>
    %130 = vector.broadcast %119 : f32 to vector<1x128xf32>
    %131 = arith.cmpf oeq, %129, %130 : vector<1x128xf32>
    %132 = vector.broadcast %c128_i32 : i32 to vector<1x128xi32>
    %133 = arith.select %131, %3, %132 : vector<1x128xi1>, vector<1x128xi32>
    %134 = vector.shape_cast %133 : vector<1x128xi32> to vector<1x1x128xi32>
    %cst_30 = arith.constant dense<2147483647> : vector<1xi32>
    %135 = vector.multi_reduction <minsi>, %134, %cst_30 [1, 2] : vector<1x1x128xi32> to vector<1xi32>
    %136 = vector.shape_cast %135 : vector<1xi32> to vector<1x1x1xi32>
    %137 = vector.extract %136[0, 0, 0] : i32 from vector<1x1x1xi32>
    %c128_i32_31 = arith.constant 128 : i32
    %138 = arith.muli %127, %c128_i32_31 : i32
    %139 = arith.addi %138, %137 : i32
    %c3_i32_32 = arith.constant 3 : i32
    %140 = arith.shrsi %139, %c3_i32_32 : i32
    %c7_i32_33 = arith.constant 7 : i32
    %141 = arith.andi %139, %c7_i32_33 : i32
    %142 = vector.broadcast %c2_i32 : i32 to vector<1x128xi32>
    %143 = arith.cmpi eq, %5, %142 : vector<1x128xi32>
    %144 = vector.broadcast %119 : f32 to vector<1x128xf32>
    %145 = arith.select %143, %144, %93 : vector<1x128xi1>, vector<1x128xf32>
    %146 = vector.broadcast %c2_i32 : i32 to vector<1x128xi32>
    %147 = arith.cmpi eq, %5, %146 : vector<1x128xi32>
    %148 = vector.broadcast %140 : i32 to vector<1x128xi32>
    %149 = arith.select %147, %148, %97 : vector<1x128xi1>, vector<1x128xi32>
    %150 = vector.broadcast %c2_i32 : i32 to vector<1x128xi32>
    %151 = arith.cmpi eq, %5, %150 : vector<1x128xi32>
    %152 = vector.broadcast %141 : i32 to vector<1x128xi32>
    %153 = arith.select %151, %152, %101 : vector<1x128xi1>, vector<1x128xi32>
    %154 = vector.broadcast %137 : i32 to vector<1x128xi32>
    %155 = arith.cmpi eq, %3, %154 : vector<1x128xi32>
    %cst_34 = arith.constant 0xFF800000 : f32
    %156 = vector.broadcast %cst_34 : f32 to vector<1x128xf32>
    %157 = arith.select %155, %156, %129 : vector<1x128xi1>, vector<1x128xf32>
    %158 = arith.index_cast %127 : i32 to index
    %c0_35 = arith.constant 0 : index
    %159 = vector.load %arg5[%158, %c0_35] : memref<64x128xf32, #tpu.memory_space<vmem>>, vector<1x128xf32>
    tpu.vector_store %arg5[%158, %c0_35], %157 {strides = array<i32>} : memref<64x128xf32, #tpu.memory_space<vmem>>, vector<1x128xf32>,
    %160 = vector.broadcast %127 : i32 to vector<64x1xi32>
    %161 = arith.cmpi eq, %4, %160 : vector<64x1xi32>
    %162 = vector.shape_cast %157 : vector<1x128xf32> to vector<1x1x128xf32>
    %cst_36 = arith.constant dense<0xFF800000> : vector<1xf32>
    %163 = vector.multi_reduction <maximumf>, %162, %cst_36 [1, 2] : vector<1x1x128xf32> to vector<1xf32>
    %164 = vector.shape_cast %163 : vector<1xf32> to vector<1x1x1xf32>
    %165 = vector.extract %164[0, 0, 0] : f32 from vector<1x1x1xf32>
    %166 = vector.broadcast %165 : f32 to vector<64x1xf32>
    %167 = arith.select %161, %166, %115 : vector<64x1xi1>, vector<64x1xf32>
    %c3_i32_37 = arith.constant 3 : i32
    %168 = vector.shape_cast %167 : vector<64x1xf32> to vector<1x64x1xf32>
    %cst_38 = arith.constant dense<0xFF800000> : vector<1xf32>
    %169 = vector.multi_reduction <maximumf>, %168, %cst_38 [1, 2] : vector<1x64x1xf32> to vector<1xf32>
    %170 = vector.shape_cast %169 : vector<1xf32> to vector<1x1x1xf32>
    %171 = vector.extract %170[0, 0, 0] : f32 from vector<1x1x1xf32>
    %172 = vector.broadcast %171 : f32 to vector<64x1xf32>
    %173 = arith.cmpf oeq, %167, %172 : vector<64x1xf32>
    %174 = vector.broadcast %c64_i32 : i32 to vector<64x1xi32>
    %175 = arith.select %173, %4, %174 : vector<64x1xi1>, vector<64x1xi32>
    %176 = vector.shape_cast %175 : vector<64x1xi32> to vector<1x64x1xi32>
    %cst_39 = arith.constant dense<2147483647> : vector<1xi32>
    %177 = vector.multi_reduction <minsi>, %176, %cst_39 [1, 2] : vector<1x64x1xi32> to vector<1xi32>
    %178 = vector.shape_cast %177 : vector<1xi32> to vector<1x1x1xi32>
    %179 = vector.extract %178[0, 0, 0] : i32 from vector<1x1x1xi32>
    %180 = arith.index_cast %179 : i32 to index
    %c0_40 = arith.constant 0 : index
    %181 = vector.load %arg5[%180, %c0_40] : memref<64x128xf32, #tpu.memory_space<vmem>>, vector<1x128xf32>
    %182 = vector.broadcast %171 : f32 to vector<1x128xf32>
    %183 = arith.cmpf oeq, %181, %182 : vector<1x128xf32>
    %184 = vector.broadcast %c128_i32 : i32 to vector<1x128xi32>
    %185 = arith.select %183, %3, %184 : vector<1x128xi1>, vector<1x128xi32>
    %186 = vector.shape_cast %185 : vector<1x128xi32> to vector<1x1x128xi32>
    %cst_41 = arith.constant dense<2147483647> : vector<1xi32>
    %187 = vector.multi_reduction <minsi>, %186, %cst_41 [1, 2] : vector<1x1x128xi32> to vector<1xi32>
    %188 = vector.shape_cast %187 : vector<1xi32> to vector<1x1x1xi32>
    %189 = vector.extract %188[0, 0, 0] : i32 from vector<1x1x1xi32>
    %c128_i32_42 = arith.constant 128 : i32
    %190 = arith.muli %179, %c128_i32_42 : i32
    %191 = arith.addi %190, %189 : i32
    %c3_i32_43 = arith.constant 3 : i32
    %192 = arith.shrsi %191, %c3_i32_43 : i32
    %c7_i32_44 = arith.constant 7 : i32
    %193 = arith.andi %191, %c7_i32_44 : i32
    %194 = vector.broadcast %c3_i32_37 : i32 to vector<1x128xi32>
    %195 = arith.cmpi eq, %5, %194 : vector<1x128xi32>
    %196 = vector.broadcast %171 : f32 to vector<1x128xf32>
    %197 = arith.select %195, %196, %145 : vector<1x128xi1>, vector<1x128xf32>
    %198 = vector.broadcast %c3_i32_37 : i32 to vector<1x128xi32>
    %199 = arith.cmpi eq, %5, %198 : vector<1x128xi32>
    %200 = vector.broadcast %192 : i32 to vector<1x128xi32>
    %201 = arith.select %199, %200, %149 : vector<1x128xi1>, vector<1x128xi32>
    %202 = vector.broadcast %c3_i32_37 : i32 to vector<1x128xi32>
    %203 = arith.cmpi eq, %5, %202 : vector<1x128xi32>
    %204 = vector.broadcast %193 : i32 to vector<1x128xi32>
    %205 = arith.select %203, %204, %153 : vector<1x128xi1>, vector<1x128xi32>
    %206 = vector.broadcast %189 : i32 to vector<1x128xi32>
    %207 = arith.cmpi eq, %3, %206 : vector<1x128xi32>
    %cst_45 = arith.constant 0xFF800000 : f32
    %208 = vector.broadcast %cst_45 : f32 to vector<1x128xf32>
    %209 = arith.select %207, %208, %181 : vector<1x128xi1>, vector<1x128xf32>
    %210 = arith.index_cast %179 : i32 to index
    %c0_46 = arith.constant 0 : index
    %211 = vector.load %arg5[%210, %c0_46] : memref<64x128xf32, #tpu.memory_space<vmem>>, vector<1x128xf32>
    tpu.vector_store %arg5[%210, %c0_46], %209 {strides = array<i32>} : memref<64x128xf32, #tpu.memory_space<vmem>>, vector<1x128xf32>,
    %212 = vector.broadcast %179 : i32 to vector<64x1xi32>
    %213 = arith.cmpi eq, %4, %212 : vector<64x1xi32>
    %214 = vector.shape_cast %209 : vector<1x128xf32> to vector<1x1x128xf32>
    %cst_47 = arith.constant dense<0xFF800000> : vector<1xf32>
    %215 = vector.multi_reduction <maximumf>, %214, %cst_47 [1, 2] : vector<1x1x128xf32> to vector<1xf32>
    %216 = vector.shape_cast %215 : vector<1xf32> to vector<1x1x1xf32>
    %217 = vector.extract %216[0, 0, 0] : f32 from vector<1x1x1xf32>
    %218 = vector.broadcast %217 : f32 to vector<64x1xf32>
    %219 = arith.select %213, %218, %167 : vector<64x1xi1>, vector<64x1xf32>
    %c4_i32 = arith.constant 4 : i32
    %220 = vector.shape_cast %219 : vector<64x1xf32> to vector<1x64x1xf32>
    %cst_48 = arith.constant dense<0xFF800000> : vector<1xf32>
    %221 = vector.multi_reduction <maximumf>, %220, %cst_48 [1, 2] : vector<1x64x1xf32> to vector<1xf32>
    %222 = vector.shape_cast %221 : vector<1xf32> to vector<1x1x1xf32>
    %223 = vector.extract %222[0, 0, 0] : f32 from vector<1x1x1xf32>
    %224 = vector.broadcast %223 : f32 to vector<64x1xf32>
    %225 = arith.cmpf oeq, %219, %224 : vector<64x1xf32>
    %226 = vector.broadcast %c64_i32 : i32 to vector<64x1xi32>
    %227 = arith.select %225, %4, %226 : vector<64x1xi1>, vector<64x1xi32>
    %228 = vector.shape_cast %227 : vector<64x1xi32> to vector<1x64x1xi32>
    %cst_49 = arith.constant dense<2147483647> : vector<1xi32>
    %229 = vector.multi_reduction <minsi>, %228, %cst_49 [1, 2] : vector<1x64x1xi32> to vector<1xi32>
    %230 = vector.shape_cast %229 : vector<1xi32> to vector<1x1x1xi32>
    %231 = vector.extract %230[0, 0, 0] : i32 from vector<1x1x1xi32>
    %232 = arith.index_cast %231 : i32 to index
    %c0_50 = arith.constant 0 : index
    %233 = vector.load %arg5[%232, %c0_50] : memref<64x128xf32, #tpu.memory_space<vmem>>, vector<1x128xf32>
    %234 = vector.broadcast %223 : f32 to vector<1x128xf32>
    %235 = arith.cmpf oeq, %233, %234 : vector<1x128xf32>
    %236 = vector.broadcast %c128_i32 : i32 to vector<1x128xi32>
    %237 = arith.select %235, %3, %236 : vector<1x128xi1>, vector<1x128xi32>
    %238 = vector.shape_cast %237 : vector<1x128xi32> to vector<1x1x128xi32>
    %cst_51 = arith.constant dense<2147483647> : vector<1xi32>
    %239 = vector.multi_reduction <minsi>, %238, %cst_51 [1, 2] : vector<1x1x128xi32> to vector<1xi32>
    %240 = vector.shape_cast %239 : vector<1xi32> to vector<1x1x1xi32>
    %241 = vector.extract %240[0, 0, 0] : i32 from vector<1x1x1xi32>
    %c128_i32_52 = arith.constant 128 : i32
    %242 = arith.muli %231, %c128_i32_52 : i32
    %243 = arith.addi %242, %241 : i32
    %c3_i32_53 = arith.constant 3 : i32
    %244 = arith.shrsi %243, %c3_i32_53 : i32
    %c7_i32_54 = arith.constant 7 : i32
    %245 = arith.andi %243, %c7_i32_54 : i32
    %246 = vector.broadcast %c4_i32 : i32 to vector<1x128xi32>
    %247 = arith.cmpi eq, %5, %246 : vector<1x128xi32>
    %248 = vector.broadcast %223 : f32 to vector<1x128xf32>
    %249 = arith.select %247, %248, %197 : vector<1x128xi1>, vector<1x128xf32>
    %250 = vector.broadcast %c4_i32 : i32 to vector<1x128xi32>
    %251 = arith.cmpi eq, %5, %250 : vector<1x128xi32>
    %252 = vector.broadcast %244 : i32 to vector<1x128xi32>
    %253 = arith.select %251, %252, %201 : vector<1x128xi1>, vector<1x128xi32>
    %254 = vector.broadcast %c4_i32 : i32 to vector<1x128xi32>
    %255 = arith.cmpi eq, %5, %254 : vector<1x128xi32>
    %256 = vector.broadcast %245 : i32 to vector<1x128xi32>
    %257 = arith.select %255, %256, %205 : vector<1x128xi1>, vector<1x128xi32>
    %258 = vector.broadcast %241 : i32 to vector<1x128xi32>
    %259 = arith.cmpi eq, %3, %258 : vector<1x128xi32>
    %cst_55 = arith.constant 0xFF800000 : f32
    %260 = vector.broadcast %cst_55 : f32 to vector<1x128xf32>
    %261 = arith.select %259, %260, %233 : vector<1x128xi1>, vector<1x128xf32>
    %262 = arith.index_cast %231 : i32 to index
    %c0_56 = arith.constant 0 : index
    %263 = vector.load %arg5[%262, %c0_56] : memref<64x128xf32, #tpu.memory_space<vmem>>, vector<1x128xf32>
    tpu.vector_store %arg5[%262, %c0_56], %261 {strides = array<i32>} : memref<64x128xf32, #tpu.memory_space<vmem>>, vector<1x128xf32>,
    %264 = vector.broadcast %231 : i32 to vector<64x1xi32>
    %265 = arith.cmpi eq, %4, %264 : vector<64x1xi32>
    %266 = vector.shape_cast %261 : vector<1x128xf32> to vector<1x1x128xf32>
    %cst_57 = arith.constant dense<0xFF800000> : vector<1xf32>
    %267 = vector.multi_reduction <maximumf>, %266, %cst_57 [1, 2] : vector<1x1x128xf32> to vector<1xf32>
    %268 = vector.shape_cast %267 : vector<1xf32> to vector<1x1x1xf32>
    %269 = vector.extract %268[0, 0, 0] : f32 from vector<1x1x1xf32>
    %270 = vector.broadcast %269 : f32 to vector<64x1xf32>
    %271 = arith.select %265, %270, %219 : vector<64x1xi1>, vector<64x1xf32>
    %c5_i32 = arith.constant 5 : i32
    %272 = vector.shape_cast %271 : vector<64x1xf32> to vector<1x64x1xf32>
    %cst_58 = arith.constant dense<0xFF800000> : vector<1xf32>
    %273 = vector.multi_reduction <maximumf>, %272, %cst_58 [1, 2] : vector<1x64x1xf32> to vector<1xf32>
    %274 = vector.shape_cast %273 : vector<1xf32> to vector<1x1x1xf32>
    %275 = vector.extract %274[0, 0, 0] : f32 from vector<1x1x1xf32>
    %276 = vector.broadcast %275 : f32 to vector<64x1xf32>
    %277 = arith.cmpf oeq, %271, %276 : vector<64x1xf32>
    %278 = vector.broadcast %c64_i32 : i32 to vector<64x1xi32>
    %279 = arith.select %277, %4, %278 : vector<64x1xi1>, vector<64x1xi32>
    %280 = vector.shape_cast %279 : vector<64x1xi32> to vector<1x64x1xi32>
    %cst_59 = arith.constant dense<2147483647> : vector<1xi32>
    %281 = vector.multi_reduction <minsi>, %280, %cst_59 [1, 2] : vector<1x64x1xi32> to vector<1xi32>
    %282 = vector.shape_cast %281 : vector<1xi32> to vector<1x1x1xi32>
    %283 = vector.extract %282[0, 0, 0] : i32 from vector<1x1x1xi32>
    %284 = arith.index_cast %283 : i32 to index
    %c0_60 = arith.constant 0 : index
    %285 = vector.load %arg5[%284, %c0_60] : memref<64x128xf32, #tpu.memory_space<vmem>>, vector<1x128xf32>
    %286 = vector.broadcast %275 : f32 to vector<1x128xf32>
    %287 = arith.cmpf oeq, %285, %286 : vector<1x128xf32>
    %288 = vector.broadcast %c128_i32 : i32 to vector<1x128xi32>
    %289 = arith.select %287, %3, %288 : vector<1x128xi1>, vector<1x128xi32>
    %290 = vector.shape_cast %289 : vector<1x128xi32> to vector<1x1x128xi32>
    %cst_61 = arith.constant dense<2147483647> : vector<1xi32>
    %291 = vector.multi_reduction <minsi>, %290, %cst_61 [1, 2] : vector<1x1x128xi32> to vector<1xi32>
    %292 = vector.shape_cast %291 : vector<1xi32> to vector<1x1x1xi32>
    %293 = vector.extract %292[0, 0, 0] : i32 from vector<1x1x1xi32>
    %c128_i32_62 = arith.constant 128 : i32
    %294 = arith.muli %283, %c128_i32_62 : i32
    %295 = arith.addi %294, %293 : i32
    %c3_i32_63 = arith.constant 3 : i32
    %296 = arith.shrsi %295, %c3_i32_63 : i32
    %c7_i32_64 = arith.constant 7 : i32
    %297 = arith.andi %295, %c7_i32_64 : i32
    %298 = vector.broadcast %c5_i32 : i32 to vector<1x128xi32>
    %299 = arith.cmpi eq, %5, %298 : vector<1x128xi32>
    %300 = vector.broadcast %275 : f32 to vector<1x128xf32>
    %301 = arith.select %299, %300, %249 : vector<1x128xi1>, vector<1x128xf32>
    %302 = vector.broadcast %c5_i32 : i32 to vector<1x128xi32>
    %303 = arith.cmpi eq, %5, %302 : vector<1x128xi32>
    %304 = vector.broadcast %296 : i32 to vector<1x128xi32>
    %305 = arith.select %303, %304, %253 : vector<1x128xi1>, vector<1x128xi32>
    %306 = vector.broadcast %c5_i32 : i32 to vector<1x128xi32>
    %307 = arith.cmpi eq, %5, %306 : vector<1x128xi32>
    %308 = vector.broadcast %297 : i32 to vector<1x128xi32>
    %309 = arith.select %307, %308, %257 : vector<1x128xi1>, vector<1x128xi32>
    %310 = vector.broadcast %293 : i32 to vector<1x128xi32>
    %311 = arith.cmpi eq, %3, %310 : vector<1x128xi32>
    %cst_65 = arith.constant 0xFF800000 : f32
    %312 = vector.broadcast %cst_65 : f32 to vector<1x128xf32>
    %313 = arith.select %311, %312, %285 : vector<1x128xi1>, vector<1x128xf32>
    %314 = arith.index_cast %283 : i32 to index
    %c0_66 = arith.constant 0 : index
    %315 = vector.load %arg5[%314, %c0_66] : memref<64x128xf32, #tpu.memory_space<vmem>>, vector<1x128xf32>
    tpu.vector_store %arg5[%314, %c0_66], %313 {strides = array<i32>} : memref<64x128xf32, #tpu.memory_space<vmem>>, vector<1x128xf32>,
    %316 = vector.broadcast %283 : i32 to vector<64x1xi32>
    %317 = arith.cmpi eq, %4, %316 : vector<64x1xi32>
    %318 = vector.shape_cast %313 : vector<1x128xf32> to vector<1x1x128xf32>
    %cst_67 = arith.constant dense<0xFF800000> : vector<1xf32>
    %319 = vector.multi_reduction <maximumf>, %318, %cst_67 [1, 2] : vector<1x1x128xf32> to vector<1xf32>
    %320 = vector.shape_cast %319 : vector<1xf32> to vector<1x1x1xf32>
    %321 = vector.extract %320[0, 0, 0] : f32 from vector<1x1x1xf32>
    %322 = vector.broadcast %321 : f32 to vector<64x1xf32>
    %323 = arith.select %317, %322, %271 : vector<64x1xi1>, vector<64x1xf32>
    %c6_i32 = arith.constant 6 : i32
    %324 = vector.shape_cast %323 : vector<64x1xf32> to vector<1x64x1xf32>
    %cst_68 = arith.constant dense<0xFF800000> : vector<1xf32>
    %325 = vector.multi_reduction <maximumf>, %324, %cst_68 [1, 2] : vector<1x64x1xf32> to vector<1xf32>
    %326 = vector.shape_cast %325 : vector<1xf32> to vector<1x1x1xf32>
    %327 = vector.extract %326[0, 0, 0] : f32 from vector<1x1x1xf32>
    %328 = vector.broadcast %327 : f32 to vector<64x1xf32>
    %329 = arith.cmpf oeq, %323, %328 : vector<64x1xf32>
    %330 = vector.broadcast %c64_i32 : i32 to vector<64x1xi32>
    %331 = arith.select %329, %4, %330 : vector<64x1xi1>, vector<64x1xi32>
    %332 = vector.shape_cast %331 : vector<64x1xi32> to vector<1x64x1xi32>
    %cst_69 = arith.constant dense<2147483647> : vector<1xi32>
    %333 = vector.multi_reduction <minsi>, %332, %cst_69 [1, 2] : vector<1x64x1xi32> to vector<1xi32>
    %334 = vector.shape_cast %333 : vector<1xi32> to vector<1x1x1xi32>
    %335 = vector.extract %334[0, 0, 0] : i32 from vector<1x1x1xi32>
    %336 = arith.index_cast %335 : i32 to index
    %c0_70 = arith.constant 0 : index
    %337 = vector.load %arg5[%336, %c0_70] : memref<64x128xf32, #tpu.memory_space<vmem>>, vector<1x128xf32>
    %338 = vector.broadcast %327 : f32 to vector<1x128xf32>
    %339 = arith.cmpf oeq, %337, %338 : vector<1x128xf32>
    %340 = vector.broadcast %c128_i32 : i32 to vector<1x128xi32>
    %341 = arith.select %339, %3, %340 : vector<1x128xi1>, vector<1x128xi32>
    %342 = vector.shape_cast %341 : vector<1x128xi32> to vector<1x1x128xi32>
    %cst_71 = arith.constant dense<2147483647> : vector<1xi32>
    %343 = vector.multi_reduction <minsi>, %342, %cst_71 [1, 2] : vector<1x1x128xi32> to vector<1xi32>
    %344 = vector.shape_cast %343 : vector<1xi32> to vector<1x1x1xi32>
    %345 = vector.extract %344[0, 0, 0] : i32 from vector<1x1x1xi32>
    %c128_i32_72 = arith.constant 128 : i32
    %346 = arith.muli %335, %c128_i32_72 : i32
    %347 = arith.addi %346, %345 : i32
    %c3_i32_73 = arith.constant 3 : i32
    %348 = arith.shrsi %347, %c3_i32_73 : i32
    %c7_i32_74 = arith.constant 7 : i32
    %349 = arith.andi %347, %c7_i32_74 : i32
    %350 = vector.broadcast %c6_i32 : i32 to vector<1x128xi32>
    %351 = arith.cmpi eq, %5, %350 : vector<1x128xi32>
    %352 = vector.broadcast %327 : f32 to vector<1x128xf32>
    %353 = arith.select %351, %352, %301 : vector<1x128xi1>, vector<1x128xf32>
    %354 = vector.broadcast %c6_i32 : i32 to vector<1x128xi32>
    %355 = arith.cmpi eq, %5, %354 : vector<1x128xi32>
    %356 = vector.broadcast %348 : i32 to vector<1x128xi32>
    %357 = arith.select %355, %356, %305 : vector<1x128xi1>, vector<1x128xi32>
    %358 = vector.broadcast %c6_i32 : i32 to vector<1x128xi32>
    %359 = arith.cmpi eq, %5, %358 : vector<1x128xi32>
    %360 = vector.broadcast %349 : i32 to vector<1x128xi32>
    %361 = arith.select %359, %360, %309 : vector<1x128xi1>, vector<1x128xi32>
    %362 = vector.broadcast %345 : i32 to vector<1x128xi32>
    %363 = arith.cmpi eq, %3, %362 : vector<1x128xi32>
    %cst_75 = arith.constant 0xFF800000 : f32
    %364 = vector.broadcast %cst_75 : f32 to vector<1x128xf32>
    %365 = arith.select %363, %364, %337 : vector<1x128xi1>, vector<1x128xf32>
    %366 = arith.index_cast %335 : i32 to index
    %c0_76 = arith.constant 0 : index
    %367 = vector.load %arg5[%366, %c0_76] : memref<64x128xf32, #tpu.memory_space<vmem>>, vector<1x128xf32>
    tpu.vector_store %arg5[%366, %c0_76], %365 {strides = array<i32>} : memref<64x128xf32, #tpu.memory_space<vmem>>, vector<1x128xf32>,
    %368 = vector.broadcast %335 : i32 to vector<64x1xi32>
    %369 = arith.cmpi eq, %4, %368 : vector<64x1xi32>
    %370 = vector.shape_cast %365 : vector<1x128xf32> to vector<1x1x128xf32>
    %cst_77 = arith.constant dense<0xFF800000> : vector<1xf32>
    %371 = vector.multi_reduction <maximumf>, %370, %cst_77 [1, 2] : vector<1x1x128xf32> to vector<1xf32>
    %372 = vector.shape_cast %371 : vector<1xf32> to vector<1x1x1xf32>
    %373 = vector.extract %372[0, 0, 0] : f32 from vector<1x1x1xf32>
    %374 = vector.broadcast %373 : f32 to vector<64x1xf32>
    %375 = arith.select %369, %374, %323 : vector<64x1xi1>, vector<64x1xf32>
    %c7_i32_78 = arith.constant 7 : i32
    %376 = vector.shape_cast %375 : vector<64x1xf32> to vector<1x64x1xf32>
    %cst_79 = arith.constant dense<0xFF800000> : vector<1xf32>
    %377 = vector.multi_reduction <maximumf>, %376, %cst_79 [1, 2] : vector<1x64x1xf32> to vector<1xf32>
    %378 = vector.shape_cast %377 : vector<1xf32> to vector<1x1x1xf32>
    %379 = vector.extract %378[0, 0, 0] : f32 from vector<1x1x1xf32>
    %380 = vector.broadcast %379 : f32 to vector<64x1xf32>
    %381 = arith.cmpf oeq, %375, %380 : vector<64x1xf32>
    %382 = vector.broadcast %c64_i32 : i32 to vector<64x1xi32>
    %383 = arith.select %381, %4, %382 : vector<64x1xi1>, vector<64x1xi32>
    %384 = vector.shape_cast %383 : vector<64x1xi32> to vector<1x64x1xi32>
    %cst_80 = arith.constant dense<2147483647> : vector<1xi32>
    %385 = vector.multi_reduction <minsi>, %384, %cst_80 [1, 2] : vector<1x64x1xi32> to vector<1xi32>
    %386 = vector.shape_cast %385 : vector<1xi32> to vector<1x1x1xi32>
    %387 = vector.extract %386[0, 0, 0] : i32 from vector<1x1x1xi32>
    %388 = arith.index_cast %387 : i32 to index
    %c0_81 = arith.constant 0 : index
    %389 = vector.load %arg5[%388, %c0_81] : memref<64x128xf32, #tpu.memory_space<vmem>>, vector<1x128xf32>
    %390 = vector.broadcast %379 : f32 to vector<1x128xf32>
    %391 = arith.cmpf oeq, %389, %390 : vector<1x128xf32>
    %392 = vector.broadcast %c128_i32 : i32 to vector<1x128xi32>
    %393 = arith.select %391, %3, %392 : vector<1x128xi1>, vector<1x128xi32>
    %394 = vector.shape_cast %393 : vector<1x128xi32> to vector<1x1x128xi32>
    %cst_82 = arith.constant dense<2147483647> : vector<1xi32>
    %395 = vector.multi_reduction <minsi>, %394, %cst_82 [1, 2] : vector<1x1x128xi32> to vector<1xi32>
    %396 = vector.shape_cast %395 : vector<1xi32> to vector<1x1x1xi32>
    %397 = vector.extract %396[0, 0, 0] : i32 from vector<1x1x1xi32>
    %c128_i32_83 = arith.constant 128 : i32
    %398 = arith.muli %387, %c128_i32_83 : i32
    %399 = arith.addi %398, %397 : i32
    %c3_i32_84 = arith.constant 3 : i32
    %400 = arith.shrsi %399, %c3_i32_84 : i32
    %c7_i32_85 = arith.constant 7 : i32
    %401 = arith.andi %399, %c7_i32_85 : i32
    %402 = vector.broadcast %c7_i32_78 : i32 to vector<1x128xi32>
    %403 = arith.cmpi eq, %5, %402 : vector<1x128xi32>
    %404 = vector.broadcast %379 : f32 to vector<1x128xf32>
    %405 = arith.select %403, %404, %353 : vector<1x128xi1>, vector<1x128xf32>
    %406 = vector.broadcast %c7_i32_78 : i32 to vector<1x128xi32>
    %407 = arith.cmpi eq, %5, %406 : vector<1x128xi32>
    %408 = vector.broadcast %400 : i32 to vector<1x128xi32>
    %409 = arith.select %407, %408, %357 : vector<1x128xi1>, vector<1x128xi32>
    %410 = vector.broadcast %c7_i32_78 : i32 to vector<1x128xi32>
    %411 = arith.cmpi eq, %5, %410 : vector<1x128xi32>
    %412 = vector.broadcast %401 : i32 to vector<1x128xi32>
    %413 = arith.select %411, %412, %361 : vector<1x128xi1>, vector<1x128xi32>
    %414 = vector.broadcast %397 : i32 to vector<1x128xi32>
    %415 = arith.cmpi eq, %3, %414 : vector<1x128xi32>
    %cst_86 = arith.constant 0xFF800000 : f32
    %416 = vector.broadcast %cst_86 : f32 to vector<1x128xf32>
    %417 = arith.select %415, %416, %389 : vector<1x128xi1>, vector<1x128xf32>
    %418 = arith.index_cast %387 : i32 to index
    %c0_87 = arith.constant 0 : index
    %419 = vector.load %arg5[%418, %c0_87] : memref<64x128xf32, #tpu.memory_space<vmem>>, vector<1x128xf32>
    tpu.vector_store %arg5[%418, %c0_87], %417 {strides = array<i32>} : memref<64x128xf32, #tpu.memory_space<vmem>>, vector<1x128xf32>,
    %420 = vector.broadcast %387 : i32 to vector<64x1xi32>
    %421 = arith.cmpi eq, %4, %420 : vector<64x1xi32>
    %422 = vector.shape_cast %417 : vector<1x128xf32> to vector<1x1x128xf32>
    %cst_88 = arith.constant dense<0xFF800000> : vector<1xf32>
    %423 = vector.multi_reduction <maximumf>, %422, %cst_88 [1, 2] : vector<1x1x128xf32> to vector<1xf32>
    %424 = vector.shape_cast %423 : vector<1xf32> to vector<1x1x1xf32>
    %425 = vector.extract %424[0, 0, 0] : f32 from vector<1x1x1xf32>
    %426 = vector.broadcast %425 : f32 to vector<64x1xf32>
    %427 = arith.select %421, %426, %375 : vector<64x1xi1>, vector<64x1xf32>
    %c8_i32 = arith.constant 8 : i32
    %428 = vector.shape_cast %427 : vector<64x1xf32> to vector<1x64x1xf32>
    %cst_89 = arith.constant dense<0xFF800000> : vector<1xf32>
    %429 = vector.multi_reduction <maximumf>, %428, %cst_89 [1, 2] : vector<1x64x1xf32> to vector<1xf32>
    %430 = vector.shape_cast %429 : vector<1xf32> to vector<1x1x1xf32>
    %431 = vector.extract %430[0, 0, 0] : f32 from vector<1x1x1xf32>
    %432 = vector.broadcast %431 : f32 to vector<64x1xf32>
    %433 = arith.cmpf oeq, %427, %432 : vector<64x1xf32>
    %434 = vector.broadcast %c64_i32 : i32 to vector<64x1xi32>
    %435 = arith.select %433, %4, %434 : vector<64x1xi1>, vector<64x1xi32>
    %436 = vector.shape_cast %435 : vector<64x1xi32> to vector<1x64x1xi32>
    %cst_90 = arith.constant dense<2147483647> : vector<1xi32>
    %437 = vector.multi_reduction <minsi>, %436, %cst_90 [1, 2] : vector<1x64x1xi32> to vector<1xi32>
    %438 = vector.shape_cast %437 : vector<1xi32> to vector<1x1x1xi32>
    %439 = vector.extract %438[0, 0, 0] : i32 from vector<1x1x1xi32>
    %440 = arith.index_cast %439 : i32 to index
    %c0_91 = arith.constant 0 : index
    %441 = vector.load %arg5[%440, %c0_91] : memref<64x128xf32, #tpu.memory_space<vmem>>, vector<1x128xf32>
    %442 = vector.broadcast %431 : f32 to vector<1x128xf32>
    %443 = arith.cmpf oeq, %441, %442 : vector<1x128xf32>
    %444 = vector.broadcast %c128_i32 : i32 to vector<1x128xi32>
    %445 = arith.select %443, %3, %444 : vector<1x128xi1>, vector<1x128xi32>
    %446 = vector.shape_cast %445 : vector<1x128xi32> to vector<1x1x128xi32>
    %cst_92 = arith.constant dense<2147483647> : vector<1xi32>
    %447 = vector.multi_reduction <minsi>, %446, %cst_92 [1, 2] : vector<1x1x128xi32> to vector<1xi32>
    %448 = vector.shape_cast %447 : vector<1xi32> to vector<1x1x1xi32>
    %449 = vector.extract %448[0, 0, 0] : i32 from vector<1x1x1xi32>
    %c128_i32_93 = arith.constant 128 : i32
    %450 = arith.muli %439, %c128_i32_93 : i32
    %451 = arith.addi %450, %449 : i32
    %c3_i32_94 = arith.constant 3 : i32
    %452 = arith.shrsi %451, %c3_i32_94 : i32
    %c7_i32_95 = arith.constant 7 : i32
    %453 = arith.andi %451, %c7_i32_95 : i32
    %454 = vector.broadcast %c8_i32 : i32 to vector<1x128xi32>
    %455 = arith.cmpi eq, %5, %454 : vector<1x128xi32>
    %456 = vector.broadcast %431 : f32 to vector<1x128xf32>
    %457 = arith.select %455, %456, %405 : vector<1x128xi1>, vector<1x128xf32>
    %458 = vector.broadcast %c8_i32 : i32 to vector<1x128xi32>
    %459 = arith.cmpi eq, %5, %458 : vector<1x128xi32>
    %460 = vector.broadcast %452 : i32 to vector<1x128xi32>
    %461 = arith.select %459, %460, %409 : vector<1x128xi1>, vector<1x128xi32>
    %462 = vector.broadcast %c8_i32 : i32 to vector<1x128xi32>
    %463 = arith.cmpi eq, %5, %462 : vector<1x128xi32>
    %464 = vector.broadcast %453 : i32 to vector<1x128xi32>
    %465 = arith.select %463, %464, %413 : vector<1x128xi1>, vector<1x128xi32>
    %466 = vector.broadcast %449 : i32 to vector<1x128xi32>
    %467 = arith.cmpi eq, %3, %466 : vector<1x128xi32>
    %cst_96 = arith.constant 0xFF800000 : f32
    %468 = vector.broadcast %cst_96 : f32 to vector<1x128xf32>
    %469 = arith.select %467, %468, %441 : vector<1x128xi1>, vector<1x128xf32>
    %470 = arith.index_cast %439 : i32 to index
    %c0_97 = arith.constant 0 : index
    %471 = vector.load %arg5[%470, %c0_97] : memref<64x128xf32, #tpu.memory_space<vmem>>, vector<1x128xf32>
    tpu.vector_store %arg5[%470, %c0_97], %469 {strides = array<i32>} : memref<64x128xf32, #tpu.memory_space<vmem>>, vector<1x128xf32>,
    %472 = vector.broadcast %439 : i32 to vector<64x1xi32>
    %473 = arith.cmpi eq, %4, %472 : vector<64x1xi32>
    %474 = vector.shape_cast %469 : vector<1x128xf32> to vector<1x1x128xf32>
    %cst_98 = arith.constant dense<0xFF800000> : vector<1xf32>
    %475 = vector.multi_reduction <maximumf>, %474, %cst_98 [1, 2] : vector<1x1x128xf32> to vector<1xf32>
    %476 = vector.shape_cast %475 : vector<1xf32> to vector<1x1x1xf32>
    %477 = vector.extract %476[0, 0, 0] : f32 from vector<1x1x1xf32>
    %478 = vector.broadcast %477 : f32 to vector<64x1xf32>
    %479 = arith.select %473, %478, %427 : vector<64x1xi1>, vector<64x1xf32>
    %c9_i32 = arith.constant 9 : i32
    %480 = vector.shape_cast %479 : vector<64x1xf32> to vector<1x64x1xf32>
    %cst_99 = arith.constant dense<0xFF800000> : vector<1xf32>
    %481 = vector.multi_reduction <maximumf>, %480, %cst_99 [1, 2] : vector<1x64x1xf32> to vector<1xf32>
    %482 = vector.shape_cast %481 : vector<1xf32> to vector<1x1x1xf32>
    %483 = vector.extract %482[0, 0, 0] : f32 from vector<1x1x1xf32>
    %484 = vector.broadcast %483 : f32 to vector<64x1xf32>
    %485 = arith.cmpf oeq, %479, %484 : vector<64x1xf32>
    %486 = vector.broadcast %c64_i32 : i32 to vector<64x1xi32>
    %487 = arith.select %485, %4, %486 : vector<64x1xi1>, vector<64x1xi32>
    %488 = vector.shape_cast %487 : vector<64x1xi32> to vector<1x64x1xi32>
    %cst_100 = arith.constant dense<2147483647> : vector<1xi32>
    %489 = vector.multi_reduction <minsi>, %488, %cst_100 [1, 2] : vector<1x64x1xi32> to vector<1xi32>
    %490 = vector.shape_cast %489 : vector<1xi32> to vector<1x1x1xi32>
    %491 = vector.extract %490[0, 0, 0] : i32 from vector<1x1x1xi32>
    %492 = arith.index_cast %491 : i32 to index
    %c0_101 = arith.constant 0 : index
    %493 = vector.load %arg5[%492, %c0_101] : memref<64x128xf32, #tpu.memory_space<vmem>>, vector<1x128xf32>
    %494 = vector.broadcast %483 : f32 to vector<1x128xf32>
    %495 = arith.cmpf oeq, %493, %494 : vector<1x128xf32>
    %496 = vector.broadcast %c128_i32 : i32 to vector<1x128xi32>
    %497 = arith.select %495, %3, %496 : vector<1x128xi1>, vector<1x128xi32>
    %498 = vector.shape_cast %497 : vector<1x128xi32> to vector<1x1x128xi32>
    %cst_102 = arith.constant dense<2147483647> : vector<1xi32>
    %499 = vector.multi_reduction <minsi>, %498, %cst_102 [1, 2] : vector<1x1x128xi32> to vector<1xi32>
    %500 = vector.shape_cast %499 : vector<1xi32> to vector<1x1x1xi32>
    %501 = vector.extract %500[0, 0, 0] : i32 from vector<1x1x1xi32>
    %c128_i32_103 = arith.constant 128 : i32
    %502 = arith.muli %491, %c128_i32_103 : i32
    %503 = arith.addi %502, %501 : i32
    %c3_i32_104 = arith.constant 3 : i32
    %504 = arith.shrsi %503, %c3_i32_104 : i32
    %c7_i32_105 = arith.constant 7 : i32
    %505 = arith.andi %503, %c7_i32_105 : i32
    %506 = vector.broadcast %c9_i32 : i32 to vector<1x128xi32>
    %507 = arith.cmpi eq, %5, %506 : vector<1x128xi32>
    %508 = vector.broadcast %483 : f32 to vector<1x128xf32>
    %509 = arith.select %507, %508, %457 : vector<1x128xi1>, vector<1x128xf32>
    %510 = vector.broadcast %c9_i32 : i32 to vector<1x128xi32>
    %511 = arith.cmpi eq, %5, %510 : vector<1x128xi32>
    %512 = vector.broadcast %504 : i32 to vector<1x128xi32>
    %513 = arith.select %511, %512, %461 : vector<1x128xi1>, vector<1x128xi32>
    %514 = vector.broadcast %c9_i32 : i32 to vector<1x128xi32>
    %515 = arith.cmpi eq, %5, %514 : vector<1x128xi32>
    %516 = vector.broadcast %505 : i32 to vector<1x128xi32>
    %517 = arith.select %515, %516, %465 : vector<1x128xi1>, vector<1x128xi32>
    %518 = vector.broadcast %501 : i32 to vector<1x128xi32>
    %519 = arith.cmpi eq, %3, %518 : vector<1x128xi32>
    %cst_106 = arith.constant 0xFF800000 : f32
    %520 = vector.broadcast %cst_106 : f32 to vector<1x128xf32>
    %521 = arith.select %519, %520, %493 : vector<1x128xi1>, vector<1x128xf32>
    %522 = arith.index_cast %491 : i32 to index
    %c0_107 = arith.constant 0 : index
    %523 = vector.load %arg5[%522, %c0_107] : memref<64x128xf32, #tpu.memory_space<vmem>>, vector<1x128xf32>
    tpu.vector_store %arg5[%522, %c0_107], %521 {strides = array<i32>} : memref<64x128xf32, #tpu.memory_space<vmem>>, vector<1x128xf32>,
    %524 = vector.broadcast %491 : i32 to vector<64x1xi32>
    %525 = arith.cmpi eq, %4, %524 : vector<64x1xi32>
    %526 = vector.shape_cast %521 : vector<1x128xf32> to vector<1x1x128xf32>
    %cst_108 = arith.constant dense<0xFF800000> : vector<1xf32>
    %527 = vector.multi_reduction <maximumf>, %526, %cst_108 [1, 2] : vector<1x1x128xf32> to vector<1xf32>
    %528 = vector.shape_cast %527 : vector<1xf32> to vector<1x1x1xf32>
    %529 = vector.extract %528[0, 0, 0] : f32 from vector<1x1x1xf32>
    %530 = vector.broadcast %529 : f32 to vector<64x1xf32>
    %531 = arith.select %525, %530, %479 : vector<64x1xi1>, vector<64x1xf32>
    %c10_i32 = arith.constant 10 : i32
    %532 = vector.shape_cast %531 : vector<64x1xf32> to vector<1x64x1xf32>
    %cst_109 = arith.constant dense<0xFF800000> : vector<1xf32>
    %533 = vector.multi_reduction <maximumf>, %532, %cst_109 [1, 2] : vector<1x64x1xf32> to vector<1xf32>
    %534 = vector.shape_cast %533 : vector<1xf32> to vector<1x1x1xf32>
    %535 = vector.extract %534[0, 0, 0] : f32 from vector<1x1x1xf32>
    %536 = vector.broadcast %535 : f32 to vector<64x1xf32>
    %537 = arith.cmpf oeq, %531, %536 : vector<64x1xf32>
    %538 = vector.broadcast %c64_i32 : i32 to vector<64x1xi32>
    %539 = arith.select %537, %4, %538 : vector<64x1xi1>, vector<64x1xi32>
    %540 = vector.shape_cast %539 : vector<64x1xi32> to vector<1x64x1xi32>
    %cst_110 = arith.constant dense<2147483647> : vector<1xi32>
    %541 = vector.multi_reduction <minsi>, %540, %cst_110 [1, 2] : vector<1x64x1xi32> to vector<1xi32>
    %542 = vector.shape_cast %541 : vector<1xi32> to vector<1x1x1xi32>
    %543 = vector.extract %542[0, 0, 0] : i32 from vector<1x1x1xi32>
    %544 = arith.index_cast %543 : i32 to index
    %c0_111 = arith.constant 0 : index
    %545 = vector.load %arg5[%544, %c0_111] : memref<64x128xf32, #tpu.memory_space<vmem>>, vector<1x128xf32>
    %546 = vector.broadcast %535 : f32 to vector<1x128xf32>
    %547 = arith.cmpf oeq, %545, %546 : vector<1x128xf32>
    %548 = vector.broadcast %c128_i32 : i32 to vector<1x128xi32>
    %549 = arith.select %547, %3, %548 : vector<1x128xi1>, vector<1x128xi32>
    %550 = vector.shape_cast %549 : vector<1x128xi32> to vector<1x1x128xi32>
    %cst_112 = arith.constant dense<2147483647> : vector<1xi32>
    %551 = vector.multi_reduction <minsi>, %550, %cst_112 [1, 2] : vector<1x1x128xi32> to vector<1xi32>
    %552 = vector.shape_cast %551 : vector<1xi32> to vector<1x1x1xi32>
    %553 = vector.extract %552[0, 0, 0] : i32 from vector<1x1x1xi32>
    %c128_i32_113 = arith.constant 128 : i32
    %554 = arith.muli %543, %c128_i32_113 : i32
    %555 = arith.addi %554, %553 : i32
    %c3_i32_114 = arith.constant 3 : i32
    %556 = arith.shrsi %555, %c3_i32_114 : i32
    %c7_i32_115 = arith.constant 7 : i32
    %557 = arith.andi %555, %c7_i32_115 : i32
    %558 = vector.broadcast %c10_i32 : i32 to vector<1x128xi32>
    %559 = arith.cmpi eq, %5, %558 : vector<1x128xi32>
    %560 = vector.broadcast %535 : f32 to vector<1x128xf32>
    %561 = arith.select %559, %560, %509 : vector<1x128xi1>, vector<1x128xf32>
    %562 = vector.broadcast %c10_i32 : i32 to vector<1x128xi32>
    %563 = arith.cmpi eq, %5, %562 : vector<1x128xi32>
    %564 = vector.broadcast %556 : i32 to vector<1x128xi32>
    %565 = arith.select %563, %564, %513 : vector<1x128xi1>, vector<1x128xi32>
    %566 = vector.broadcast %c10_i32 : i32 to vector<1x128xi32>
    %567 = arith.cmpi eq, %5, %566 : vector<1x128xi32>
    %568 = vector.broadcast %557 : i32 to vector<1x128xi32>
    %569 = arith.select %567, %568, %517 : vector<1x128xi1>, vector<1x128xi32>
    %570 = vector.broadcast %553 : i32 to vector<1x128xi32>
    %571 = arith.cmpi eq, %3, %570 : vector<1x128xi32>
    %cst_116 = arith.constant 0xFF800000 : f32
    %572 = vector.broadcast %cst_116 : f32 to vector<1x128xf32>
    %573 = arith.select %571, %572, %545 : vector<1x128xi1>, vector<1x128xf32>
    %574 = arith.index_cast %543 : i32 to index
    %c0_117 = arith.constant 0 : index
    %575 = vector.load %arg5[%574, %c0_117] : memref<64x128xf32, #tpu.memory_space<vmem>>, vector<1x128xf32>
    tpu.vector_store %arg5[%574, %c0_117], %573 {strides = array<i32>} : memref<64x128xf32, #tpu.memory_space<vmem>>, vector<1x128xf32>,
    %576 = vector.broadcast %543 : i32 to vector<64x1xi32>
    %577 = arith.cmpi eq, %4, %576 : vector<64x1xi32>
    %578 = vector.shape_cast %573 : vector<1x128xf32> to vector<1x1x128xf32>
    %cst_118 = arith.constant dense<0xFF800000> : vector<1xf32>
    %579 = vector.multi_reduction <maximumf>, %578, %cst_118 [1, 2] : vector<1x1x128xf32> to vector<1xf32>
    %580 = vector.shape_cast %579 : vector<1xf32> to vector<1x1x1xf32>
    %581 = vector.extract %580[0, 0, 0] : f32 from vector<1x1x1xf32>
    %582 = vector.broadcast %581 : f32 to vector<64x1xf32>
    %583 = arith.select %577, %582, %531 : vector<64x1xi1>, vector<64x1xf32>
    %c11_i32 = arith.constant 11 : i32
    %584 = vector.shape_cast %583 : vector<64x1xf32> to vector<1x64x1xf32>
    %cst_119 = arith.constant dense<0xFF800000> : vector<1xf32>
    %585 = vector.multi_reduction <maximumf>, %584, %cst_119 [1, 2] : vector<1x64x1xf32> to vector<1xf32>
    %586 = vector.shape_cast %585 : vector<1xf32> to vector<1x1x1xf32>
    %587 = vector.extract %586[0, 0, 0] : f32 from vector<1x1x1xf32>
    %588 = vector.broadcast %587 : f32 to vector<64x1xf32>
    %589 = arith.cmpf oeq, %583, %588 : vector<64x1xf32>
    %590 = vector.broadcast %c64_i32 : i32 to vector<64x1xi32>
    %591 = arith.select %589, %4, %590 : vector<64x1xi1>, vector<64x1xi32>
    %592 = vector.shape_cast %591 : vector<64x1xi32> to vector<1x64x1xi32>
    %cst_120 = arith.constant dense<2147483647> : vector<1xi32>
    %593 = vector.multi_reduction <minsi>, %592, %cst_120 [1, 2] : vector<1x64x1xi32> to vector<1xi32>
    %594 = vector.shape_cast %593 : vector<1xi32> to vector<1x1x1xi32>
    %595 = vector.extract %594[0, 0, 0] : i32 from vector<1x1x1xi32>
    %596 = arith.index_cast %595 : i32 to index
    %c0_121 = arith.constant 0 : index
    %597 = vector.load %arg5[%596, %c0_121] : memref<64x128xf32, #tpu.memory_space<vmem>>, vector<1x128xf32>
    %598 = vector.broadcast %587 : f32 to vector<1x128xf32>
    %599 = arith.cmpf oeq, %597, %598 : vector<1x128xf32>
    %600 = vector.broadcast %c128_i32 : i32 to vector<1x128xi32>
    %601 = arith.select %599, %3, %600 : vector<1x128xi1>, vector<1x128xi32>
    %602 = vector.shape_cast %601 : vector<1x128xi32> to vector<1x1x128xi32>
    %cst_122 = arith.constant dense<2147483647> : vector<1xi32>
    %603 = vector.multi_reduction <minsi>, %602, %cst_122 [1, 2] : vector<1x1x128xi32> to vector<1xi32>
    %604 = vector.shape_cast %603 : vector<1xi32> to vector<1x1x1xi32>
    %605 = vector.extract %604[0, 0, 0] : i32 from vector<1x1x1xi32>
    %c128_i32_123 = arith.constant 128 : i32
    %606 = arith.muli %595, %c128_i32_123 : i32
    %607 = arith.addi %606, %605 : i32
    %c3_i32_124 = arith.constant 3 : i32
    %608 = arith.shrsi %607, %c3_i32_124 : i32
    %c7_i32_125 = arith.constant 7 : i32
    %609 = arith.andi %607, %c7_i32_125 : i32
    %610 = vector.broadcast %c11_i32 : i32 to vector<1x128xi32>
    %611 = arith.cmpi eq, %5, %610 : vector<1x128xi32>
    %612 = vector.broadcast %587 : f32 to vector<1x128xf32>
    %613 = arith.select %611, %612, %561 : vector<1x128xi1>, vector<1x128xf32>
    %614 = vector.broadcast %c11_i32 : i32 to vector<1x128xi32>
    %615 = arith.cmpi eq, %5, %614 : vector<1x128xi32>
    %616 = vector.broadcast %608 : i32 to vector<1x128xi32>
    %617 = arith.select %615, %616, %565 : vector<1x128xi1>, vector<1x128xi32>
    %618 = vector.broadcast %c11_i32 : i32 to vector<1x128xi32>
    %619 = arith.cmpi eq, %5, %618 : vector<1x128xi32>
    %620 = vector.broadcast %609 : i32 to vector<1x128xi32>
    %621 = arith.select %619, %620, %569 : vector<1x128xi1>, vector<1x128xi32>
    %622 = vector.broadcast %605 : i32 to vector<1x128xi32>
    %623 = arith.cmpi eq, %3, %622 : vector<1x128xi32>
    %cst_126 = arith.constant 0xFF800000 : f32
    %624 = vector.broadcast %cst_126 : f32 to vector<1x128xf32>
    %625 = arith.select %623, %624, %597 : vector<1x128xi1>, vector<1x128xf32>
    %626 = arith.index_cast %595 : i32 to index
    %c0_127 = arith.constant 0 : index
    %627 = vector.load %arg5[%626, %c0_127] : memref<64x128xf32, #tpu.memory_space<vmem>>, vector<1x128xf32>
    tpu.vector_store %arg5[%626, %c0_127], %625 {strides = array<i32>} : memref<64x128xf32, #tpu.memory_space<vmem>>, vector<1x128xf32>,
    %628 = vector.broadcast %595 : i32 to vector<64x1xi32>
    %629 = arith.cmpi eq, %4, %628 : vector<64x1xi32>
    %630 = vector.shape_cast %625 : vector<1x128xf32> to vector<1x1x128xf32>
    %cst_128 = arith.constant dense<0xFF800000> : vector<1xf32>
    %631 = vector.multi_reduction <maximumf>, %630, %cst_128 [1, 2] : vector<1x1x128xf32> to vector<1xf32>
    %632 = vector.shape_cast %631 : vector<1xf32> to vector<1x1x1xf32>
    %633 = vector.extract %632[0, 0, 0] : f32 from vector<1x1x1xf32>
    %634 = vector.broadcast %633 : f32 to vector<64x1xf32>
    %635 = arith.select %629, %634, %583 : vector<64x1xi1>, vector<64x1xf32>
    %c12_i32 = arith.constant 12 : i32
    %636 = vector.shape_cast %635 : vector<64x1xf32> to vector<1x64x1xf32>
    %cst_129 = arith.constant dense<0xFF800000> : vector<1xf32>
    %637 = vector.multi_reduction <maximumf>, %636, %cst_129 [1, 2] : vector<1x64x1xf32> to vector<1xf32>
    %638 = vector.shape_cast %637 : vector<1xf32> to vector<1x1x1xf32>
    %639 = vector.extract %638[0, 0, 0] : f32 from vector<1x1x1xf32>
    %640 = vector.broadcast %639 : f32 to vector<64x1xf32>
    %641 = arith.cmpf oeq, %635, %640 : vector<64x1xf32>
    %642 = vector.broadcast %c64_i32 : i32 to vector<64x1xi32>
    %643 = arith.select %641, %4, %642 : vector<64x1xi1>, vector<64x1xi32>
    %644 = vector.shape_cast %643 : vector<64x1xi32> to vector<1x64x1xi32>
    %cst_130 = arith.constant dense<2147483647> : vector<1xi32>
    %645 = vector.multi_reduction <minsi>, %644, %cst_130 [1, 2] : vector<1x64x1xi32> to vector<1xi32>
    %646 = vector.shape_cast %645 : vector<1xi32> to vector<1x1x1xi32>
    %647 = vector.extract %646[0, 0, 0] : i32 from vector<1x1x1xi32>
    %648 = arith.index_cast %647 : i32 to index
    %c0_131 = arith.constant 0 : index
    %649 = vector.load %arg5[%648, %c0_131] : memref<64x128xf32, #tpu.memory_space<vmem>>, vector<1x128xf32>
    %650 = vector.broadcast %639 : f32 to vector<1x128xf32>
    %651 = arith.cmpf oeq, %649, %650 : vector<1x128xf32>
    %652 = vector.broadcast %c128_i32 : i32 to vector<1x128xi32>
    %653 = arith.select %651, %3, %652 : vector<1x128xi1>, vector<1x128xi32>
    %654 = vector.shape_cast %653 : vector<1x128xi32> to vector<1x1x128xi32>
    %cst_132 = arith.constant dense<2147483647> : vector<1xi32>
    %655 = vector.multi_reduction <minsi>, %654, %cst_132 [1, 2] : vector<1x1x128xi32> to vector<1xi32>
    %656 = vector.shape_cast %655 : vector<1xi32> to vector<1x1x1xi32>
    %657 = vector.extract %656[0, 0, 0] : i32 from vector<1x1x1xi32>
    %c128_i32_133 = arith.constant 128 : i32
    %658 = arith.muli %647, %c128_i32_133 : i32
    %659 = arith.addi %658, %657 : i32
    %c3_i32_134 = arith.constant 3 : i32
    %660 = arith.shrsi %659, %c3_i32_134 : i32
    %c7_i32_135 = arith.constant 7 : i32
    %661 = arith.andi %659, %c7_i32_135 : i32
    %662 = vector.broadcast %c12_i32 : i32 to vector<1x128xi32>
    %663 = arith.cmpi eq, %5, %662 : vector<1x128xi32>
    %664 = vector.broadcast %639 : f32 to vector<1x128xf32>
    %665 = arith.select %663, %664, %613 : vector<1x128xi1>, vector<1x128xf32>
    %666 = vector.broadcast %c12_i32 : i32 to vector<1x128xi32>
    %667 = arith.cmpi eq, %5, %666 : vector<1x128xi32>
    %668 = vector.broadcast %660 : i32 to vector<1x128xi32>
    %669 = arith.select %667, %668, %617 : vector<1x128xi1>, vector<1x128xi32>
    %670 = vector.broadcast %c12_i32 : i32 to vector<1x128xi32>
    %671 = arith.cmpi eq, %5, %670 : vector<1x128xi32>
    %672 = vector.broadcast %661 : i32 to vector<1x128xi32>
    %673 = arith.select %671, %672, %621 : vector<1x128xi1>, vector<1x128xi32>
    %674 = vector.broadcast %657 : i32 to vector<1x128xi32>
    %675 = arith.cmpi eq, %3, %674 : vector<1x128xi32>
    %cst_136 = arith.constant 0xFF800000 : f32
    %676 = vector.broadcast %cst_136 : f32 to vector<1x128xf32>
    %677 = arith.select %675, %676, %649 : vector<1x128xi1>, vector<1x128xf32>
    %678 = arith.index_cast %647 : i32 to index
    %c0_137 = arith.constant 0 : index
    %679 = vector.load %arg5[%678, %c0_137] : memref<64x128xf32, #tpu.memory_space<vmem>>, vector<1x128xf32>
    tpu.vector_store %arg5[%678, %c0_137], %677 {strides = array<i32>} : memref<64x128xf32, #tpu.memory_space<vmem>>, vector<1x128xf32>,
    %680 = vector.broadcast %647 : i32 to vector<64x1xi32>
    %681 = arith.cmpi eq, %4, %680 : vector<64x1xi32>
    %682 = vector.shape_cast %677 : vector<1x128xf32> to vector<1x1x128xf32>
    %cst_138 = arith.constant dense<0xFF800000> : vector<1xf32>
    %683 = vector.multi_reduction <maximumf>, %682, %cst_138 [1, 2] : vector<1x1x128xf32> to vector<1xf32>
    %684 = vector.shape_cast %683 : vector<1xf32> to vector<1x1x1xf32>
    %685 = vector.extract %684[0, 0, 0] : f32 from vector<1x1x1xf32>
    %686 = vector.broadcast %685 : f32 to vector<64x1xf32>
    %687 = arith.select %681, %686, %635 : vector<64x1xi1>, vector<64x1xf32>
    %c13_i32 = arith.constant 13 : i32
    %688 = vector.shape_cast %687 : vector<64x1xf32> to vector<1x64x1xf32>
    %cst_139 = arith.constant dense<0xFF800000> : vector<1xf32>
    %689 = vector.multi_reduction <maximumf>, %688, %cst_139 [1, 2] : vector<1x64x1xf32> to vector<1xf32>
    %690 = vector.shape_cast %689 : vector<1xf32> to vector<1x1x1xf32>
    %691 = vector.extract %690[0, 0, 0] : f32 from vector<1x1x1xf32>
    %692 = vector.broadcast %691 : f32 to vector<64x1xf32>
    %693 = arith.cmpf oeq, %687, %692 : vector<64x1xf32>
    %694 = vector.broadcast %c64_i32 : i32 to vector<64x1xi32>
    %695 = arith.select %693, %4, %694 : vector<64x1xi1>, vector<64x1xi32>
    %696 = vector.shape_cast %695 : vector<64x1xi32> to vector<1x64x1xi32>
    %cst_140 = arith.constant dense<2147483647> : vector<1xi32>
    %697 = vector.multi_reduction <minsi>, %696, %cst_140 [1, 2] : vector<1x64x1xi32> to vector<1xi32>
    %698 = vector.shape_cast %697 : vector<1xi32> to vector<1x1x1xi32>
    %699 = vector.extract %698[0, 0, 0] : i32 from vector<1x1x1xi32>
    %700 = arith.index_cast %699 : i32 to index
    %c0_141 = arith.constant 0 : index
    %701 = vector.load %arg5[%700, %c0_141] : memref<64x128xf32, #tpu.memory_space<vmem>>, vector<1x128xf32>
    %702 = vector.broadcast %691 : f32 to vector<1x128xf32>
    %703 = arith.cmpf oeq, %701, %702 : vector<1x128xf32>
    %704 = vector.broadcast %c128_i32 : i32 to vector<1x128xi32>
    %705 = arith.select %703, %3, %704 : vector<1x128xi1>, vector<1x128xi32>
    %706 = vector.shape_cast %705 : vector<1x128xi32> to vector<1x1x128xi32>
    %cst_142 = arith.constant dense<2147483647> : vector<1xi32>
    %707 = vector.multi_reduction <minsi>, %706, %cst_142 [1, 2] : vector<1x1x128xi32> to vector<1xi32>
    %708 = vector.shape_cast %707 : vector<1xi32> to vector<1x1x1xi32>
    %709 = vector.extract %708[0, 0, 0] : i32 from vector<1x1x1xi32>
    %c128_i32_143 = arith.constant 128 : i32
    %710 = arith.muli %699, %c128_i32_143 : i32
    %711 = arith.addi %710, %709 : i32
    %c3_i32_144 = arith.constant 3 : i32
    %712 = arith.shrsi %711, %c3_i32_144 : i32
    %c7_i32_145 = arith.constant 7 : i32
    %713 = arith.andi %711, %c7_i32_145 : i32
    %714 = vector.broadcast %c13_i32 : i32 to vector<1x128xi32>
    %715 = arith.cmpi eq, %5, %714 : vector<1x128xi32>
    %716 = vector.broadcast %691 : f32 to vector<1x128xf32>
    %717 = arith.select %715, %716, %665 : vector<1x128xi1>, vector<1x128xf32>
    %718 = vector.broadcast %c13_i32 : i32 to vector<1x128xi32>
    %719 = arith.cmpi eq, %5, %718 : vector<1x128xi32>
    %720 = vector.broadcast %712 : i32 to vector<1x128xi32>
    %721 = arith.select %719, %720, %669 : vector<1x128xi1>, vector<1x128xi32>
    %722 = vector.broadcast %c13_i32 : i32 to vector<1x128xi32>
    %723 = arith.cmpi eq, %5, %722 : vector<1x128xi32>
    %724 = vector.broadcast %713 : i32 to vector<1x128xi32>
    %725 = arith.select %723, %724, %673 : vector<1x128xi1>, vector<1x128xi32>
    %726 = vector.broadcast %709 : i32 to vector<1x128xi32>
    %727 = arith.cmpi eq, %3, %726 : vector<1x128xi32>
    %cst_146 = arith.constant 0xFF800000 : f32
    %728 = vector.broadcast %cst_146 : f32 to vector<1x128xf32>
    %729 = arith.select %727, %728, %701 : vector<1x128xi1>, vector<1x128xf32>
    %730 = arith.index_cast %699 : i32 to index
    %c0_147 = arith.constant 0 : index
    %731 = vector.load %arg5[%730, %c0_147] : memref<64x128xf32, #tpu.memory_space<vmem>>, vector<1x128xf32>
    tpu.vector_store %arg5[%730, %c0_147], %729 {strides = array<i32>} : memref<64x128xf32, #tpu.memory_space<vmem>>, vector<1x128xf32>,
    %732 = vector.broadcast %699 : i32 to vector<64x1xi32>
    %733 = arith.cmpi eq, %4, %732 : vector<64x1xi32>
    %734 = vector.shape_cast %729 : vector<1x128xf32> to vector<1x1x128xf32>
    %cst_148 = arith.constant dense<0xFF800000> : vector<1xf32>
    %735 = vector.multi_reduction <maximumf>, %734, %cst_148 [1, 2] : vector<1x1x128xf32> to vector<1xf32>
    %736 = vector.shape_cast %735 : vector<1xf32> to vector<1x1x1xf32>
    %737 = vector.extract %736[0, 0, 0] : f32 from vector<1x1x1xf32>
    %738 = vector.broadcast %737 : f32 to vector<64x1xf32>
    %739 = arith.select %733, %738, %687 : vector<64x1xi1>, vector<64x1xf32>
    %c14_i32 = arith.constant 14 : i32
    %740 = vector.shape_cast %739 : vector<64x1xf32> to vector<1x64x1xf32>
    %cst_149 = arith.constant dense<0xFF800000> : vector<1xf32>
    %741 = vector.multi_reduction <maximumf>, %740, %cst_149 [1, 2] : vector<1x64x1xf32> to vector<1xf32>
    %742 = vector.shape_cast %741 : vector<1xf32> to vector<1x1x1xf32>
    %743 = vector.extract %742[0, 0, 0] : f32 from vector<1x1x1xf32>
    %744 = vector.broadcast %743 : f32 to vector<64x1xf32>
    %745 = arith.cmpf oeq, %739, %744 : vector<64x1xf32>
    %746 = vector.broadcast %c64_i32 : i32 to vector<64x1xi32>
    %747 = arith.select %745, %4, %746 : vector<64x1xi1>, vector<64x1xi32>
    %748 = vector.shape_cast %747 : vector<64x1xi32> to vector<1x64x1xi32>
    %cst_150 = arith.constant dense<2147483647> : vector<1xi32>
    %749 = vector.multi_reduction <minsi>, %748, %cst_150 [1, 2] : vector<1x64x1xi32> to vector<1xi32>
    %750 = vector.shape_cast %749 : vector<1xi32> to vector<1x1x1xi32>
    %751 = vector.extract %750[0, 0, 0] : i32 from vector<1x1x1xi32>
    %752 = arith.index_cast %751 : i32 to index
    %c0_151 = arith.constant 0 : index
    %753 = vector.load %arg5[%752, %c0_151] : memref<64x128xf32, #tpu.memory_space<vmem>>, vector<1x128xf32>
    %754 = vector.broadcast %743 : f32 to vector<1x128xf32>
    %755 = arith.cmpf oeq, %753, %754 : vector<1x128xf32>
    %756 = vector.broadcast %c128_i32 : i32 to vector<1x128xi32>
    %757 = arith.select %755, %3, %756 : vector<1x128xi1>, vector<1x128xi32>
    %758 = vector.shape_cast %757 : vector<1x128xi32> to vector<1x1x128xi32>
    %cst_152 = arith.constant dense<2147483647> : vector<1xi32>
    %759 = vector.multi_reduction <minsi>, %758, %cst_152 [1, 2] : vector<1x1x128xi32> to vector<1xi32>
    %760 = vector.shape_cast %759 : vector<1xi32> to vector<1x1x1xi32>
    %761 = vector.extract %760[0, 0, 0] : i32 from vector<1x1x1xi32>
    %c128_i32_153 = arith.constant 128 : i32
    %762 = arith.muli %751, %c128_i32_153 : i32
    %763 = arith.addi %762, %761 : i32
    %c3_i32_154 = arith.constant 3 : i32
    %764 = arith.shrsi %763, %c3_i32_154 : i32
    %c7_i32_155 = arith.constant 7 : i32
    %765 = arith.andi %763, %c7_i32_155 : i32
    %766 = vector.broadcast %c14_i32 : i32 to vector<1x128xi32>
    %767 = arith.cmpi eq, %5, %766 : vector<1x128xi32>
    %768 = vector.broadcast %743 : f32 to vector<1x128xf32>
    %769 = arith.select %767, %768, %717 : vector<1x128xi1>, vector<1x128xf32>
    %770 = vector.broadcast %c14_i32 : i32 to vector<1x128xi32>
    %771 = arith.cmpi eq, %5, %770 : vector<1x128xi32>
    %772 = vector.broadcast %764 : i32 to vector<1x128xi32>
    %773 = arith.select %771, %772, %721 : vector<1x128xi1>, vector<1x128xi32>
    %774 = vector.broadcast %c14_i32 : i32 to vector<1x128xi32>
    %775 = arith.cmpi eq, %5, %774 : vector<1x128xi32>
    %776 = vector.broadcast %765 : i32 to vector<1x128xi32>
    %777 = arith.select %775, %776, %725 : vector<1x128xi1>, vector<1x128xi32>
    %778 = vector.broadcast %761 : i32 to vector<1x128xi32>
    %779 = arith.cmpi eq, %3, %778 : vector<1x128xi32>
    %cst_156 = arith.constant 0xFF800000 : f32
    %780 = vector.broadcast %cst_156 : f32 to vector<1x128xf32>
    %781 = arith.select %779, %780, %753 : vector<1x128xi1>, vector<1x128xf32>
    %782 = arith.index_cast %751 : i32 to index
    %c0_157 = arith.constant 0 : index
    %783 = vector.load %arg5[%782, %c0_157] : memref<64x128xf32, #tpu.memory_space<vmem>>, vector<1x128xf32>
    tpu.vector_store %arg5[%782, %c0_157], %781 {strides = array<i32>} : memref<64x128xf32, #tpu.memory_space<vmem>>, vector<1x128xf32>,
    %784 = vector.broadcast %751 : i32 to vector<64x1xi32>
    %785 = arith.cmpi eq, %4, %784 : vector<64x1xi32>
    %786 = vector.shape_cast %781 : vector<1x128xf32> to vector<1x1x128xf32>
    %cst_158 = arith.constant dense<0xFF800000> : vector<1xf32>
    %787 = vector.multi_reduction <maximumf>, %786, %cst_158 [1, 2] : vector<1x1x128xf32> to vector<1xf32>
    %788 = vector.shape_cast %787 : vector<1xf32> to vector<1x1x1xf32>
    %789 = vector.extract %788[0, 0, 0] : f32 from vector<1x1x1xf32>
    %790 = vector.broadcast %789 : f32 to vector<64x1xf32>
    %791 = arith.select %785, %790, %739 : vector<64x1xi1>, vector<64x1xf32>
    %c15_i32 = arith.constant 15 : i32
    %792 = vector.shape_cast %791 : vector<64x1xf32> to vector<1x64x1xf32>
    %cst_159 = arith.constant dense<0xFF800000> : vector<1xf32>
    %793 = vector.multi_reduction <maximumf>, %792, %cst_159 [1, 2] : vector<1x64x1xf32> to vector<1xf32>
    %794 = vector.shape_cast %793 : vector<1xf32> to vector<1x1x1xf32>
    %795 = vector.extract %794[0, 0, 0] : f32 from vector<1x1x1xf32>
    %796 = vector.broadcast %795 : f32 to vector<64x1xf32>
    %797 = arith.cmpf oeq, %791, %796 : vector<64x1xf32>
    %798 = vector.broadcast %c64_i32 : i32 to vector<64x1xi32>
    %799 = arith.select %797, %4, %798 : vector<64x1xi1>, vector<64x1xi32>
    %800 = vector.shape_cast %799 : vector<64x1xi32> to vector<1x64x1xi32>
    %cst_160 = arith.constant dense<2147483647> : vector<1xi32>
    %801 = vector.multi_reduction <minsi>, %800, %cst_160 [1, 2] : vector<1x64x1xi32> to vector<1xi32>
    %802 = vector.shape_cast %801 : vector<1xi32> to vector<1x1x1xi32>
    %803 = vector.extract %802[0, 0, 0] : i32 from vector<1x1x1xi32>
    %804 = arith.index_cast %803 : i32 to index
    %c0_161 = arith.constant 0 : index
    %805 = vector.load %arg5[%804, %c0_161] : memref<64x128xf32, #tpu.memory_space<vmem>>, vector<1x128xf32>
    %806 = vector.broadcast %795 : f32 to vector<1x128xf32>
    %807 = arith.cmpf oeq, %805, %806 : vector<1x128xf32>
    %808 = vector.broadcast %c128_i32 : i32 to vector<1x128xi32>
    %809 = arith.select %807, %3, %808 : vector<1x128xi1>, vector<1x128xi32>
    %810 = vector.shape_cast %809 : vector<1x128xi32> to vector<1x1x128xi32>
    %cst_162 = arith.constant dense<2147483647> : vector<1xi32>
    %811 = vector.multi_reduction <minsi>, %810, %cst_162 [1, 2] : vector<1x1x128xi32> to vector<1xi32>
    %812 = vector.shape_cast %811 : vector<1xi32> to vector<1x1x1xi32>
    %813 = vector.extract %812[0, 0, 0] : i32 from vector<1x1x1xi32>
    %c128_i32_163 = arith.constant 128 : i32
    %814 = arith.muli %803, %c128_i32_163 : i32
    %815 = arith.addi %814, %813 : i32
    %c3_i32_164 = arith.constant 3 : i32
    %816 = arith.shrsi %815, %c3_i32_164 : i32
    %c7_i32_165 = arith.constant 7 : i32
    %817 = arith.andi %815, %c7_i32_165 : i32
    %818 = vector.broadcast %c15_i32 : i32 to vector<1x128xi32>
    %819 = arith.cmpi eq, %5, %818 : vector<1x128xi32>
    %820 = vector.broadcast %795 : f32 to vector<1x128xf32>
    %821 = arith.select %819, %820, %769 : vector<1x128xi1>, vector<1x128xf32>
    %822 = vector.broadcast %c15_i32 : i32 to vector<1x128xi32>
    %823 = arith.cmpi eq, %5, %822 : vector<1x128xi32>
    %824 = vector.broadcast %816 : i32 to vector<1x128xi32>
    %825 = arith.select %823, %824, %773 : vector<1x128xi1>, vector<1x128xi32>
    %826 = vector.broadcast %c15_i32 : i32 to vector<1x128xi32>
    %827 = arith.cmpi eq, %5, %826 : vector<1x128xi32>
    %828 = vector.broadcast %817 : i32 to vector<1x128xi32>
    %829 = arith.select %827, %828, %777 : vector<1x128xi1>, vector<1x128xi32>
    %830 = vector.broadcast %813 : i32 to vector<1x128xi32>
    %831 = arith.cmpi eq, %3, %830 : vector<1x128xi32>
    %cst_166 = arith.constant 0xFF800000 : f32
    %832 = vector.broadcast %cst_166 : f32 to vector<1x128xf32>
    %833 = arith.select %831, %832, %805 : vector<1x128xi1>, vector<1x128xf32>
    %834 = arith.index_cast %803 : i32 to index
    %c0_167 = arith.constant 0 : index
    %835 = vector.load %arg5[%834, %c0_167] : memref<64x128xf32, #tpu.memory_space<vmem>>, vector<1x128xf32>
    tpu.vector_store %arg5[%834, %c0_167], %833 {strides = array<i32>} : memref<64x128xf32, #tpu.memory_space<vmem>>, vector<1x128xf32>,
    %836 = vector.broadcast %803 : i32 to vector<64x1xi32>
    %837 = arith.cmpi eq, %4, %836 : vector<64x1xi32>
    %838 = vector.shape_cast %833 : vector<1x128xf32> to vector<1x1x128xf32>
    %cst_168 = arith.constant dense<0xFF800000> : vector<1xf32>
    %839 = vector.multi_reduction <maximumf>, %838, %cst_168 [1, 2] : vector<1x1x128xf32> to vector<1xf32>
    %840 = vector.shape_cast %839 : vector<1xf32> to vector<1x1x1xf32>
    %841 = vector.extract %840[0, 0, 0] : f32 from vector<1x1x1xf32>
    %842 = vector.broadcast %841 : f32 to vector<64x1xf32>
    %843 = arith.select %837, %842, %791 : vector<64x1xi1>, vector<64x1xf32>
    %c16_i32 = arith.constant 16 : i32
    %c0_169 = arith.constant 0 : index
    %c0_170 = arith.constant 0 : index
    %c0_171 = arith.constant 0 : index
    %844 = vector.load %arg2[%c0_169, %c0_170, %c0_171] : memref<1x1x128xf32, #tpu.memory_space<vmem>>, vector<1x1x128xf32>
    %845 = vector.shape_cast %844 : vector<1x1x128xf32> to vector<1x128xf32>
    %846 = vector.shape_cast %821 : vector<1x128xf32> to vector<1x1x128xf32>
    tpu.vector_store %arg2[%c0_169, %c0_170, %c0_171], %846 {strides = array<i32>} : memref<1x1x128xf32, #tpu.memory_space<vmem>>, vector<1x1x128xf32>,
    %c0_172 = arith.constant 0 : index
    %c0_173 = arith.constant 0 : index
    %c0_174 = arith.constant 0 : index
    %847 = vector.load %arg3[%c0_172, %c0_173, %c0_174] : memref<1x1x128xi32, #tpu.memory_space<vmem>>, vector<1x1x128xi32>
    %848 = vector.shape_cast %847 : vector<1x1x128xi32> to vector<1x128xi32>
    %849 = vector.shape_cast %825 : vector<1x128xi32> to vector<1x1x128xi32>
    tpu.vector_store %arg3[%c0_172, %c0_173, %c0_174], %849 {strides = array<i32>} : memref<1x1x128xi32, #tpu.memory_space<vmem>>, vector<1x1x128xi32>,
    %c0_175 = arith.constant 0 : index
    %c0_176 = arith.constant 0 : index
    %c0_177 = arith.constant 0 : index
    %850 = vector.load %arg4[%c0_175, %c0_176, %c0_177] : memref<1x1x128xi32, #tpu.memory_space<vmem>>, vector<1x1x128xi32>
    %851 = vector.shape_cast %850 : vector<1x1x128xi32> to vector<1x128xi32>
    %852 = vector.shape_cast %829 : vector<1x128xi32> to vector<1x1x128xi32>
    tpu.vector_store %arg4[%c0_175, %c0_176, %c0_177], %852 {strides = array<i32>} : memref<1x1x128xi32, #tpu.memory_space<vmem>>, vector<1x1x128xi32>,
    return
  }
  func.func @transform_0(%arg0: i32) -> (i32, i32, i32) {
    %c0_i32 = arith.constant 0 : i32
    %c0_i32_0 = arith.constant 0 : i32
    %c0_i32_1 = arith.constant 0 : i32
    return %arg0, %c0_i32, %c0_i32_0 : i32, i32, i32
  }
  func.func @transform_1(%arg0: i32) -> (i32, i32, i32) {
    %c0_i32 = arith.constant 0 : i32
    %c0_i32_0 = arith.constant 0 : i32
    %c0_i32_1 = arith.constant 0 : i32
    return %arg0, %c0_i32, %c0_i32_0 : i32, i32, i32
  }
  func.func @transform_2(%arg0: i32) -> (i32, i32, i32) {
    %c0_i32 = arith.constant 0 : i32
    %c0_i32_0 = arith.constant 0 : i32
    %c0_i32_1 = arith.constant 0 : i32
    return %arg0, %c0_i32, %c0_i32_0 : i32, i32, i32
  }
  func.func @transform_3(%arg0: i32) -> (i32, i32, i32) {
    %c0_i32 = arith.constant 0 : i32
    %c0_i32_0 = arith.constant 0 : i32
    %c0_i32_1 = arith.constant 0 : i32
    return %arg0, %c0_i32, %c0_i32_0 : i32, i32, i32
  }
}

</mosaic_0001>

<bundles_post_ra>
// kernel: fwd.6
= control target key start
LH: loop header
LB: loop body
LE: loop exit
PB: predicated region body
PF: predicated region fallthrough
CT: control target
= control target key end

     0   :  { %vm44_vm0 = vcmask 130048   ;;  %s170_s1 = inlined_call_operand.vmem [shape: bf16[16,128], index: 1, kind: input, shape index: {}]   ;;  %s171_s0 = inlined_call_operand.vmem [shape: bf16[32,16], index: 0, kind: input, shape index: {}]   ;;  %s172_s2 = inlined_call_operand.vmem [shape: f32[1,128], index: 2, kind: input, shape index: {}]   ;;  %s173_s3 = inlined_call_operand.vmem [shape: f32[32,128], index: 3, kind: output, shape index: {}]  }
   0x1   :  { %v123_v0 = vld [vmem:[%s170_s1] sm:$0xff]   ;;  %v125_v2 = vld [vmem:[%s171_s0 + $0x8] sm:$0xff]  }
   0x2   :  { %v124_v1 = vld [vmem:[%s171_s0] sm:$0xff]   ;;  %117 = vmatprep.subr.bf16.mxu0 %v123_v0 }
   0x3   :  { %118 = vmatpush3.bf16.msra.mxu0 %v123_v0  ;;  %119 = vmatprep.mubr.msk.bf16.mxu0 %vm44_vm0, %v124_v1  ;;  %v108_v3 = vld [vmem:[%s172_s2] ss:$0 sm:$0xff] }
   0x6   :  { %120 = vmatmul.mubr.msk.bf16.vlgmr.msra.gmra.mxu0 %vm44_vm0, %v125_v2 }
  0xc6   :  { %v121_v4 = vpop.f32.mrf.mxu0 }
  0xc7   :  { %v94_v5 = vadd.f32 %v121_v4, %v108_v3 }
  0xc8   :  { %v85_v6 = vpop.f32.mrf.mxu0 }
  0xc9   :  { %102 = vst [vmem:[%s173_s3 + $0x10] sm:$0xff] %v94_v5  ;;  %v86_v7 = vadd.f32 %v108_v3, %v85_v6 }
  0xca   :  { %v122_v8 = vpop.f32.mrf.mxu0 }
  0xcb   :  { %100 = vst [vmem:[%s173_s3] sm:$0xff] %v86_v7  ;;  %v97_v9 = vadd.f32 %v122_v8, %v108_v3 }
  0xcc   :  { %v88_v10 = vpop.f32.mrf.mxu0 }
  0xcd   :  { %103 = vst [vmem:[%s173_s3 + $0x18] sm:$0xff] %v97_v9  ;;  %v89_v11 = vadd.f32 %v108_v3, %v88_v10 }
  0xcf   :  { %101 = vst [vmem:[%s173_s3 + $0x8] sm:$0xff] %v89_v11 }

// kernel: fwd.5
= control target key start
LH: loop header
LB: loop body
LE: loop exit
PB: predicated region body
PF: predicated region fallthrough
CT: control target
= control target key end

     0   :  { %vm86_vm0 = vcmask 130048   ;;  %s390_s1 = inlined_call_operand.vmem [shape: bf16[16,128], index: 1, kind: input, shape index: {}]   ;;  %s391_s0 = inlined_call_operand.vmem [shape: bf16[128,16], index: 0, kind: input, shape index: {}]   ;;  %s392_s2 = inlined_call_operand.vmem [shape: f32[1,128], index: 2, kind: input, shape index: {}]   ;;  %s393_s3 = inlined_call_operand.vmem [shape: f32[128,128], index: 3, kind: output, shape index: {}]  }
   0x1   :  { %v275_v0 = vld [vmem:[%s390_s1] sm:$0xff]   ;;  %v278_v3 = vld [vmem:[%s391_s0 + $0x8] sm:$0xff]   ;;  %v280_v5 = vld [vmem:[%s391_s0 + $0x10] sm:$0xff]  }
   0x2   :  { %v276_v1 = vld [vmem:[%s391_s0] sm:$0xff]   ;;  %255 = vmatprep.subr.bf16.mxu0 %v275_v0  ;;  %273 = vmatprep.subr.bf16.mxu1 %v275_v0  ;;  %v279_v4 = vld [vmem:[%s391_s0 + $0x28] sm:$0xff]   ;;  %v281_v6 = vld [vmem:[%s391_s0 + $0x30] sm:$0xff]  }
   0x3   :  { %v277_v2 = vld [vmem:[%s391_s0 + $0x20] sm:$0xff]   ;;  %256 = vmatpush3.bf16.msra.mxu0 %v275_v0  ;;  %274 = vmatpush3.bf16.msra.mxu1 %v275_v0  ;;  %v282_v7 = vld [vmem:[%s391_s0 + $0x18] sm:$0xff]  }
   0x4   :  { %257 = vmatprep.mubr.msk.bf16.mxu0 %vm86_vm0, %v276_v1  ;;  %265 = vmatprep.mubr.msk.bf16.mxu1 %vm86_vm0, %v277_v2  ;;  %v283_v8 = vld [vmem:[%s391_s0 + $0x38] sm:$0xff]   ;;  %v228_v9 = vld [vmem:[%s392_s2] ss:$0 sm:$0xff] }
   0x6   :  { %258 = vmatmul.mubr.msk.bf16.vlgmr.msra.gmra.mxu0 %vm86_vm0, %v278_v3  ;;  %266 = vmatmul.mubr.msk.bf16.vlgmr.msra.gmra.mxu1 %vm86_vm0, %v279_v4 }
   0x7   :  { %261 = vmatprep.mubr.msk.bf16.mxu0 %vm86_vm0, %v280_v5  ;;  %269 = vmatprep.mubr.msk.bf16.mxu1 %vm86_vm0, %v281_v6 }
   0xe   :  { %262 = vmatmul.mubr.msk.bf16.gmra.mxu0 %vm86_vm0, %v282_v7  ;;  %270 = vmatmul.mubr.msk.bf16.gmra.mxu1 %vm86_vm0, %v283_v8 }
  0xc6   :  { %v259_v10 = vpop.f32.mrf.mxu0  ;;  %v267_v11 = vpop.f32.mrf.mxu1 }
  0xc7   :  { %v154_v12 = vadd.f32 %v259_v10, %v228_v9  ;;  %v186_v13 = vadd.f32 %v267_v11, %v228_v9 }
  0xc8   :  { %v145_v14 = vpop.f32.mrf.mxu0  ;;  %v177_v15 = vpop.f32.mrf.mxu1 }
  0xc9   :  { %210 = vst [vmem:[%s393_s3 + $0x10] sm:$0xff] %v154_v12  ;;  %218 = vst [vmem:[%s393_s3 + $0x50] sm:$0xff] %v186_v13  ;;  %v146_v16 = vadd.f32 %v228_v9, %v145_v14  ;;  %v178_v17 = vadd.f32 %v228_v9, %v177_v15 }
  0xca   :  { %v260_v18 = vpop.f32.mrf.mxu0  ;;  %v268_v19 = vpop.f32.mrf.mxu1 }
  0xcb   :  { %208 = vst [vmem:[%s393_s3] sm:$0xff] %v146_v16  ;;  %216 = vst [vmem:[%s393_s3 + $0x40] sm:$0xff] %v178_v17  ;;  %v157_v20 = vadd.f32 %v260_v18, %v228_v9  ;;  %v189_v21 = vadd.f32 %v268_v19, %v228_v9 }
  0xcc   :  { %v148_v22 = vpop.f32.mrf.mxu0  ;;  %v180_v23 = vpop.f32.mrf.mxu1 }
  0xcd   :  { %211 = vst [vmem:[%s393_s3 + $0x18] sm:$0xff] %v157_v20  ;;  %219 = vst [vmem:[%s393_s3 + $0x58] sm:$0xff] %v189_v21  ;;  %v149_v24 = vadd.f32 %v228_v9, %v148_v22  ;;  %v181_v25 = vadd.f32 %v228_v9, %v180_v23 }
  0xce   :  { %v263_v26 = vpop.f32.mrf.mxu0  ;;  %v271_v27 = vpop.f32.mrf.mxu1 }
  0xcf   :  { %209 = vst [vmem:[%s393_s3 + $0x8] sm:$0xff] %v149_v24  ;;  %217 = vst [vmem:[%s393_s3 + $0x48] sm:$0xff] %v181_v25  ;;  %v170_v28 = vadd.f32 %v263_v26, %v228_v9  ;;  %v202_v29 = vadd.f32 %v271_v27, %v228_v9 }
  0xd0   :  { %v161_v30 = vpop.f32.mrf.mxu0  ;;  %v193_v31 = vpop.f32.mrf.mxu1 }
  0xd1   :  { %214 = vst [vmem:[%s393_s3 + $0x30] sm:$0xff] %v170_v28  ;;  %222 = vst [vmem:[%s393_s3 + $0x70] sm:$0xff] %v202_v29  ;;  %v162_v32 = vadd.f32 %v228_v9, %v161_v30  ;;  %v194_v33 = vadd.f32 %v228_v9, %v193_v31 }
  0xd2   :  { %v264_v34 = vpop.f32.mrf.mxu0  ;;  %v272_v35 = vpop.f32.mrf.mxu1 }
  0xd3   :  { %212 = vst [vmem:[%s393_s3 + $0x20] sm:$0xff] %v162_v32  ;;  %220 = vst [vmem:[%s393_s3 + $0x60] sm:$0xff] %v194_v33  ;;  %v173_v36 = vadd.f32 %v264_v34, %v228_v9  ;;  %v205_v37 = vadd.f32 %v272_v35, %v228_v9 }
  0xd4   :  { %v164_v38 = vpop.f32.mrf.mxu0  ;;  %v196_v39 = vpop.f32.mrf.mxu1 }
  0xd5   :  { %215 = vst [vmem:[%s393_s3 + $0x38] sm:$0xff] %v173_v36  ;;  %223 = vst [vmem:[%s393_s3 + $0x78] sm:$0xff] %v205_v37  ;;  %v165_v40 = vadd.f32 %v228_v9, %v164_v38  ;;  %v197_v41 = vadd.f32 %v228_v9, %v196_v39 }
  0xd7   :  { %213 = vst [vmem:[%s393_s3 + $0x28] sm:$0xff] %v165_v40  ;;  %221 = vst [vmem:[%s393_s3 + $0x68] sm:$0xff] %v197_v41 }

// kernel: fwd.4
= control target key start
LH: loop header
LB: loop body
LE: loop exit
PB: predicated region body
PF: predicated region fallthrough
CT: control target
= control target key end

     0   :  { %vm254_vm0 = vcmask 130048   ;;  %s1320_s1 = inlined_call_operand.vmem [shape: bf16[16,128], index: 1, kind: input, shape index: {}]   ;;  %s1321_s0 = inlined_call_operand.vmem [shape: bf16[512,16], index: 0, kind: input, shape index: {}]   ;;  %s1322_s2 = inlined_call_operand.vmem [shape: f32[1,128], index: 2, kind: input, shape index: {}]   ;;  %s1323_s3 = inlined_call_operand.vmem [shape: f32[512,128], index: 3, kind: output, shape index: {}]  }
   0x1   :  { %v875_v0 = vld [vmem:[%s1320_s1] sm:$0xff]   ;;  %v878_v3 = vld [vmem:[%s1321_s0 + $0x8] sm:$0xff]   ;;  %v880_v5 = vld [vmem:[%s1321_s0 + $0x10] sm:$0xff]  }
   0x2   :  { %v876_v1 = vld [vmem:[%s1321_s0] sm:$0xff]   ;;  %807 = vmatprep.subr.bf16.mxu0 %v875_v0  ;;  %873 = vmatprep.subr.bf16.mxu1 %v875_v0  ;;  %v879_v4 = vld [vmem:[%s1321_s0 + $0x88] sm:$0xff]   ;;  %v881_v6 = vld [vmem:[%s1321_s0 + $0x90] sm:$0xff]  }
   0x3   :  { %v877_v2 = vld [vmem:[%s1321_s0 + $0x80] sm:$0xff]   ;;  %808 = vmatpush3.bf16.msra.mxu0 %v875_v0  ;;  %874 = vmatpush3.bf16.msra.mxu1 %v875_v0  ;;  %v882_v7 = vld [vmem:[%s1321_s0 + $0x18] sm:$0xff]   ;;  %v886_v11 = vld [vmem:[%s1321_s0 + $0x28] sm:$0xff]  }
   0x4   :  { %809 = vmatprep.mubr.msk.bf16.mxu0 %vm254_vm0, %v876_v1  ;;  %841 = vmatprep.mubr.msk.bf16.mxu1 %vm254_vm0, %v877_v2  ;;  %v883_v8 = vld [vmem:[%s1321_s0 + $0x98] sm:$0xff]   ;;  %v884_v9 = vld [vmem:[%s1321_s0 + $0x20] sm:$0xff]   ;;  %v887_v12 = vld [vmem:[%s1321_s0 + $0xa8] sm:$0xff]  }
   0x5   :  { %v885_v10 = vld [vmem:[%s1321_s0 + $0xa0] sm:$0xff]   ;;  %v888_v13 = vld [vmem:[%s1321_s0 + $0x30] sm:$0xff]   ;;  %v890_v15 = vld [vmem:[%s1321_s0 + $0x38] sm:$0xff]  }
   0x6   :  { %810 = vmatmul.mubr.msk.bf16.vlgmr.msra.gmra.mxu0 %vm254_vm0, %v878_v3  ;;  %842 = vmatmul.mubr.msk.bf16.vlgmr.msra.gmra.mxu1 %vm254_vm0, %v879_v4  ;;  %v889_v14 = vld [vmem:[%s1321_s0 + $0xb0] sm:$0xff]   ;;  %v891_v16 = vld [vmem:[%s1321_s0 + $0xb8] sm:$0xff]   ;;  %v892_v17 = vld [vmem:[%s1321_s0 + $0x40] sm:$0xff]  }
   0x7   :  { %813 = vmatprep.mubr.msk.bf16.mxu0 %vm254_vm0, %v880_v5  ;;  %845 = vmatprep.mubr.msk.bf16.mxu1 %vm254_vm0, %v881_v6  ;;  %v893_v18 = vld [vmem:[%s1321_s0 + $0xc0] sm:$0xff]   ;;  %v894_v19 = vld [vmem:[%s1321_s0 + $0x48] sm:$0xff]   ;;  %v896_v21 = vld [vmem:[%s1321_s0 + $0x50] sm:$0xff]  }
   0x8   :  { %v895_v20 = vld [vmem:[%s1321_s0 + $0xc8] sm:$0xff]   ;;  %v897_v22 = vld [vmem:[%s1321_s0 + $0xd0] sm:$0xff]   ;;  %v898_v23 = vld [vmem:[%s1321_s0 + $0x58] sm:$0xff]  }
   0x9   :  { %v899_v24 = vld [vmem:[%s1321_s0 + $0xd8] sm:$0xff]   ;;  %v900_v25 = vld [vmem:[%s1321_s0 + $0x60] sm:$0xff]   ;;  %v902_v27 = vld [vmem:[%s1321_s0 + $0x68] sm:$0xff]  }
   0xa   :  { %v901_v26 = vld [vmem:[%s1321_s0 + $0xe0] sm:$0xff]   ;;  %v903_v28 = vld [vmem:[%s1321_s0 + $0xe8] sm:$0xff]   ;;  %v904_v29 = vld [vmem:[%s1321_s0 + $0x70] sm:$0xff]  }
   0xb   :  { %v905_v30 = vld [vmem:[%s1321_s0 + $0xf0] sm:$0xff]   ;;  %v906_v31 = vld [vmem:[%s1321_s0 + $0x78] sm:$0xff]   ;;  %v1062_v33 = vld [vmem:[%s1322_s2] ss:$0 sm:$0xff] }
   0xc   :  { %v907_v32 = vld [vmem:[%s1321_s0 + $0xf8] sm:$0xff]  }
   0xe   :  { %814 = vmatmul.mubr.msk.bf16.gmra.mxu0 %vm254_vm0, %v882_v7  ;;  %846 = vmatmul.mubr.msk.bf16.gmra.mxu1 %vm254_vm0, %v883_v8 }
   0xf   :  { %817 = vmatprep.mubr.msk.bf16.mxu0 %vm254_vm0, %v884_v9  ;;  %849 = vmatprep.mubr.msk.bf16.mxu1 %vm254_vm0, %v885_v10 }
  0x16   :  { %818 = vmatmul.mubr.msk.bf16.gmra.mxu0 %vm254_vm0, %v886_v11  ;;  %850 = vmatmul.mubr.msk.bf16.gmra.mxu1 %vm254_vm0, %v887_v12 }
  0x17   :  { %821 = vmatprep.mubr.msk.bf16.mxu0 %vm254_vm0, %v888_v13  ;;  %853 = vmatprep.mubr.msk.bf16.mxu1 %vm254_vm0, %v889_v14 }
  0x1e   :  { %822 = vmatmul.mubr.msk.bf16.gmra.mxu0 %vm254_vm0, %v890_v15  ;;  %854 = vmatmul.mubr.msk.bf16.gmra.mxu1 %vm254_vm0, %v891_v16 }
  0x1f   :  { %825 = vmatprep.mubr.msk.bf16.mxu0 %vm254_vm0, %v892_v17  ;;  %857 = vmatprep.mubr.msk.bf16.mxu1 %vm254_vm0, %v893_v18 }
  0x26   :  { %826 = vmatmul.mubr.msk.bf16.gmra.mxu0 %vm254_vm0, %v894_v19  ;;  %858 = vmatmul.mubr.msk.bf16.gmra.mxu1 %vm254_vm0, %v895_v20 }
  0x27   :  { %829 = vmatprep.mubr.msk.bf16.mxu0 %vm254_vm0, %v896_v21  ;;  %861 = vmatprep.mubr.msk.bf16.mxu1 %vm254_vm0, %v897_v22 }
  0x2e   :  { %830 = vmatmul.mubr.msk.bf16.gmra.mxu0 %vm254_vm0, %v898_v23  ;;  %862 = vmatmul.mubr.msk.bf16.gmra.mxu1 %vm254_vm0, %v899_v24 }
  0x2f   :  { %833 = vmatprep.mubr.msk.bf16.mxu0 %vm254_vm0, %v900_v25  ;;  %865 = vmatprep.mubr.msk.bf16.mxu1 %vm254_vm0, %v901_v26 }
  0x36   :  { %834 = vmatmul.mubr.msk.bf16.gmra.mxu0 %vm254_vm0, %v902_v27  ;;  %866 = vmatmul.mubr.msk.bf16.gmra.mxu1 %vm254_vm0, %v903_v28 }
  0x37   :  { %837 = vmatprep.mubr.msk.bf16.mxu0 %vm254_vm0, %v904_v29  ;;  %869 = vmatprep.mubr.msk.bf16.mxu1 %vm254_vm0, %v905_v30 }
  0x3e   :  { %838 = vmatmul.mubr.msk.bf16.gmra.mxu0 %vm254_vm0, %v906_v31  ;;  %870 = vmatmul.mubr.msk.bf16.gmra.mxu1 %vm254_vm0, %v907_v32 }
  0xc6   :  { %v811_v34 = vpop.f32.mrf.mxu0  ;;  %v843_v35 = vpop.f32.mrf.mxu1 }
  0xc7   :  { %v394_v36 = vadd.f32 %v811_v34, %v1062_v33  ;;  %v522_v37 = vadd.f32 %v843_v35, %v1062_v33 }
  0xc8   :  { %v385_v38 = vpop.f32.mrf.mxu0  ;;  %v513_v39 = vpop.f32.mrf.mxu1 }
  0xc9   :  { %642 = vst [vmem:[%s1323_s3 + $0x10] sm:$0xff] %v394_v36  ;;  %674 = vst [vmem:[%s1323_s3 + $0x110] sm:$0xff] %v522_v37  ;;  %v386_v40 = vadd.f32 %v1062_v33, %v385_v38  ;;  %v514_v41 = vadd.f32 %v1062_v33, %v513_v39 }
  0xca   :  { %v812_v42 = vpop.f32.mrf.mxu0  ;;  %v844_v43 = vpop.f32.mrf.mxu1 }
  0xcb   :  { %640 = vst [vmem:[%s1323_s3] sm:$0xff] %v386_v40  ;;  %672 = vst [vmem:[%s1323_s3 + $0x100] sm:$0xff] %v514_v41  ;;  %v397_v44 = vadd.f32 %v812_v42, %v1062_v33  ;;  %v525_v45 = vadd.f32 %v844_v43, %v1062_v33 }
  0xcc   :  { %v388_v46 = vpop.f32.mrf.mxu0  ;;  %v516_v47 = vpop.f32.mrf.mxu1 }
  0xcd   :  { %643 = vst [vmem:[%s1323_s3 + $0x18] sm:$0xff] %v397_v44  ;;  %675 = vst [vmem:[%s1323_s3 + $0x118] sm:$0xff] %v525_v45  ;;  %v389_v48 = vadd.f32 %v1062_v33, %v388_v46  ;;  %v517_v49 = vadd.f32 %v1062_v33, %v516_v47 }
  0xce   :  { %v815_v50 = vpop.f32.mrf.mxu0  ;;  %v847_v51 = vpop.f32.mrf.mxu1 }
  0xcf   :  { %641 = vst [vmem:[%s1323_s3 + $0x8] sm:$0xff] %v389_v48  ;;  %673 = vst [vmem:[%s1323_s3 + $0x108] sm:$0xff] %v517_v49  ;;  %v410_v52 = vadd.f32 %v815_v50, %v1062_v33  ;;  %v538_v53 = vadd.f32 %v847_v51, %v1062_v33 }
  0xd0   :  { %v401_v54 = vpop.f32.mrf.mxu0  ;;  %v529_v55 = vpop.f32.mrf.mxu1 }
  0xd1   :  { %646 = vst [vmem:[%s1323_s3 + $0x30] sm:$0xff] %v410_v52  ;;  %678 = vst [vmem:[%s1323_s3 + $0x130] sm:$0xff] %v538_v53  ;;  %v402_v56 = vadd.f32 %v1062_v33, %v401_v54  ;;  %v530_v57 = vadd.f32 %v1062_v33, %v529_v55 }
  0xd2   :  { %v816_v58 = vpop.f32.mrf.mxu0  ;;  %v848_v59 = vpop.f32.mrf.mxu1 }
  0xd3   :  { %644 = vst [vmem:[%s1323_s3 + $0x20] sm:$0xff] %v402_v56  ;;  %676 = vst [vmem:[%s1323_s3 + $0x120] sm:$0xff] %v530_v57  ;;  %v413_v60 = vadd.f32 %v816_v58, %v1062_v33  ;;  %v541_v61 = vadd.f32 %v848_v59, %v1062_v33 }
  0xd4   :  { %v404_v62 = vpop.f32.mrf.mxu0  ;;  %v532_v63 = vpop.f32.mrf.mxu1 }
  0xd5   :  { %647 = vst [vmem:[%s1323_s3 + $0x38] sm:$0xff] %v413_v60  ;;  %679 = vst [vmem:[%s1323_s3 + $0x138] sm:$0xff] %v541_v61  ;;  %v405_v0 = vadd.f32 %v1062_v33, %v404_v62  ;;  %v533_v1 = vadd.f32 %v1062_v33, %v532_v63 }
  0xd6   :  { %v819_v2 = vpop.f32.mrf.mxu0  ;;  %v851_v3 = vpop.f32.mrf.mxu1 }
  0xd7   :  { %645 = vst [vmem:[%s1323_s3 + $0x28] sm:$0xff] %v405_v0  ;;  %677 = vst [vmem:[%s1323_s3 + $0x128] sm:$0xff] %v533_v1  ;;  %v426_v4 = vadd.f32 %v819_v2, %v1062_v33  ;;  %v554_v5 = vadd.f32 %v851_v3, %v1062_v33 }
  0xd8   :  { %v417_v6 = vpop.f32.mrf.mxu0  ;;  %v545_v7 = vpop.f32.mrf.mxu1 }
  0xd9   :  { %650 = vst [vmem:[%s1323_s3 + $0x50] sm:$0xff] %v426_v4  ;;  %682 = vst [vmem:[%s1323_s3 + $0x150] sm:$0xff] %v554_v5  ;;  %v418_v8 = vadd.f32 %v1062_v33, %v417_v6  ;;  %v546_v9 = vadd.f32 %v1062_v33, %v545_v7 }
  0xda   :  { %v820_v10 = vpop.f32.mrf.mxu0  ;;  %v852_v11 = vpop.f32.mrf.mxu1 }
  0xdb   :  { %648 = vst [vmem:[%s1323_s3 + $0x40] sm:$0xff] %v418_v8  ;;  %680 = vst [vmem:[%s1323_s3 + $0x140] sm:$0xff] %v546_v9  ;;  %v429_v12 = vadd.f32 %v820_v10, %v1062_v33  ;;  %v557_v13 = vadd.f32 %v852_v11, %v1062_v33 }
  0xdc   :  { %v420_v14 = vpop.f32.mrf.mxu0  ;;  %v548_v15 = vpop.f32.mrf.mxu1 }
  0xdd   :  { %651 = vst [vmem:[%s1323_s3 + $0x58] sm:$0xff] %v429_v12  ;;  %683 = vst [vmem:[%s1323_s3 + $0x158] sm:$0xff] %v557_v13  ;;  %v421_v16 = vadd.f32 %v1062_v33, %v420_v14  ;;  %v549_v17 = vadd.f32 %v1062_v33, %v548_v15 }
  0xde   :  { %v823_v18 = vpop.f32.mrf.mxu0  ;;  %v855_v19 = vpop.f32.mrf.mxu1 }
  0xdf   :  { %649 = vst [vmem:[%s1323_s3 + $0x48] sm:$0xff] %v421_v16  ;;  %681 = vst [vmem:[%s1323_s3 + $0x148] sm:$0xff] %v549_v17  ;;  %v442_v20 = vadd.f32 %v823_v18, %v1062_v33  ;;  %v570_v21 = vadd.f32 %v855_v19, %v1062_v33 }
  0xe0   :  { %v433_v22 = vpop.f32.mrf.mxu0  ;;  %v561_v23 = vpop.f32.mrf.mxu1 }
  0xe1   :  { %654 = vst [vmem:[%s1323_s3 + $0x70] sm:$0xff] %v442_v20  ;;  %686 = vst [vmem:[%s1323_s3 + $0x170] sm:$0xff] %v570_v21  ;;  %v434_v24 = vadd.f32 %v1062_v33, %v433_v22  ;;  %v562_v25 = vadd.f32 %v1062_v33, %v561_v23 }
  0xe2   :  { %v824_v26 = vpop.f32.mrf.mxu0  ;;  %v856_v27 = vpop.f32.mrf.mxu1 }
  0xe3   :  { %652 = vst [vmem:[%s1323_s3 + $0x60] sm:$0xff] %v434_v24  ;;  %684 = vst [vmem:[%s1323_s3 + $0x160] sm:$0xff] %v562_v25  ;;  %v445_v28 = vadd.f32 %v824_v26, %v1062_v33  ;;  %v573_v29 = vadd.f32 %v856_v27, %v1062_v33 }
  0xe4   :  { %v436_v30 = vpop.f32.mrf.mxu0  ;;  %v564_v31 = vpop.f32.mrf.mxu1 }
  0xe5   :  { %655 = vst [vmem:[%s1323_s3 + $0x78] sm:$0xff] %v445_v28  ;;  %687 = vst [vmem:[%s1323_s3 + $0x178] sm:$0xff] %v573_v29  ;;  %v437_v32 = vadd.f32 %v1062_v33, %v436_v30  ;;  %v565_v34 = vadd.f32 %v1062_v33, %v564_v31 }
  0xe6   :  { %v827_v35 = vpop.f32.mrf.mxu0  ;;  %v859_v36 = vpop.f32.mrf.mxu1 }
  0xe7   :  { %653 = vst [vmem:[%s1323_s3 + $0x68] sm:$0xff] %v437_v32  ;;  %685 = vst [vmem:[%s1323_s3 + $0x168] sm:$0xff] %v565_v34  ;;  %v458_v37 = vadd.f32 %v827_v35, %v1062_v33  ;;  %v586_v38 = vadd.f32 %v859_v36, %v1062_v33 }
  0xe8   :  { %v449_v39 = vpop.f32.mrf.mxu0  ;;  %v577_v40 = vpop.f32.mrf.mxu1 }
  0xe9   :  { %658 = vst [vmem:[%s1323_s3 + $0x90] sm:$0xff] %v458_v37  ;;  %690 = vst [vmem:[%s1323_s3 + $0x190] sm:$0xff] %v586_v38  ;;  %v450_v41 = vadd.f32 %v1062_v33, %v449_v39  ;;  %v578_v42 = vadd.f32 %v1062_v33, %v577_v40 }
  0xea   :  { %v828_v43 = vpop.f32.mrf.mxu0  ;;  %v860_v44 = vpop.f32.mrf.mxu1 }
  0xeb   :  { %656 = vst [vmem:[%s1323_s3 + $0x80] sm:$0xff] %v450_v41  ;;  %688 = vst [vmem:[%s1323_s3 + $0x180] sm:$0xff] %v578_v42  ;;  %v461_v45 = vadd.f32 %v828_v43, %v1062_v33  ;;  %v589_v46 = vadd.f32 %v860_v44, %v1062_v33 }
  0xec   :  { %v452_v47 = vpop.f32.mrf.mxu0  ;;  %v580_v48 = vpop.f32.mrf.mxu1 }
  0xed   :  { %659 = vst [vmem:[%s1323_s3 + $0x98] sm:$0xff] %v461_v45  ;;  %691 = vst [vmem:[%s1323_s3 + $0x198] sm:$0xff] %v589_v46  ;;  %v453_v49 = vadd.f32 %v1062_v33, %v452_v47  ;;  %v581_v50 = vadd.f32 %v1062_v33, %v580_v48 }
  0xee   :  { %v831_v51 = vpop.f32.mrf.mxu0  ;;  %v863_v52 = vpop.f32.mrf.mxu1 }
  0xef   :  { %657 = vst [vmem:[%s1323_s3 + $0x88] sm:$0xff] %v453_v49  ;;  %689 = vst [vmem:[%s1323_s3 + $0x188] sm:$0xff] %v581_v50  ;;  %v474_v53 = vadd.f32 %v831_v51, %v1062_v33  ;;  %v602_v54 = vadd.f32 %v863_v52, %v1062_v33 }
  0xf0   :  { %v465_v55 = vpop.f32.mrf.mxu0  ;;  %v593_v56 = vpop.f32.mrf.mxu1 }
  0xf1   :  { %662 = vst [vmem:[%s1323_s3 + $0xb0] sm:$0xff] %v474_v53  ;;  %694 = vst [vmem:[%s1323_s3 + $0x1b0] sm:$0xff] %v602_v54  ;;  %v466_v57 = vadd.f32 %v1062_v33, %v465_v55  ;;  %v594_v58 = vadd.f32 %v1062_v33, %v593_v56 }
  0xf2   :  { %v832_v59 = vpop.f32.mrf.mxu0  ;;  %v864_v60 = vpop.f32.mrf.mxu1 }
  0xf3   :  { %660 = vst [vmem:[%s1323_s3 + $0xa0] sm:$0xff] %v466_v57  ;;  %692 = vst [vmem:[%s1323_s3 + $0x1a0] sm:$0xff] %v594_v58  ;;  %v477_v61 = vadd.f32 %v832_v59, %v1062_v33  ;;  %v605_v62 = vadd.f32 %v864_v60, %v1062_v33 }
  0xf4   :  { %v468_v63 = vpop.f32.mrf.mxu0  ;;  %v596_v0 = vpop.f32.mrf.mxu1 }
  0xf5   :  { %663 = vst [vmem:[%s1323_s3 + $0xb8] sm:$0xff] %v477_v61  ;;  %695 = vst [vmem:[%s1323_s3 + $0x1b8] sm:$0xff] %v605_v62  ;;  %v469_v1 = vadd.f32 %v1062_v33, %v468_v63  ;;  %v597_v2 = vadd.f32 %v1062_v33, %v596_v0 }
  0xf6   :  { %v835_v3 = vpop.f32.mrf.mxu0  ;;  %v867_v4 = vpop.f32.mrf.mxu1 }
  0xf7   :  { %661 = vst [vmem:[%s1323_s3 + $0xa8] sm:$0xff] %v469_v1  ;;  %693 = vst [vmem:[%s1323_s3 + $0x1a8] sm:$0xff] %v597_v2  ;;  %v490_v5 = vadd.f32 %v835_v3, %v1062_v33  ;;  %v618_v6 = vadd.f32 %v867_v4, %v1062_v33 }
  0xf8   :  { %v481_v7 = vpop.f32.mrf.mxu0  ;;  %v609_v8 = vpop.f32.mrf.mxu1 }
  0xf9   :  { %666 = vst [vmem:[%s1323_s3 + $0xd0] sm:$0xff] %v490_v5  ;;  %698 = vst [vmem:[%s1323_s3 + $0x1d0] sm:$0xff] %v618_v6  ;;  %v482_v9 = vadd.f32 %v1062_v33, %v481_v7  ;;  %v610_v10 = vadd.f32 %v1062_v33, %v609_v8 }
  0xfa   :  { %v836_v11 = vpop.f32.mrf.mxu0  ;;  %v868_v12 = vpop.f32.mrf.mxu1 }
  0xfb   :  { %664 = vst [vmem:[%s1323_s3 + $0xc0] sm:$0xff] %v482_v9  ;;  %696 = vst [vmem:[%s1323_s3 + $0x1c0] sm:$0xff] %v610_v10  ;;  %v493_v13 = vadd.f32 %v836_v11, %v1062_v33  ;;  %v621_v14 = vadd.f32 %v868_v12, %v1062_v33 }
  0xfc   :  { %v484_v15 = vpop.f32.mrf.mxu0  ;;  %v612_v16 = vpop.f32.mrf.mxu1 }
  0xfd   :  { %667 = vst [vmem:[%s1323_s3 + $0xd8] sm:$0xff] %v493_v13  ;;  %699 = vst [vmem:[%s1323_s3 + $0x1d8] sm:$0xff] %v621_v14  ;;  %v485_v17 = vadd.f32 %v1062_v33, %v484_v15  ;;  %v613_v18 = vadd.f32 %v1062_v33, %v612_v16 }
  0xfe   :  { %v839_v19 = vpop.f32.mrf.mxu0  ;;  %v871_v20 = vpop.f32.mrf.mxu1 }
  0xff   :  { %665 = vst [vmem:[%s1323_s3 + $0xc8] sm:$0xff] %v485_v17  ;;  %697 = vst [vmem:[%s1323_s3 + $0x1c8] sm:$0xff] %v613_v18  ;;  %v506_v21 = vadd.f32 %v839_v19, %v1062_v33  ;;  %v634_v22 = vadd.f32 %v871_v20, %v1062_v33 }
 0x100   :  { %v497_v23 = vpop.f32.mrf.mxu0  ;;  %v625_v24 = vpop.f32.mrf.mxu1 }
 0x101   :  { %670 = vst [vmem:[%s1323_s3 + $0xf0] sm:$0xff] %v506_v21  ;;  %702 = vst [vmem:[%s1323_s3 + $0x1f0] sm:$0xff] %v634_v22  ;;  %v498_v25 = vadd.f32 %v1062_v33, %v497_v23  ;;  %v626_v26 = vadd.f32 %v1062_v33, %v625_v24 }
 0x102   :  { %v840_v27 = vpop.f32.mrf.mxu0  ;;  %v872_v28 = vpop.f32.mrf.mxu1 }
 0x103   :  { %668 = vst [vmem:[%s1323_s3 + $0xe0] sm:$0xff] %v498_v25  ;;  %700 = vst [vmem:[%s1323_s3 + $0x1e0] sm:$0xff] %v626_v26  ;;  %v509_v29 = vadd.f32 %v840_v27, %v1062_v33  ;;  %v637_v30 = vadd.f32 %v872_v28, %v1062_v33 }
 0x104   :  { %v500_v31 = vpop.f32.mrf.mxu0  ;;  %v628_v32 = vpop.f32.mrf.mxu1 }
 0x105   :  { %671 = vst [vmem:[%s1323_s3 + $0xf8] sm:$0xff] %v509_v29  ;;  %703 = vst [vmem:[%s1323_s3 + $0x1f8] sm:$0xff] %v637_v30  ;;  %v501_v34 = vadd.f32 %v1062_v33, %v500_v31  ;;  %v629_v35 = vadd.f32 %v1062_v33, %v628_v32 }
 0x107   :  { %669 = vst [vmem:[%s1323_s3 + $0xe8] sm:$0xff] %v501_v34  ;;  %701 = vst [vmem:[%s1323_s3 + $0x1e8] sm:$0xff] %v629_v35 }

// kernel: fwd.7
= control target key start
LH: loop header
LB: loop body
LE: loop exit
PB: predicated region body
PF: predicated region fallthrough
CT: control target
= control target key end

     0   :  { %s4323_s0 = inlined_call_operand.vmem [shape: f32[2,64,128], index: 0, kind: input, shape index: {}]   ;;  %s4324_s1 = inlined_call_operand.vmem [shape: f32[2,1,128], index: 1, kind: output, shape index: {0}]   ;;  %s4325_s2 = inlined_call_operand.vmem [shape: s32[2,1,128], index: 2, kind: output, shape index: {1}]   ;;  %s4326_s3 = inlined_call_operand.hbm [shape: s32[2,1,128], index: 3, kind: output, shape index: {2}]  }
   0x1   :  { %4371 = sst [smem:[#allocation25_spill]] %s4323_s0 }
   0x2   :  { %4372 = sst [smem:[#allocation26_spill]] %s4324_s1 }
   0x3   :  { %4373 = sst [smem:[#allocation27_spill]] %s4325_s2 }
   0x4   :  { %4374 = sst [smem:[#allocation28_spill]] %s4326_s3 }
   0x5   :  { %9 = vsyncpa [#allocation4], 0 }
   0x6   :  { %11 = vsyncpa [#allocation4 + $0x1], 0  ;;  %s2636_s12 = smov 0   ;;  %s2638_s13 = smov 0  }
   0x7   :  { %s2640_s14 = smov 0   ;;  %s2642_s15 = smov 0  }
   0x8 LB: > { %4375 = sst [smem:[#allocation6_spill]] %s2601_s12  ;;  %s2657_s16 = sadd.s32 4294967295, %s2613_s15   ;;  %s2613_s15 = sphi %s2642_s15, %s4458_s15   ;;  %s2609_s14 = sphi %s2640_s14, %s4461_s14   ;;  %s2605_s13 = sphi %s2638_s13, %s4460_s13   ;;  %s2601_s12 = sphi %s2636_s12, %s4459_s12  }
   0x9   : > { %4376 = sst [smem:[#allocation7_spill]] %s2605_s13  ;;  %s2362_s17 = sadd.s32 4294967294, %s2613_s15  }
   0xa   : > { %4377 = sst [smem:[#allocation8_spill]] %s2609_s14  ;;  %s2661_s18 = sadd.s32 1, %s2613_s15  }
   0xb   : > { %4378 = sst [smem:[#allocation9_spill]] %s2613_s15  ;;  %s102_s19 = sadd.s32 1, %s2609_s14 }
   0xc   : > { %4379 = sst [smem:[#allocation10_spill]] %s2657_s16  ;;  %s99_s20 = ssub.s32 %s2613_s15, %s2661_s18 }
   0xd   : > { %4380 = sst [smem:[#allocation11_spill]] %s2661_s18  ;;  %p112_p0 = scmp.ne.s32.totalorder %s2609_s14, %s2605_s13 }
   0xe   : > { %p100_p1 = scmp.eq.s32.totalorder %s99_s20, 0  ;;  %p113_p2 = scmp.eq.s32.totalorder %s2657_s16, 1 }
   0xf   : > { %p118_p3 = scmp.ne.s32.totalorder %s2605_s13, %s2601_s12  ;;  %p119_p4 = scmp.eq.s32.totalorder %s2362_s17, 1 }
  0x10   : > { %s2672_s21 = scalar_select %p100_p1, %s2609_s14, %s102_s19  }
  0x11   : > { %p2674_p5 = por %p113_p2, %p112_p0  ;;  %p2678_p6 = por %p119_p4, %p118_p3 }
  0x12   : > { %4381 = sst [smem:[#allocation12_spill]] %s2672_s21  ;;  %p2365_p7 = scmp.ge.s32.totalorder %s2613_s15, 1 }
  0x13   : > { %s4382_s22 = scalar_select %p2674_p5, 1, 0 }
  0x14   : > { %s4384_s23 = scalar_select %p2678_p6, 1, 0 }
  0x15   : > { %4383 = sst [smem:[#allocation13_spill]] %s4382_s22  ;;  %p145_p8 = scmp.lt.s32.totalorder %s2613_s15, 3 }
  0x16   : > { %4385 = sst [smem:[#allocation14_spill]] %s4384_s23 }
  0x17   : > { %p146_p9 = pnand %p2365_p7, %p145_p8 }
  0x19   : > { %149 = sbr.rel (%p146_p9) target bundleno = 11214 (0x2bce), region = 24 }
  0x1e   : > { %p174_p10 = scmp.lt.s32.totalorder %s2657_s16, 1  ;;  %s4387_s0 = sld [smem:[#allocation25_spill]]  ;;  %v201_v29 = vlaneseq }
  0x1f   : > { %s4403_s1 = sld [smem:[#allocation26_spill]] }
  0x20   : > { %s2686_s24 = scalar_select %p174_p10, %s2657_s16, 1  ;;  %v2716_v30 = vshrl.u32 %v201_v29, 7  ;;  %v2767_v60 = vand.u32 127, %v201_v29 }
  0x22   : > { %4386 = sst [smem:[#allocation15_spill]] %s2686_s24  ;;  %s2387_s25 = sshll.u32 %s2686_s24, 6  ;;  %v2719_v31 = vadd.s32 8, %v2716_v30  ;;  %v2722_v32 = vadd.s32 16, %v2716_v30  ;;  %v2725_v33 = vadd.s32 24, %v2716_v30  ;;  %v2728_v34 = vadd.s32 32, %v2716_v30 }
  0x23   : > { %v2733_v36 = vadd.s32 40, %v2716_v30  ;;  %v2736_v37 = vadd.s32 48, %v2716_v30  ;;  %v2739_v38 = vadd.s32 56, %v2716_v30 }
  0x24   : > { %s178_s28 = scalar_lea.vmem %s4387_s0, %s2387_s25 }
  0x25   : > { %v187_v0 = vld [vmem:[%s178_s28 + $0x10] sm:$0xff]  ;;  %v185_v1 = vld [vmem:[%s178_s28] sm:$0xff]  ;;  %v188_v2 = vld [vmem:[%s178_s28 + $0x18] sm:$0xff] }
  0x26   : > { %195 = vst [vmem:[#allocation2 + $0x10] sm:$0xff] %v187_v0  ;;  %224 = vmax.xlane.f32.xlu1 %v187_v0  ;;  %193 = vst [vmem:[#allocation2] sm:$0xff] %v185_v1  ;;  %220 = vmax.xlane.f32.xlu0 %v185_v1  ;;  %v186_v3 = vld [vmem:[%s178_s28 + $0x8] sm:$0xff]  ;;  %v189_v5 = vld [vmem:[%s178_s28 + $0x20] sm:$0xff] }
  0x27   : > { %196 = vst [vmem:[#allocation2 + $0x18] sm:$0xff] %v188_v2  ;;  %v190_v4 = vld [vmem:[%s178_s28 + $0x28] sm:$0xff]  ;;  %194 = vst [vmem:[#allocation2 + $0x8] sm:$0xff] %v186_v3  ;;  %v192_v6 = vld [vmem:[%s178_s28 + $0x38] sm:$0xff] }
  0x28   : > { %198 = vst [vmem:[#allocation2 + $0x28] sm:$0xff] %v190_v4  ;;  %197 = vst [vmem:[#allocation2 + $0x20] sm:$0xff] %v189_v5  ;;  %v191_v7 = vld [vmem:[%s178_s28 + $0x30] sm:$0xff] }
  0x29   : > { %200 = vst [vmem:[#allocation2 + $0x38] sm:$0xff] %v192_v6  ;;  %199 = vst [vmem:[#allocation2 + $0x30] sm:$0xff] %v191_v7 }
  0x2a   : > { %226 = vmax.xlane.f32.xlu1 %v188_v2  ;;  %222 = vmax.xlane.f32.xlu0 %v186_v3 }
  0x2e   : > { %230 = vmax.xlane.f32.xlu1 %v190_v4  ;;  %228 = vmax.xlane.f32.xlu0 %v189_v5 }
  0x32   : > { %234 = vmax.xlane.f32.xlu1 %v192_v6  ;;  %232 = vmax.xlane.f32.xlu0 %v191_v7 }
  0xaf   : > { %v2692_v8 = vpop.xlane.xlu1 %224  ;;  %v2694_v9 = vpop.xlane.xlu0 %220 }
  0xb3   : > { %v2696_v10 = vpop.xlane.xlu1 %226  ;;  %v2698_v11 = vpop.xlane.xlu0 %222 }
  0xb7   : > { %v2700_v12 = vpop.xlane.xlu1 %230  ;;  %v2702_v13 = vpop.xlane.xlu0 %228 }
  0xb8   : > { %v237_v14 = vmax.f32 %v2698_v11, %v2700_v12  ;;  %v236_v15 = vmax.f32 %v2694_v9, %v2702_v13 }
  0xba   : > { %v240_v20 = vmax.f32 %v236_v15, %v237_v14 }
  0xbb   : > { %v2708_v16 = vpop.xlane.xlu1 %234  ;;  %v2710_v17 = vpop.xlane.xlu0 %232 }
  0xbc   : > { %v239_v18 = vmax.f32 %v2696_v10, %v2708_v16  ;;  %v238_v19 = vmax.f32 %v2692_v8, %v2710_v17 }
  0xbe   : > { %v241_v21 = vmax.f32 %v238_v19, %v239_v18 }
  0xc0   : > { %v242_v22 = vmax.f32 %v240_v20, %v241_v21 }
  0xc2   : > { %v243_v23 = vrot.slane %v242_v22, 4 }
  0xc4   : > { %v244_v24 = vmax.f32 %v242_v22, %v243_v23 }
  0xc6   : > { %v245_v25 = vrot.slane %v244_v24, 2 }
  0xc8   : > { %v246_v26 = vmax.f32 %v244_v24, %v245_v25 }
  0xca   : > { %v247_v27 = vrot.slane %v246_v26, 1 }
  0xcc   : > { %v248_v28 = vmax.f32 %v246_v26, %v247_v27 }
  0xce   : > { %2388 = vpush %v248_v28 }
  0xff   : > { %s2389_s29 = spop %2388 }
 0x100   : > { %v2730_v35 = vstv %s2389_s29 }
 0x101   : > { %vm251_vm0 = vcmp.eq.f32.partialorder %v2694_v9, %v2730_v35  ;;  %vm252_vm1 = vcmp.eq.f32.partialorder %v2698_v11, %v2730_v35  ;;  %vm253_vm2 = vcmp.eq.f32.partialorder %v2692_v8, %v2730_v35  ;;  %vm254_vm3 = vcmp.eq.f32.partialorder %v2696_v10, %v2730_v35 }
 0x102   : > { %vm255_vm4 = vcmp.eq.f32.partialorder %v2702_v13, %v2730_v35  ;;  %vm256_vm5 = vcmp.eq.f32.partialorder %v2700_v12, %v2730_v35  ;;  %vm257_vm6 = vcmp.eq.f32.partialorder %v2710_v17, %v2730_v35  ;;  %vm258_vm7 = vcmp.eq.f32.partialorder %v2708_v16, %v2730_v35 }
 0x103   : > { %v259_v39 = vsel %vm251_vm0, %v2716_v30, 64  ;;  %v260_v40 = vsel %vm252_vm1, %v2719_v31, 64  ;;  %v261_v41 = vsel %vm253_vm2, %v2722_v32, 64  ;;  %v262_v42 = vsel %vm254_vm3, %v2725_v33, 64 }
 0x104   : > { %v263_v43 = vsel %vm255_vm4, %v2728_v34, 64  ;;  %v264_v44 = vsel %vm256_vm5, %v2733_v36, 64  ;;  %v265_v45 = vsel %vm257_vm6, %v2736_v37, 64  ;;  %v266_v46 = vsel %vm258_vm7, %v2739_v38, 64 }
 0x105   : > { %vm267_vm8 = vcmp.lt.s32.totalorder %v259_v39, %v263_v43  ;;  %vm269_vm9 = vcmp.lt.s32.totalorder %v260_v40, %v264_v44  ;;  %vm271_vm10 = vcmp.lt.s32.totalorder %v261_v41, %v265_v45  ;;  %vm273_vm11 = vcmp.lt.s32.totalorder %v262_v42, %v266_v46 }
 0x106   : > { %v268_v47 = vsel %vm267_vm8, %v259_v39, %v263_v43  ;;  %v270_v48 = vsel %vm269_vm9, %v260_v40, %v264_v44  ;;  %v272_v49 = vsel %vm271_vm10, %v261_v41, %v265_v45  ;;  %v274_v50 = vsel %vm273_vm11, %v262_v42, %v266_v46 }
 0x107   : > { %vm275_vm12 = vcmp.lt.s32.totalorder %v268_v47, %v270_v48  ;;  %vm277_vm13 = vcmp.lt.s32.totalorder %v272_v49, %v274_v50  ;;  %vm295_vm2 = vcmask 1040384  }
 0x108   : > { %v276_v51 = vsel %vm275_vm12, %v268_v47, %v270_v48  ;;  %v278_v52 = vsel %vm277_vm13, %v272_v49, %v274_v50 }
 0x109   : > { %vm279_vm14 = vcmp.lt.s32.totalorder %v276_v51, %v278_v52 }
 0x10a   : > { %v280_v53 = vsel %vm279_vm14, %v276_v51, %v278_v52 }
 0x10b   : > { %v281_v54 = vrot.slane %v280_v53, 4 }
 0x10d   : > { %vm282_vm15 = vcmp.lt.s32.totalorder %v280_v53, %v281_v54 }
 0x10e   : > { %v283_v55 = vsel %vm282_vm15, %v280_v53, %v281_v54 }
 0x10f   : > { %v284_v56 = vrot.slane %v283_v55, 2 }
 0x111   : > { %vm285_vm0 = vcmp.lt.s32.totalorder %v283_v55, %v284_v56 }
 0x112   : > { %v286_v57 = vsel %vm285_vm0, %v283_v55, %v284_v56 }
 0x113   : > { %v287_v58 = vrot.slane %v286_v57, 1 }
 0x115   : > { %vm288_vm1 = vcmp.lt.s32.totalorder %v286_v57, %v287_v58 }
 0x116   : > { %v289_v59 = vsel %vm288_vm1, %v286_v57, %v287_v58 }
 0x117   : > { %2390 = vpush %v289_v59 }
 0x148   : > { %s2765_s30 = spop %2390 }
 0x149   : > { %s291_s4 = scalar_lea.vmem [#allocation2], %s2765_s30  ;;  %v335_v44 = vstv %s2765_s30 }
 0x14a   : > { %v292_v61 = vld [vmem:[%s291_s4] sm:$0x1]  ;;  %vm336_vm9 = vcmp.eq.s32.totalorder %v2716_v30, %v335_v44  ;;  %vm337_vm10 = vcmp.eq.s32.totalorder %v2719_v31, %v335_v44  ;;  %vm338_vm11 = vcmp.eq.s32.totalorder %v2722_v32, %v335_v44  ;;  %vm339_vm12 = vcmp.eq.s32.totalorder %v2725_v33, %v335_v44 }
 0x14b   : > { %vm293_vm3 = vcmp.eq.f32.partialorder %v292_v61, %v2730_v35  ;;  %vm340_vm13 = vcmp.eq.s32.totalorder %v2728_v34, %v335_v44  ;;  %vm341_vm14 = vcmp.eq.s32.totalorder %v2733_v36, %v335_v44  ;;  %vm342_vm15 = vcmp.eq.s32.totalorder %v2736_v37, %v335_v44 }
 0x14c   : > { %v294_v62 = vsel %vm293_vm3, %v2767_v60, 128  ;;  %vm343_vm0 = vcmp.eq.s32.totalorder %v2739_v38, %v335_v44 }
 0x14d   : > { %v296_v63 = vsel %vm295_vm2, %v294_v62, 2147483647 }
 0x14e   : > { %v298_v0 = vshra.s32 %v296_v63, 16  ;;  %v297_v2 = vand.u32 65535, %v296_v63 }
 0x150   : > { %v300_v1 = vcvt.s32.f32 %v298_v0  ;;  %v299_v4 = vcvt.s32.f32 %v297_v2 }
 0x152   : > { %301 = vmin.xlane.f32.xlu0 %v300_v1 }
 0x1db   : > { %v302_v3 = vpop.xlane.xlu0 %301 }
 0x1dc   : > { %vm303_vm4 = vcmp.eq.f32.partialorder %v300_v1, %v302_v3  ;;  %v308_v6 = vcvt.f32.s32 %v302_v3 }
 0x1dd   : > { %v304_v5 = vsel %vm303_vm4, %v299_v4, inf }
 0x1de   : > { %305 = vmin.xlane.f32.xlu1 %v304_v5  ;;  %v309_v14 = vshll.u32 %v308_v6, 16 }
 0x267   : > { %v306_v7 = vpop.xlane.xlu1 %305 }
 0x268   : > { %v307_v15 = vcvt.f32.s32 %v306_v7 }
 0x26a   : > { %v310_v18 = vadd.s32 %v309_v14, %v307_v15 }
 0x26c   : > { %v311_v19 = vrot.slane %v310_v18, 4 }
 0x26e   : > { %vm312_vm5 = vcmp.lt.s32.totalorder %v310_v18, %v311_v19 }
 0x26f   : > { %v313_v20 = vsel %vm312_vm5, %v310_v18, %v311_v19 }
 0x270   : > { %v314_v21 = vrot.slane %v313_v20, 2 }
 0x272   : > { %vm315_vm6 = vcmp.lt.s32.totalorder %v313_v20, %v314_v21 }
 0x273   : > { %v316_v22 = vsel %vm315_vm6, %v313_v20, %v314_v21 }
 0x274   : > { %v317_v23 = vrot.slane %v316_v22, 1 }
 0x276   : > { %vm318_vm7 = vcmp.lt.s32.totalorder %v316_v22, %v317_v23 }
 0x277   : > { %v319_v24 = vsel %vm318_vm7, %v316_v22, %v317_v23 }
 0x278   : > { %2392 = vpush %v319_v24 }
 0x2a9   : > { %s2775_s5 = spop %2392 }
 0x2aa   : > { %v331_v25 = vstv %s2775_s5 }
 0x2ab   : > { %vm332_vm8 = vcmp.eq.s32.totalorder %v2767_v60, %v331_v25 }
 0x2ac   : > { %v333_v26 = vsel %vm332_vm8, -inf, %v292_v61 }
 0x2ad   : > { %v344_v27 = vsel %vm295_vm2, %v333_v26, -inf  ;;  %334 = vst [vmem:[%s291_s4] sm:$0x1] %v333_v26 }
 0x2ae   : > { %345 = vmax.xlane.f32.xlu0 %v344_v27 }
 0x337   : > { %v346_v28 = vpop.xlane.xlu0 %345 }
 0x338   : > { %v347_v29 = vrot.slane %v346_v28, 4 }
 0x33a   : > { %v348_v39 = vmax.f32 %v346_v28, %v347_v29 }
 0x33c   : > { %v349_v40 = vrot.slane %v348_v39, 2 }
 0x33e   : > { %v350_v41 = vmax.f32 %v348_v39, %v349_v40 }
 0x340   : > { %v351_v42 = vrot.slane %v350_v41, 1 }
 0x342   : > { %v352_v43 = vmax.f32 %v350_v41, %v351_v42 }
 0x344   : > { %2394 = vpush %v352_v43 }
 0x375   : > { %s2395_s6 = spop %2394 }
 0x376   : > { %v354_v45 = vstv %s2395_s6 }
 0x377   : > { %v2792_v46 = vsel %vm336_vm9, %v354_v45, %v2694_v9  ;;  %v2795_v47 = vsel %vm337_vm10, %v354_v45, %v2698_v11  ;;  %v2798_v48 = vsel %vm338_vm11, %v354_v45, %v2692_v8  ;;  %v2801_v49 = vsel %vm339_vm12, %v354_v45, %v2696_v10 }
 0x378   : > { %v2804_v50 = vsel %vm340_vm13, %v354_v45, %v2702_v13  ;;  %v2807_v51 = vsel %vm341_vm14, %v354_v45, %v2700_v12  ;;  %v2810_v52 = vsel %vm342_vm15, %v354_v45, %v2710_v17  ;;  %v2813_v9 = vsel %vm343_vm0, %v354_v45, %v2708_v16 }
 0x379   : > { %v363_v11 = vmax.f32 %v2792_v46, %v2804_v50  ;;  %v364_v8 = vmax.f32 %v2795_v47, %v2807_v51  ;;  %v365_v10 = vmax.f32 %v2798_v48, %v2810_v52  ;;  %v366_v13 = vmax.f32 %v2801_v49, %v2813_v9 }
 0x37b   : > { %v367_v12 = vmax.f32 %v363_v11, %v364_v8  ;;  %v368_v53 = vmax.f32 %v365_v10, %v366_v13 }
 0x37d   : > { %v369_v54 = vmax.f32 %v367_v12, %v368_v53 }
 0x37f   : > { %v370_v17 = vrot.slane %v369_v54, 4 }
 0x381   : > { %v371_v55 = vmax.f32 %v369_v54, %v370_v17 }
 0x383   : > { %v372_v56 = vrot.slane %v371_v55, 2 }
 0x385   : > { %v373_v16 = vmax.f32 %v371_v55, %v372_v56 }
 0x387   : > { %v374_v57 = vrot.slane %v373_v16, 1 }
 0x389   : > { %v375_v58 = vmax.f32 %v373_v16, %v374_v57 }
 0x38b   : > { %2396 = vpush %v375_v58 }
 0x3bc   : > { %s2397_s7 = spop %2396 }
 0x3bd   : > { %v2823_v59 = vstv %s2397_s7 }
 0x3be   : > { %vm378_vm1 = vcmp.eq.f32.partialorder %v2792_v46, %v2823_v59  ;;  %vm379_vm3 = vcmp.eq.f32.partialorder %v2795_v47, %v2823_v59  ;;  %vm380_vm4 = vcmp.eq.f32.partialorder %v2798_v48, %v2823_v59  ;;  %vm381_vm5 = vcmp.eq.f32.partialorder %v2801_v49, %v2823_v59 }
 0x3bf   : > { %vm382_vm6 = vcmp.eq.f32.partialorder %v2804_v50, %v2823_v59  ;;  %vm383_vm7 = vcmp.eq.f32.partialorder %v2807_v51, %v2823_v59  ;;  %vm384_vm8 = vcmp.eq.f32.partialorder %v2810_v52, %v2823_v59  ;;  %vm385_vm9 = vcmp.eq.f32.partialorder %v2813_v9, %v2823_v59 }
 0x3c0   : > { %v386_v61 = vsel %vm378_vm1, %v2716_v30, 64  ;;  %v387_v62 = vsel %vm379_vm3, %v2719_v31, 64  ;;  %v388_v63 = vsel %vm380_vm4, %v2722_v32, 64  ;;  %v389_v0 = vsel %vm381_vm5, %v2725_v33, 64 }
 0x3c1   : > { %v390_v1 = vsel %vm382_vm6, %v2728_v34, 64  ;;  %v391_v2 = vsel %vm383_vm7, %v2733_v36, 64  ;;  %v392_v3 = vsel %vm384_vm8, %v2736_v37, 64  ;;  %v393_v4 = vsel %vm385_vm9, %v2739_v38, 64 }
 0x3c2   : > { %vm394_vm10 = vcmp.lt.s32.totalorder %v386_v61, %v390_v1  ;;  %vm396_vm11 = vcmp.lt.s32.totalorder %v387_v62, %v391_v2  ;;  %vm398_vm12 = vcmp.lt.s32.totalorder %v388_v63, %v392_v3  ;;  %vm400_vm13 = vcmp.lt.s32.totalorder %v389_v0, %v393_v4 }
 0x3c3   : > { %v395_v5 = vsel %vm394_vm10, %v386_v61, %v390_v1  ;;  %v397_v6 = vsel %vm396_vm11, %v387_v62, %v391_v2  ;;  %v399_v7 = vsel %vm398_vm12, %v388_v63, %v392_v3  ;;  %v401_v14 = vsel %vm400_vm13, %v389_v0, %v393_v4 }
 0x3c4   : > { %vm402_vm14 = vcmp.lt.s32.totalorder %v395_v5, %v397_v6  ;;  %vm404_vm15 = vcmp.lt.s32.totalorder %v399_v7, %v401_v14 }
 0x3c5   : > { %v403_v15 = vsel %vm402_vm14, %v395_v5, %v397_v6  ;;  %v405_v18 = vsel %vm404_vm15, %v399_v7, %v401_v14 }
 0x3c6   : > { %vm406_vm0 = vcmp.lt.s32.totalorder %v403_v15, %v405_v18 }
 0x3c7   : > { %v407_v19 = vsel %vm406_vm0, %v403_v15, %v405_v18 }
 0x3c8   : > { %v408_v20 = vrot.slane %v407_v19, 4 }
 0x3ca   : > { %vm409_vm1 = vcmp.lt.s32.totalorder %v407_v19, %v408_v20 }
 0x3cb   : > { %v410_v21 = vsel %vm409_vm1, %v407_v19, %v408_v20 }
 0x3cc   : > { %v411_v22 = vrot.slane %v410_v21, 2 }
 0x3ce   : > { %vm412_vm3 = vcmp.lt.s32.totalorder %v410_v21, %v411_v22 }
 0x3cf   : > { %v413_v23 = vsel %vm412_vm3, %v410_v21, %v411_v22 }
 0x3d0   : > { %v414_v24 = vrot.slane %v413_v23, 1 }
 0x3d2   : > { %vm415_vm4 = vcmp.lt.s32.totalorder %v413_v23, %v414_v24 }
 0x3d3   : > { %v416_v25 = vsel %vm415_vm4, %v413_v23, %v414_v24 }
 0x3d4   : > { %2398 = vpush %v416_v25 }
 0x405   : > { %s2849_s8 = spop %2398 }
 0x406   : > { %s418_s9 = scalar_lea.vmem [#allocation2], %s2849_s8  ;;  %v461_v3 = vstv %s2849_s8 }
 0x407   : > { %v419_v26 = vld [vmem:[%s418_s9] sm:$0x1]  ;;  %vm462_vm11 = vcmp.eq.s32.totalorder %v2716_v30, %v461_v3  ;;  %vm463_vm12 = vcmp.eq.s32.totalorder %v2719_v31, %v461_v3  ;;  %vm464_vm13 = vcmp.eq.s32.totalorder %v2722_v32, %v461_v3  ;;  %vm465_vm14 = vcmp.eq.s32.totalorder %v2725_v33, %v461_v3 }
 0x408   : > { %vm420_vm5 = vcmp.eq.f32.partialorder %v419_v26, %v2823_v59  ;;  %vm466_vm15 = vcmp.eq.s32.totalorder %v2728_v34, %v461_v3  ;;  %vm467_vm0 = vcmp.eq.s32.totalorder %v2733_v36, %v461_v3  ;;  %vm468_vm1 = vcmp.eq.s32.totalorder %v2736_v37, %v461_v3 }
 0x409   : > { %v421_v27 = vsel %vm420_vm5, %v2767_v60, 128  ;;  %vm469_vm3 = vcmp.eq.s32.totalorder %v2739_v38, %v461_v3 }
 0x40a   : > { %v422_v28 = vsel %vm295_vm2, %v421_v27, 2147483647 }
 0x40b   : > { %v424_v29 = vshra.s32 %v422_v28, 16  ;;  %v423_v40 = vand.u32 65535, %v422_v28 }
 0x40d   : > { %v426_v39 = vcvt.s32.f32 %v424_v29  ;;  %v425_v42 = vcvt.s32.f32 %v423_v40 }
 0x40f   : > { %427 = vmin.xlane.f32.xlu1 %v426_v39 }
 0x498   : > { %v428_v41 = vpop.xlane.xlu1 %427 }
 0x499   : > { %vm429_vm6 = vcmp.eq.f32.partialorder %v426_v39, %v428_v41  ;;  %v434_v44 = vcvt.f32.s32 %v428_v41 }
 0x49a   : > { %v430_v43 = vsel %vm429_vm6, %v425_v42, inf }
 0x49b   : > { %431 = vmin.xlane.f32.xlu0 %v430_v43  ;;  %v435_v11 = vshll.u32 %v434_v44, 16 }
 0x524   : > { %v432_v45 = vpop.xlane.xlu0 %431 }
 0x525   : > { %v433_v8 = vcvt.f32.s32 %v432_v45 }
 0x527   : > { %v436_v10 = vadd.s32 %v435_v11, %v433_v8 }
 0x529   : > { %v437_v13 = vrot.slane %v436_v10, 4 }
 0x52b   : > { %vm438_vm7 = vcmp.lt.s32.totalorder %v436_v10, %v437_v13 }
 0x52c   : > { %v439_v12 = vsel %vm438_vm7, %v436_v10, %v437_v13 }
 0x52d   : > { %v440_v53 = vrot.slane %v439_v12, 2 }
 0x52f   : > { %vm441_vm8 = vcmp.lt.s32.totalorder %v439_v12, %v440_v53 }
 0x530   : > { %v442_v54 = vsel %vm441_vm8, %v439_v12, %v440_v53 }
 0x531   : > { %v443_v17 = vrot.slane %v442_v54, 1 }
 0x533   : > { %vm444_vm9 = vcmp.lt.s32.totalorder %v442_v54, %v443_v17 }
 0x534   : > { %v445_v55 = vsel %vm444_vm9, %v442_v54, %v443_v17 }
 0x535   : > { %2400 = vpush %v445_v55 }
 0x566   : > { %s2857_s10 = spop %2400 }
 0x567   : > { %v457_v56 = vstv %s2857_s10 }
 0x568   : > { %vm458_vm10 = vcmp.eq.s32.totalorder %v2767_v60, %v457_v56 }
 0x569   : > { %v459_v16 = vsel %vm458_vm10, -inf, %v419_v26 }
 0x56a   : > { %v470_v57 = vsel %vm295_vm2, %v459_v16, -inf  ;;  %460 = vst [vmem:[%s418_s9] sm:$0x1] %v459_v16 }
 0x56b   : > { %471 = vmax.xlane.f32.xlu1 %v470_v57 }
 0x5f4   : > { %v472_v58 = vpop.xlane.xlu1 %471 }
 0x5f5   : > { %v473_v61 = vrot.slane %v472_v58, 4 }
 0x5f7   : > { %v474_v62 = vmax.f32 %v472_v58, %v473_v61 }
 0x5f9   : > { %v475_v63 = vrot.slane %v474_v62, 2 }
 0x5fb   : > { %v476_v0 = vmax.f32 %v474_v62, %v475_v63 }
 0x5fd   : > { %v477_v1 = vrot.slane %v476_v0, 1 }
 0x5ff   : > { %v478_v2 = vmax.f32 %v476_v0, %v477_v1 }
 0x601   : > { %2402 = vpush %v478_v2 }
 0x632   : > { %s2403_s11 = spop %2402 }
 0x633   : > { %v480_v4 = vstv %s2403_s11 }
 0x634   : > { %v2874_v5 = vsel %vm462_vm11, %v480_v4, %v2792_v46  ;;  %v2877_v6 = vsel %vm463_vm12, %v480_v4, %v2795_v47  ;;  %v2880_v7 = vsel %vm464_vm13, %v480_v4, %v2798_v48  ;;  %v2883_v14 = vsel %vm465_vm14, %v480_v4, %v2801_v49 }
 0x635   : > { %v2886_v15 = vsel %vm466_vm15, %v480_v4, %v2804_v50  ;;  %v2889_v18 = vsel %vm467_vm0, %v480_v4, %v2807_v51  ;;  %v2892_v19 = vsel %vm468_vm1, %v480_v4, %v2810_v52  ;;  %v2895_v46 = vsel %vm469_vm3, %v480_v4, %v2813_v9 }
 0x636   : > { %v489_v47 = vmax.f32 %v2874_v5, %v2886_v15  ;;  %v490_v48 = vmax.f32 %v2877_v6, %v2889_v18  ;;  %v491_v49 = vmax.f32 %v2880_v7, %v2892_v19  ;;  %v492_v50 = vmax.f32 %v2883_v14, %v2895_v46 }
 0x638   : > { %v493_v51 = vmax.f32 %v489_v47, %v490_v48  ;;  %v494_v20 = vmax.f32 %v491_v49, %v492_v50 }
 0x63a   : > { %v495_v21 = vmax.f32 %v493_v51, %v494_v20 }
 0x63c   : > { %v496_v52 = vrot.slane %v495_v21, 4 }
 0x63e   : > { %v497_v22 = vmax.f32 %v495_v21, %v496_v52 }
 0x640   : > { %v498_v23 = vrot.slane %v497_v22, 2 }
 0x642   : > { %v499_v9 = vmax.f32 %v497_v22, %v498_v23 }
 0x644   : > { %v500_v24 = vrot.slane %v499_v9, 1 }
 0x646   : > { %v501_v25 = vmax.f32 %v499_v9, %v500_v24 }
 0x648   : > { %2404 = vpush %v501_v25 }
 0x679   : > { %s2405_s17 = spop %2404 }
 0x67a   : > { %v2905_v26 = vstv %s2405_s17 }
 0x67b   : > { %vm504_vm4 = vcmp.eq.f32.partialorder %v2874_v5, %v2905_v26  ;;  %vm505_vm5 = vcmp.eq.f32.partialorder %v2877_v6, %v2905_v26  ;;  %vm506_vm6 = vcmp.eq.f32.partialorder %v2880_v7, %v2905_v26  ;;  %vm507_vm7 = vcmp.eq.f32.partialorder %v2883_v14, %v2905_v26 }
 0x67c   : > { %vm508_vm8 = vcmp.eq.f32.partialorder %v2886_v15, %v2905_v26  ;;  %vm509_vm9 = vcmp.eq.f32.partialorder %v2889_v18, %v2905_v26  ;;  %vm510_vm10 = vcmp.eq.f32.partialorder %v2892_v19, %v2905_v26  ;;  %vm511_vm11 = vcmp.eq.f32.partialorder %v2895_v46, %v2905_v26 }
 0x67d   : > { %v512_v27 = vsel %vm504_vm4, %v2716_v30, 64  ;;  %v513_v28 = vsel %vm505_vm5, %v2719_v31, 64  ;;  %v514_v29 = vsel %vm506_vm6, %v2722_v32, 64  ;;  %v515_v39 = vsel %vm507_vm7, %v2725_v33, 64 }
 0x67e   : > { %v516_v40 = vsel %vm508_vm8, %v2728_v34, 64  ;;  %v517_v41 = vsel %vm509_vm9, %v2733_v36, 64  ;;  %v518_v42 = vsel %vm510_vm10, %v2736_v37, 64  ;;  %v519_v43 = vsel %vm511_vm11, %v2739_v38, 64 }
 0x67f   : > { %vm520_vm12 = vcmp.lt.s32.totalorder %v512_v27, %v516_v40  ;;  %vm522_vm13 = vcmp.lt.s32.totalorder %v513_v28, %v517_v41  ;;  %vm524_vm14 = vcmp.lt.s32.totalorder %v514_v29, %v518_v42  ;;  %vm526_vm15 = vcmp.lt.s32.totalorder %v515_v39, %v519_v43 }
 0x680   : > { %v521_v44 = vsel %vm520_vm12, %v512_v27, %v516_v40  ;;  %v523_v45 = vsel %vm522_vm13, %v513_v28, %v517_v41  ;;  %v525_v11 = vsel %vm524_vm14, %v514_v29, %v518_v42  ;;  %v527_v8 = vsel %vm526_vm15, %v515_v39, %v519_v43 }
 0x681   : > { %vm528_vm0 = vcmp.lt.s32.totalorder %v521_v44, %v523_v45  ;;  %vm530_vm1 = vcmp.lt.s32.totalorder %v525_v11, %v527_v8 }
 0x682   : > { %v529_v10 = vsel %vm528_vm0, %v521_v44, %v523_v45  ;;  %v531_v13 = vsel %vm530_vm1, %v525_v11, %v527_v8 }
 0x683   : > { %vm532_vm3 = vcmp.lt.s32.totalorder %v529_v10, %v531_v13 }
 0x684   : > { %v533_v12 = vsel %vm532_vm3, %v529_v10, %v531_v13 }
 0x685   : > { %v534_v53 = vrot.slane %v533_v12, 4 }
 0x687   : > { %vm535_vm4 = vcmp.lt.s32.totalorder %v533_v12, %v534_v53 }
 0x688   : > { %v536_v54 = vsel %vm535_vm4, %v533_v12, %v534_v53 }
 0x689   : > { %v537_v17 = vrot.slane %v536_v54, 2 }
 0x68b   : > { %vm538_vm5 = vcmp.lt.s32.totalorder %v536_v54, %v537_v17 }
 0x68c   : > { %v539_v55 = vsel %vm538_vm5, %v536_v54, %v537_v17 }
 0x68d   : > { %v540_v56 = vrot.slane %v539_v55, 1 }
 0x68f   : > { %vm541_vm6 = vcmp.lt.s32.totalorder %v539_v55, %v540_v56 }
 0x690   : > { %v542_v16 = vsel %vm541_vm6, %v539_v55, %v540_v56 }
 0x691   : > { %2406 = vpush %v542_v16 }
 0x6c2   : > { %s2931_s19 = spop %2406 }
 0x6c3   : > { %s544_s20 = scalar_lea.vmem [#allocation2], %s2931_s19  ;;  %v587_v43 = vstv %s2931_s19 }
 0x6c4   : > { %v545_v57 = vld [vmem:[%s544_s20] sm:$0x1]  ;;  %vm588_vm13 = vcmp.eq.s32.totalorder %v2716_v30, %v587_v43  ;;  %vm589_vm14 = vcmp.eq.s32.totalorder %v2719_v31, %v587_v43  ;;  %vm590_vm15 = vcmp.eq.s32.totalorder %v2722_v32, %v587_v43  ;;  %vm591_vm0 = vcmp.eq.s32.totalorder %v2725_v33, %v587_v43 }
 0x6c5   : > { %vm546_vm7 = vcmp.eq.f32.partialorder %v545_v57, %v2905_v26  ;;  %vm592_vm1 = vcmp.eq.s32.totalorder %v2728_v34, %v587_v43  ;;  %vm593_vm3 = vcmp.eq.s32.totalorder %v2733_v36, %v587_v43  ;;  %vm594_vm4 = vcmp.eq.s32.totalorder %v2736_v37, %v587_v43 }
 0x6c6   : > { %v547_v58 = vsel %vm546_vm7, %v2767_v60, 128  ;;  %vm595_vm5 = vcmp.eq.s32.totalorder %v2739_v38, %v587_v43 }
 0x6c7   : > { %v548_v61 = vsel %vm295_vm2, %v547_v58, 2147483647 }
 0x6c8   : > { %v550_v62 = vshra.s32 %v548_v61, 16  ;;  %v549_v0 = vand.u32 65535, %v548_v61 }
 0x6ca   : > { %v552_v63 = vcvt.s32.f32 %v550_v62  ;;  %v551_v2 = vcvt.s32.f32 %v549_v0 }
 0x6cc   : > { %553 = vmin.xlane.f32.xlu0 %v552_v63 }
 0x755   : > { %v554_v1 = vpop.xlane.xlu0 %553 }
 0x756   : > { %vm555_vm8 = vcmp.eq.f32.partialorder %v552_v63, %v554_v1  ;;  %v560_v4 = vcvt.f32.s32 %v554_v1 }
 0x757   : > { %v556_v3 = vsel %vm555_vm8, %v551_v2, inf }
 0x758   : > { %557 = vmin.xlane.f32.xlu1 %v556_v3  ;;  %v561_v48 = vshll.u32 %v560_v4, 16 }
 0x7e1   : > { %v558_v47 = vpop.xlane.xlu1 %557 }
 0x7e2   : > { %v559_v49 = vcvt.f32.s32 %v558_v47 }
 0x7e4   : > { %v562_v50 = vadd.s32 %v561_v48, %v559_v49 }
 0x7e6   : > { %v563_v51 = vrot.slane %v562_v50, 4 }
 0x7e8   : > { %vm564_vm9 = vcmp.lt.s32.totalorder %v562_v50, %v563_v51 }
 0x7e9   : > { %v565_v20 = vsel %vm564_vm9, %v562_v50, %v563_v51 }
 0x7ea   : > { %v566_v21 = vrot.slane %v565_v20, 2 }
 0x7ec   : > { %vm567_vm10 = vcmp.lt.s32.totalorder %v565_v20, %v566_v21 }
 0x7ed   : > { %v568_v52 = vsel %vm567_vm10, %v565_v20, %v566_v21 }
 0x7ee   : > { %v569_v22 = vrot.slane %v568_v52, 1 }
 0x7f0   : > { %vm570_vm11 = vcmp.lt.s32.totalorder %v568_v52, %v569_v22 }
 0x7f1   : > { %v571_v23 = vsel %vm570_vm11, %v568_v52, %v569_v22 }
 0x7f2   : > { %2408 = vpush %v571_v23 }
 0x823   : > { %s2939_s25 = spop %2408 }
 0x824   : > { %v583_v9 = vstv %s2939_s25 }
 0x825   : > { %vm584_vm12 = vcmp.eq.s32.totalorder %v2767_v60, %v583_v9 }
 0x826   : > { %v585_v24 = vsel %vm584_vm12, -inf, %v545_v57 }
 0x827   : > { %v596_v25 = vsel %vm295_vm2, %v585_v24, -inf  ;;  %586 = vst [vmem:[%s544_s20] sm:$0x1] %v585_v24 }
 0x828   : > { %597 = vmax.xlane.f32.xlu0 %v596_v25 }
 0x8b1   : > { %v598_v27 = vpop.xlane.xlu0 %597 }
 0x8b2   : > { %v599_v28 = vrot.slane %v598_v27, 4 }
 0x8b4   : > { %v600_v29 = vmax.f32 %v598_v27, %v599_v28 }
 0x8b6   : > { %v601_v39 = vrot.slane %v600_v29, 2 }
 0x8b8   : > { %v602_v40 = vmax.f32 %v600_v29, %v601_v39 }
 0x8ba   : > { %v603_v41 = vrot.slane %v602_v40, 1 }
 0x8bc   : > { %v604_v42 = vmax.f32 %v602_v40, %v603_v41 }
 0x8be   : > { %2410 = vpush %v604_v42 }
 0x8ef   : > { %s2411_s26 = spop %2410 }
 0x8f0   : > { %v606_v44 = vstv %s2411_s26 }
 0x8f1   : > { %v2956_v45 = vsel %vm588_vm13, %v606_v44, %v2874_v5  ;;  %v2959_v11 = vsel %vm589_vm14, %v606_v44, %v2877_v6  ;;  %v2962_v8 = vsel %vm590_vm15, %v606_v44, %v2880_v7  ;;  %v2965_v10 = vsel %vm591_vm0, %v606_v44, %v2883_v14 }
 0x8f2   : > { %v2968_v13 = vsel %vm592_vm1, %v606_v44, %v2886_v15  ;;  %v2971_v12 = vsel %vm593_vm3, %v606_v44, %v2889_v18  ;;  %v2974_v53 = vsel %vm594_vm4, %v606_v44, %v2892_v19  ;;  %v2977_v5 = vsel %vm595_vm5, %v606_v44, %v2895_v46 }
 0x8f3   : > { %v615_v6 = vmax.f32 %v2956_v45, %v2968_v13  ;;  %v616_v7 = vmax.f32 %v2959_v11, %v2971_v12  ;;  %v617_v14 = vmax.f32 %v2962_v8, %v2974_v53  ;;  %v618_v15 = vmax.f32 %v2965_v10, %v2977_v5 }
 0x8f5   : > { %v619_v18 = vmax.f32 %v615_v6, %v616_v7  ;;  %v620_v54 = vmax.f32 %v617_v14, %v618_v15 }
 0x8f7   : > { %v621_v17 = vmax.f32 %v619_v18, %v620_v54 }
 0x8f9   : > { %v622_v19 = vrot.slane %v621_v17, 4 }
 0x8fb   : > { %v623_v55 = vmax.f32 %v621_v17, %v622_v19 }
 0x8fd   : > { %v624_v56 = vrot.slane %v623_v55, 2 }
 0x8ff   : > { %v625_v46 = vmax.f32 %v623_v55, %v624_v56 }
 0x901   : > { %v626_v16 = vrot.slane %v625_v46, 1 }
 0x903   : > { %v627_v57 = vmax.f32 %v625_v46, %v626_v16 }
 0x905   : > { %2412 = vpush %v627_v57 }
 0x936   : > { %s2413_s27 = spop %2412 }
 0x937   : > { %v2987_v58 = vstv %s2413_s27 }
 0x938   : > { %vm630_vm6 = vcmp.eq.f32.partialorder %v2956_v45, %v2987_v58  ;;  %vm631_vm7 = vcmp.eq.f32.partialorder %v2959_v11, %v2987_v58  ;;  %vm632_vm8 = vcmp.eq.f32.partialorder %v2962_v8, %v2987_v58  ;;  %vm633_vm9 = vcmp.eq.f32.partialorder %v2965_v10, %v2987_v58 }
 0x939   : > { %vm634_vm10 = vcmp.eq.f32.partialorder %v2968_v13, %v2987_v58  ;;  %vm635_vm11 = vcmp.eq.f32.partialorder %v2971_v12, %v2987_v58  ;;  %vm636_vm12 = vcmp.eq.f32.partialorder %v2974_v53, %v2987_v58  ;;  %vm637_vm13 = vcmp.eq.f32.partialorder %v2977_v5, %v2987_v58 }
 0x93a   : > { %v638_v61 = vsel %vm630_vm6, %v2716_v30, 64  ;;  %v639_v62 = vsel %vm631_vm7, %v2719_v31, 64  ;;  %v640_v63 = vsel %vm632_vm8, %v2722_v32, 64  ;;  %v641_v0 = vsel %vm633_vm9, %v2725_v33, 64 }
 0x93b   : > { %v642_v1 = vsel %vm634_vm10, %v2728_v34, 64  ;;  %v643_v2 = vsel %vm635_vm11, %v2733_v36, 64  ;;  %v644_v3 = vsel %vm636_vm12, %v2736_v37, 64  ;;  %v645_v4 = vsel %vm637_vm13, %v2739_v38, 64 }
 0x93c   : > { %vm646_vm14 = vcmp.lt.s32.totalorder %v638_v61, %v642_v1  ;;  %vm648_vm15 = vcmp.lt.s32.totalorder %v639_v62, %v643_v2  ;;  %vm650_vm0 = vcmp.lt.s32.totalorder %v640_v63, %v644_v3  ;;  %vm652_vm1 = vcmp.lt.s32.totalorder %v641_v0, %v645_v4 }
 0x93d   : > { %v647_v47 = vsel %vm646_vm14, %v638_v61, %v642_v1  ;;  %v649_v48 = vsel %vm648_vm15, %v639_v62, %v643_v2  ;;  %v651_v49 = vsel %vm650_vm0, %v640_v63, %v644_v3  ;;  %v653_v50 = vsel %vm652_vm1, %v641_v0, %v645_v4 }
 0x93e   : > { %vm654_vm3 = vcmp.lt.s32.totalorder %v647_v47, %v649_v48  ;;  %vm656_vm4 = vcmp.lt.s32.totalorder %v651_v49, %v653_v50 }
 0x93f   : > { %v655_v51 = vsel %vm654_vm3, %v647_v47, %v649_v48  ;;  %v657_v20 = vsel %vm656_vm4, %v651_v49, %v653_v50 }
 0x940   : > { %vm658_vm5 = vcmp.lt.s32.totalorder %v655_v51, %v657_v20 }
 0x941   : > { %v659_v21 = vsel %vm658_vm5, %v655_v51, %v657_v20 }
 0x942   : > { %v660_v52 = vrot.slane %v659_v21, 4 }
 0x944   : > { %vm661_vm6 = vcmp.lt.s32.totalorder %v659_v21, %v660_v52 }
 0x945   : > { %v662_v22 = vsel %vm661_vm6, %v659_v21, %v660_v52 }
 0x946   : > { %v663_v23 = vrot.slane %v662_v22, 2 }
 0x948   : > { %vm664_vm7 = vcmp.lt.s32.totalorder %v662_v22, %v663_v23 }
 0x949   : > { %v665_v9 = vsel %vm664_vm7, %v662_v22, %v663_v23 }
 0x94a   : > { %v666_v24 = vrot.slane %v665_v9, 1 }
 0x94c   : > { %vm667_vm8 = vcmp.lt.s32.totalorder %v665_v9, %v666_v24 }
 0x94d   : > { %v668_v25 = vsel %vm667_vm8, %v665_v9, %v666_v24 }
 0x94e   : > { %2414 = vpush %v668_v25 }
 0x97f   : > { %s3013_s28 = spop %2414 }
 0x980   : > { %s670_s29 = scalar_lea.vmem [#allocation2], %s3013_s28  ;;  %v713_v47 = vstv %s3013_s28 }
 0x981   : > { %v671_v27 = vld [vmem:[%s670_s29] sm:$0x1]  ;;  %vm714_vm15 = vcmp.eq.s32.totalorder %v2716_v30, %v713_v47  ;;  %vm715_vm0 = vcmp.eq.s32.totalorder %v2719_v31, %v713_v47  ;;  %vm716_vm1 = vcmp.eq.s32.totalorder %v2722_v32, %v713_v47  ;;  %vm717_vm3 = vcmp.eq.s32.totalorder %v2725_v33, %v713_v47 }
 0x982   : > { %vm672_vm9 = vcmp.eq.f32.partialorder %v671_v27, %v2987_v58  ;;  %vm718_vm4 = vcmp.eq.s32.totalorder %v2728_v34, %v713_v47  ;;  %vm719_vm5 = vcmp.eq.s32.totalorder %v2733_v36, %v713_v47  ;;  %vm720_vm6 = vcmp.eq.s32.totalorder %v2736_v37, %v713_v47 }
 0x983   : > { %v673_v28 = vsel %vm672_vm9, %v2767_v60, 128  ;;  %vm721_vm7 = vcmp.eq.s32.totalorder %v2739_v38, %v713_v47 }
 0x984   : > { %v674_v29 = vsel %vm295_vm2, %v673_v28, 2147483647 }
 0x985   : > { %v676_v39 = vshra.s32 %v674_v29, 16  ;;  %v675_v41 = vand.u32 65535, %v674_v29 }
 0x987   : > { %v678_v40 = vcvt.s32.f32 %v676_v39  ;;  %v677_v43 = vcvt.s32.f32 %v675_v41 }
 0x989   : > { %679 = vmin.xlane.f32.xlu1 %v678_v40 }
 0xa12   : > { %v680_v42 = vpop.xlane.xlu1 %679 }
 0xa13   : > { %vm681_vm10 = vcmp.eq.f32.partialorder %v678_v40, %v680_v42  ;;  %v686_v6 = vcvt.f32.s32 %v680_v42 }
 0xa14   : > { %v682_v44 = vsel %vm681_vm10, %v677_v43, inf }
 0xa15   : > { %683 = vmin.xlane.f32.xlu0 %v682_v44  ;;  %v687_v14 = vshll.u32 %v686_v6, 16 }
 0xa9e   : > { %v684_v7 = vpop.xlane.xlu0 %683 }
 0xa9f   : > { %v685_v15 = vcvt.f32.s32 %v684_v7 }
 0xaa1   : > { %v688_v18 = vadd.s32 %v687_v14, %v685_v15 }
 0xaa3   : > { %v689_v54 = vrot.slane %v688_v18, 4 }
 0xaa5   : > { %vm690_vm11 = vcmp.lt.s32.totalorder %v688_v18, %v689_v54 }
 0xaa6   : > { %v691_v17 = vsel %vm690_vm11, %v688_v18, %v689_v54 }
 0xaa7   : > { %v692_v19 = vrot.slane %v691_v17, 2 }
 0xaa9   : > { %vm693_vm12 = vcmp.lt.s32.totalorder %v691_v17, %v692_v19 }
 0xaaa   : > { %v694_v55 = vsel %vm693_vm12, %v691_v17, %v692_v19 }
 0xaab   : > { %v695_v56 = vrot.slane %v694_v55, 1 }
 0xaad   : > { %vm696_vm13 = vcmp.lt.s32.totalorder %v694_v55, %v695_v56 }
 0xaae   : > { %v697_v46 = vsel %vm696_vm13, %v694_v55, %v695_v56 }
 0xaaf   : > { %2416 = vpush %v697_v46 }
 0xae0   : > { %s3021_s4 = spop %2416 }
 0xae1   : > { %v709_v16 = vstv %s3021_s4 }
 0xae2   : > { %vm710_vm14 = vcmp.eq.s32.totalorder %v2767_v60, %v709_v16 }
 0xae3   : > { %v711_v57 = vsel %vm710_vm14, -inf, %v671_v27 }
 0xae4   : > { %v722_v61 = vsel %vm295_vm2, %v711_v57, -inf  ;;  %712 = vst [vmem:[%s670_s29] sm:$0x1] %v711_v57 }
 0xae5   : > { %723 = vmax.xlane.f32.xlu1 %v722_v61 }
 0xb6e   : > { %v724_v62 = vpop.xlane.xlu1 %723 }
 0xb6f   : > { %v725_v63 = vrot.slane %v724_v62, 4 }
 0xb71   : > { %v726_v0 = vmax.f32 %v724_v62, %v725_v63 }
 0xb73   : > { %v727_v1 = vrot.slane %v726_v0, 2 }
 0xb75   : > { %v728_v2 = vmax.f32 %v726_v0, %v727_v1 }
 0xb77   : > { %v729_v3 = vrot.slane %v728_v2, 1 }
 0xb79   : > { %v730_v4 = vmax.f32 %v728_v2, %v729_v3 }
 0xb7b   : > { %2418 = vpush %v730_v4 }
 0xbac   : > { %s2419_s6 = spop %2418 }
 0xbad   : > { %v732_v48 = vstv %s2419_s6 }
 0xbae   : > { %v3038_v49 = vsel %vm714_vm15, %v732_v48, %v2956_v45  ;;  %v3041_v50 = vsel %vm715_vm0, %v732_v48, %v2959_v11  ;;  %v3044_v51 = vsel %vm716_vm1, %v732_v48, %v2962_v8  ;;  %v3047_v20 = vsel %vm717_vm3, %v732_v48, %v2965_v10 }
 0xbaf   : > { %v3050_v21 = vsel %vm718_vm4, %v732_v48, %v2968_v13  ;;  %v3053_v52 = vsel %vm719_vm5, %v732_v48, %v2971_v12  ;;  %v3056_v22 = vsel %vm720_vm6, %v732_v48, %v2974_v53  ;;  %v3059_v45 = vsel %vm721_vm7, %v732_v48, %v2977_v5 }
 0xbb0   : > { %v741_v11 = vmax.f32 %v3038_v49, %v3050_v21  ;;  %v742_v8 = vmax.f32 %v3041_v50, %v3053_v52  ;;  %v743_v10 = vmax.f32 %v3044_v51, %v3056_v22  ;;  %v744_v13 = vmax.f32 %v3047_v20, %v3059_v45 }
 0xbb2   : > { %v745_v12 = vmax.f32 %v741_v11, %v742_v8  ;;  %v746_v23 = vmax.f32 %v743_v10, %v744_v13 }
 0xbb4   : > { %v747_v9 = vmax.f32 %v745_v12, %v746_v23 }
 0xbb6   : > { %v748_v53 = vrot.slane %v747_v9, 4 }
 0xbb8   : > { %v749_v24 = vmax.f32 %v747_v9, %v748_v53 }
 0xbba   : > { %v750_v25 = vrot.slane %v749_v24, 2 }
 0xbbc   : > { %v751_v5 = vmax.f32 %v749_v24, %v750_v25 }
 0xbbe   : > { %v752_v27 = vrot.slane %v751_v5, 1 }
 0xbc0   : > { %v753_v28 = vmax.f32 %v751_v5, %v752_v27 }
 0xbc2   : > { %2420 = vpush %v753_v28 }
 0xbf3   : > { %s2421_s7 = spop %2420 }
 0xbf4   : > { %v3069_v29 = vstv %s2421_s7 }
 0xbf5   : > { %vm756_vm8 = vcmp.eq.f32.partialorder %v3038_v49, %v3069_v29  ;;  %vm757_vm9 = vcmp.eq.f32.partialorder %v3041_v50, %v3069_v29  ;;  %vm758_vm10 = vcmp.eq.f32.partialorder %v3044_v51, %v3069_v29  ;;  %vm759_vm11 = vcmp.eq.f32.partialorder %v3047_v20, %v3069_v29 }
 0xbf6   : > { %vm760_vm12 = vcmp.eq.f32.partialorder %v3050_v21, %v3069_v29  ;;  %vm761_vm13 = vcmp.eq.f32.partialorder %v3053_v52, %v3069_v29  ;;  %vm762_vm14 = vcmp.eq.f32.partialorder %v3056_v22, %v3069_v29  ;;  %vm763_vm15 = vcmp.eq.f32.partialorder %v3059_v45, %v3069_v29 }
 0xbf7   : > { %v764_v39 = vsel %vm756_vm8, %v2716_v30, 64  ;;  %v765_v40 = vsel %vm757_vm9, %v2719_v31, 64  ;;  %v766_v41 = vsel %vm758_vm10, %v2722_v32, 64  ;;  %v767_v42 = vsel %vm759_vm11, %v2725_v33, 64 }
 0xbf8   : > { %v768_v43 = vsel %vm760_vm12, %v2728_v34, 64  ;;  %v769_v44 = vsel %vm761_vm13, %v2733_v36, 64  ;;  %v770_v6 = vsel %vm762_vm14, %v2736_v37, 64  ;;  %v771_v7 = vsel %vm763_vm15, %v2739_v38, 64 }
 0xbf9   : > { %vm772_vm0 = vcmp.lt.s32.totalorder %v764_v39, %v768_v43  ;;  %vm774_vm1 = vcmp.lt.s32.totalorder %v765_v40, %v769_v44  ;;  %vm776_vm3 = vcmp.lt.s32.totalorder %v766_v41, %v770_v6  ;;  %vm778_vm4 = vcmp.lt.s32.totalorder %v767_v42, %v771_v7 }
 0xbfa   : > { %v773_v14 = vsel %vm772_vm0, %v764_v39, %v768_v43  ;;  %v775_v15 = vsel %vm774_vm1, %v765_v40, %v769_v44  ;;  %v777_v18 = vsel %vm776_vm3, %v766_v41, %v770_v6  ;;  %v779_v54 = vsel %vm778_vm4, %v767_v42, %v771_v7 }
 0xbfb   : > { %vm780_vm5 = vcmp.lt.s32.totalorder %v773_v14, %v775_v15  ;;  %vm782_vm6 = vcmp.lt.s32.totalorder %v777_v18, %v779_v54 }
 0xbfc   : > { %v781_v17 = vsel %vm780_vm5, %v773_v14, %v775_v15  ;;  %v783_v19 = vsel %vm782_vm6, %v777_v18, %v779_v54 }
 0xbfd   : > { %vm784_vm7 = vcmp.lt.s32.totalorder %v781_v17, %v783_v19 }
 0xbfe   : > { %v785_v55 = vsel %vm784_vm7, %v781_v17, %v783_v19 }
 0xbff   : > { %v786_v56 = vrot.slane %v785_v55, 4 }
 0xc01   : > { %vm787_vm8 = vcmp.lt.s32.totalorder %v785_v55, %v786_v56 }
 0xc02   : > { %v788_v46 = vsel %vm787_vm8, %v785_v55, %v786_v56 }
 0xc03   : > { %v789_v16 = vrot.slane %v788_v46, 2 }
 0xc05   : > { %vm790_vm9 = vcmp.lt.s32.totalorder %v788_v46, %v789_v16 }
 0xc06   : > { %v791_v57 = vsel %vm790_vm9, %v788_v46, %v789_v16 }
 0xc07   : > { %v792_v61 = vrot.slane %v791_v57, 1 }
 0xc09   : > { %vm793_vm10 = vcmp.lt.s32.totalorder %v791_v57, %v792_v61 }
 0xc0a   : > { %v794_v62 = vsel %vm793_vm10, %v791_v57, %v792_v61 }
 0xc0b   : > { %2422 = vpush %v794_v62 }
 0xc3c   : > { %s3095_s9 = spop %2422 }
 0xc3d   : > { %s796_s11 = scalar_lea.vmem [#allocation2], %s3095_s9  ;;  %v839_v15 = vstv %s3095_s9 }
 0xc3e   : > { %v797_v63 = vld [vmem:[%s796_s11] sm:$0x1]  ;;  %vm840_vm1 = vcmp.eq.s32.totalorder %v2716_v30, %v839_v15  ;;  %vm841_vm3 = vcmp.eq.s32.totalorder %v2719_v31, %v839_v15  ;;  %vm842_vm4 = vcmp.eq.s32.totalorder %v2722_v32, %v839_v15  ;;  %vm843_vm5 = vcmp.eq.s32.totalorder %v2725_v33, %v839_v15 }
 0xc3f   : > { %vm798_vm11 = vcmp.eq.f32.partialorder %v797_v63, %v3069_v29  ;;  %vm844_vm6 = vcmp.eq.s32.totalorder %v2728_v34, %v839_v15  ;;  %vm845_vm7 = vcmp.eq.s32.totalorder %v2733_v36, %v839_v15  ;;  %vm846_vm8 = vcmp.eq.s32.totalorder %v2736_v37, %v839_v15 }
 0xc40   : > { %v799_v0 = vsel %vm798_vm11, %v2767_v60, 128  ;;  %vm847_vm9 = vcmp.eq.s32.totalorder %v2739_v38, %v839_v15 }
 0xc41   : > { %v800_v1 = vsel %vm295_vm2, %v799_v0, 2147483647 }
 0xc42   : > { %v802_v2 = vshra.s32 %v800_v1, 16  ;;  %v801_v4 = vand.u32 65535, %v800_v1 }
 0xc44   : > { %v804_v3 = vcvt.s32.f32 %v802_v2  ;;  %v803_v48 = vcvt.s32.f32 %v801_v4 }
 0xc46   : > { %805 = vmin.xlane.f32.xlu0 %v804_v3 }
 0xccf   : > { %v806_v47 = vpop.xlane.xlu0 %805 }
 0xcd0   : > { %vm807_vm12 = vcmp.eq.f32.partialorder %v804_v3, %v806_v47  ;;  %v812_v8 = vcvt.f32.s32 %v806_v47 }
 0xcd1   : > { %v808_v11 = vsel %vm807_vm12, %v803_v48, inf }
 0xcd2   : > { %809 = vmin.xlane.f32.xlu1 %v808_v11  ;;  %v813_v13 = vshll.u32 %v812_v8, 16 }
 0xd5b   : > { %v810_v10 = vpop.xlane.xlu1 %809 }
 0xd5c   : > { %v811_v12 = vcvt.f32.s32 %v810_v10 }
 0xd5e   : > { %v814_v23 = vadd.s32 %v813_v13, %v811_v12 }
 0xd60   : > { %v815_v9 = vrot.slane %v814_v23, 4 }
 0xd62   : > { %vm816_vm13 = vcmp.lt.s32.totalorder %v814_v23, %v815_v9 }
 0xd63   : > { %v817_v53 = vsel %vm816_vm13, %v814_v23, %v815_v9 }
 0xd64   : > { %v818_v24 = vrot.slane %v817_v53, 2 }
 0xd66   : > { %vm819_vm14 = vcmp.lt.s32.totalorder %v817_v53, %v818_v24 }
 0xd67   : > { %v820_v25 = vsel %vm819_vm14, %v817_v53, %v818_v24 }
 0xd68   : > { %v821_v5 = vrot.slane %v820_v25, 1 }
 0xd6a   : > { %vm822_vm15 = vcmp.lt.s32.totalorder %v820_v25, %v821_v5 }
 0xd6b   : > { %v823_v27 = vsel %vm822_vm15, %v820_v25, %v821_v5 }
 0xd6c   : > { %2424 = vpush %v823_v27 }
 0xd9d   : > { %s3103_s17 = spop %2424 }
 0xd9e   : > { %v835_v28 = vstv %s3103_s17 }
 0xd9f   : > { %vm836_vm0 = vcmp.eq.s32.totalorder %v2767_v60, %v835_v28 }
 0xda0   : > { %v837_v39 = vsel %vm836_vm0, -inf, %v797_v63 }
 0xda1   : > { %v848_v40 = vsel %vm295_vm2, %v837_v39, -inf  ;;  %838 = vst [vmem:[%s796_s11] sm:$0x1] %v837_v39 }
 0xda2   : > { %849 = vmax.xlane.f32.xlu0 %v848_v40 }
 0xe2b   : > { %v850_v41 = vpop.xlane.xlu0 %849 }
 0xe2c   : > { %v851_v42 = vrot.slane %v850_v41, 4 }
 0xe2e   : > { %v852_v43 = vmax.f32 %v850_v41, %v851_v42 }
 0xe30   : > { %v853_v44 = vrot.slane %v852_v43, 2 }
 0xe32   : > { %v854_v6 = vmax.f32 %v852_v43, %v853_v44 }
 0xe34   : > { %v855_v7 = vrot.slane %v854_v6, 1 }
 0xe36   : > { %v856_v14 = vmax.f32 %v854_v6, %v855_v7 }
 0xe38   : > { %2426 = vpush %v856_v14 }
 0xe69   : > { %s2427_s20 = spop %2426 }
 0xe6a   : > { %v858_v18 = vstv %s2427_s20 }
 0xe6b   : > { %v3120_v54 = vsel %vm840_vm1, %v858_v18, %v3038_v49  ;;  %v3123_v17 = vsel %vm841_vm3, %v858_v18, %v3041_v50  ;;  %v3126_v19 = vsel %vm842_vm4, %v858_v18, %v3044_v51  ;;  %v3129_v55 = vsel %vm843_vm5, %v858_v18, %v3047_v20 }
 0xe6c   : > { %v3132_v56 = vsel %vm844_vm6, %v858_v18, %v3050_v21  ;;  %v3135_v46 = vsel %vm845_vm7, %v858_v18, %v3053_v52  ;;  %v3138_v16 = vsel %vm846_vm8, %v858_v18, %v3056_v22  ;;  %v3141_v49 = vsel %vm847_vm9, %v858_v18, %v3059_v45 }
 0xe6d   : > { %v867_v50 = vmax.f32 %v3120_v54, %v3132_v56  ;;  %v868_v51 = vmax.f32 %v3123_v17, %v3135_v46  ;;  %v869_v20 = vmax.f32 %v3126_v19, %v3138_v16  ;;  %v870_v21 = vmax.f32 %v3129_v55, %v3141_v49 }
 0xe6f   : > { %v871_v52 = vmax.f32 %v867_v50, %v868_v51  ;;  %v872_v57 = vmax.f32 %v869_v20, %v870_v21 }
 0xe71   : > { %v873_v61 = vmax.f32 %v871_v52, %v872_v57 }
 0xe73   : > { %v874_v22 = vrot.slane %v873_v61, 4 }
 0xe75   : > { %v875_v62 = vmax.f32 %v873_v61, %v874_v22 }
 0xe77   : > { %v876_v63 = vrot.slane %v875_v62, 2 }
 0xe79   : > { %v877_v45 = vmax.f32 %v875_v62, %v876_v63 }
 0xe7b   : > { %v878_v0 = vrot.slane %v877_v45, 1 }
 0xe7d   : > { %v879_v1 = vmax.f32 %v877_v45, %v878_v0 }
 0xe7f   : > { %2428 = vpush %v879_v1 }
 0xeb0   : > { %s2429_s26 = spop %2428 }
 0xeb1   : > { %v3151_v2 = vstv %s2429_s26 }
 0xeb2   : > { %vm882_vm10 = vcmp.eq.f32.partialorder %v3120_v54, %v3151_v2  ;;  %vm883_vm11 = vcmp.eq.f32.partialorder %v3123_v17, %v3151_v2  ;;  %vm884_vm12 = vcmp.eq.f32.partialorder %v3126_v19, %v3151_v2  ;;  %vm885_vm13 = vcmp.eq.f32.partialorder %v3129_v55, %v3151_v2 }
 0xeb3   : > { %vm886_vm14 = vcmp.eq.f32.partialorder %v3132_v56, %v3151_v2  ;;  %vm887_vm15 = vcmp.eq.f32.partialorder %v3135_v46, %v3151_v2  ;;  %vm888_vm0 = vcmp.eq.f32.partialorder %v3138_v16, %v3151_v2  ;;  %vm889_vm1 = vcmp.eq.f32.partialorder %v3141_v49, %v3151_v2 }
 0xeb4   : > { %v890_v3 = vsel %vm882_vm10, %v2716_v30, 64  ;;  %v891_v4 = vsel %vm883_vm11, %v2719_v31, 64  ;;  %v892_v47 = vsel %vm884_vm12, %v2722_v32, 64  ;;  %v893_v48 = vsel %vm885_vm13, %v2725_v33, 64 }
 0xeb5   : > { %v894_v11 = vsel %vm886_vm14, %v2728_v34, 64  ;;  %v895_v8 = vsel %vm887_vm15, %v2733_v36, 64  ;;  %v896_v10 = vsel %vm888_vm0, %v2736_v37, 64  ;;  %v897_v13 = vsel %vm889_vm1, %v2739_v38, 64 }
 0xeb6   : > { %vm898_vm3 = vcmp.lt.s32.totalorder %v890_v3, %v894_v11  ;;  %vm900_vm4 = vcmp.lt.s32.totalorder %v891_v4, %v895_v8  ;;  %vm902_vm5 = vcmp.lt.s32.totalorder %v892_v47, %v896_v10  ;;  %vm904_vm6 = vcmp.lt.s32.totalorder %v893_v48, %v897_v13 }
 0xeb7   : > { %v899_v12 = vsel %vm898_vm3, %v890_v3, %v894_v11  ;;  %v901_v23 = vsel %vm900_vm4, %v891_v4, %v895_v8  ;;  %v903_v9 = vsel %vm902_vm5, %v892_v47, %v896_v10  ;;  %v905_v53 = vsel %vm904_vm6, %v893_v48, %v897_v13 }
 0xeb8   : > { %vm906_vm7 = vcmp.lt.s32.totalorder %v899_v12, %v901_v23  ;;  %vm908_vm8 = vcmp.lt.s32.totalorder %v903_v9, %v905_v53 }
 0xeb9   : > { %v907_v24 = vsel %vm906_vm7, %v899_v12, %v901_v23  ;;  %v909_v25 = vsel %vm908_vm8, %v903_v9, %v905_v53 }
 0xeba   : > { %vm910_vm9 = vcmp.lt.s32.totalorder %v907_v24, %v909_v25 }
 0xebb   : > { %v911_v5 = vsel %vm910_vm9, %v907_v24, %v909_v25 }
 0xebc   : > { %v912_v27 = vrot.slane %v911_v5, 4 }
 0xebe   : > { %vm913_vm10 = vcmp.lt.s32.totalorder %v911_v5, %v912_v27 }
 0xebf   : > { %v914_v28 = vsel %vm913_vm10, %v911_v5, %v912_v27 }
 0xec0   : > { %v915_v39 = vrot.slane %v914_v28, 2 }
 0xec2   : > { %vm916_vm11 = vcmp.lt.s32.totalorder %v914_v28, %v915_v39 }
 0xec3   : > { %v917_v40 = vsel %vm916_vm11, %v914_v28, %v915_v39 }
 0xec4   : > { %v918_v41 = vrot.slane %v917_v40, 1 }
 0xec6   : > { %vm919_vm12 = vcmp.lt.s32.totalorder %v917_v40, %v918_v41 }
 0xec7   : > { %v920_v42 = vsel %vm919_vm12, %v917_v40, %v918_v41 }
 0xec8   : > { %2430 = vpush %v920_v42 }
 0xef9   : > { %s3177_s27 = spop %2430 }
 0xefa   : > { %s922_s29 = scalar_lea.vmem [#allocation2], %s3177_s27  ;;  %v965_v9 = vstv %s3177_s27 }
 0xefb   : > { %v923_v43 = vld [vmem:[%s922_s29] sm:$0x1]  ;;  %vm966_vm4 = vcmp.eq.s32.totalorder %v2716_v30, %v965_v9  ;;  %vm967_vm5 = vcmp.eq.s32.totalorder %v2719_v31, %v965_v9  ;;  %vm968_vm6 = vcmp.eq.s32.totalorder %v2722_v32, %v965_v9  ;;  %vm969_vm7 = vcmp.eq.s32.totalorder %v2725_v33, %v965_v9 }
 0xefc   : > { %vm924_vm13 = vcmp.eq.f32.partialorder %v923_v43, %v3151_v2  ;;  %vm970_vm8 = vcmp.eq.s32.totalorder %v2728_v34, %v965_v9  ;;  %vm971_vm9 = vcmp.eq.s32.totalorder %v2733_v36, %v965_v9  ;;  %vm972_vm10 = vcmp.eq.s32.totalorder %v2736_v37, %v965_v9 }
 0xefd   : > { %v925_v44 = vsel %vm924_vm13, %v2767_v60, 128  ;;  %vm973_vm11 = vcmp.eq.s32.totalorder %v2739_v38, %v965_v9 }
 0xefe   : > { %v926_v6 = vsel %vm295_vm2, %v925_v44, 2147483647 }
 0xeff   : > { %v928_v7 = vshra.s32 %v926_v6, 16  ;;  %v927_v15 = vand.u32 65535, %v926_v6 }
 0xf01   : > { %v930_v14 = vcvt.s32.f32 %v928_v7  ;;  %v929_v50 = vcvt.s32.f32 %v927_v15 }
 0xf03   : > { %931 = vmin.xlane.f32.xlu1 %v930_v14 }
 0xf8c   : > { %v932_v18 = vpop.xlane.xlu1 %931 }
 0xf8d   : > { %vm933_vm14 = vcmp.eq.f32.partialorder %v930_v14, %v932_v18  ;;  %v938_v20 = vcvt.f32.s32 %v932_v18 }
 0xf8e   : > { %v934_v51 = vsel %vm933_vm14, %v929_v50, inf }
 0xf8f   : > { %935 = vmin.xlane.f32.xlu0 %v934_v51  ;;  %v939_v52 = vshll.u32 %v938_v20, 16 }
0x1018   : > { %v936_v21 = vpop.xlane.xlu0 %935 }
0x1019   : > { %v937_v57 = vcvt.f32.s32 %v936_v21 }
0x101b   : > { %v940_v61 = vadd.s32 %v939_v52, %v937_v57 }
0x101d   : > { %v941_v22 = vrot.slane %v940_v61, 4 }
0x101f   : > { %vm942_vm15 = vcmp.lt.s32.totalorder %v940_v61, %v941_v22 }
0x1020   : > { %v943_v62 = vsel %vm942_vm15, %v940_v61, %v941_v22 }
0x1021   : > { %v944_v63 = vrot.slane %v943_v62, 2 }
0x1023   : > { %vm945_vm0 = vcmp.lt.s32.totalorder %v943_v62, %v944_v63 }
0x1024   : > { %v946_v45 = vsel %vm945_vm0, %v943_v62, %v944_v63 }
0x1025   : > { %v947_v0 = vrot.slane %v946_v45, 1 }
0x1027   : > { %vm948_vm1 = vcmp.lt.s32.totalorder %v946_v45, %v947_v0 }
0x1028   : > { %v949_v1 = vsel %vm948_vm1, %v946_v45, %v947_v0 }
0x1029   : > { %2432 = vpush %v949_v1 }
0x105a   : > { %s3185_s6 = spop %2432 }
0x105b   : > { %v961_v3 = vstv %s3185_s6 }
0x105c   : > { %vm962_vm3 = vcmp.eq.s32.totalorder %v2767_v60, %v961_v3 }
0x105d   : > { %v963_v4 = vsel %vm962_vm3, -inf, %v923_v43 }
0x105e   : > { %v974_v47 = vsel %vm295_vm2, %v963_v4, -inf  ;;  %964 = vst [vmem:[%s922_s29] sm:$0x1] %v963_v4 }
0x105f   : > { %975 = vmax.xlane.f32.xlu1 %v974_v47 }
0x10e8   : > { %v976_v48 = vpop.xlane.xlu1 %975 }
0x10e9   : > { %v977_v11 = vrot.slane %v976_v48, 4 }
0x10eb   : > { %v978_v8 = vmax.f32 %v976_v48, %v977_v11 }
0x10ed   : > { %v979_v10 = vrot.slane %v978_v8, 2 }
0x10ef   : > { %v980_v13 = vmax.f32 %v978_v8, %v979_v10 }
0x10f1   : > { %v981_v12 = vrot.slane %v980_v13, 1 }
0x10f3   : > { %v982_v23 = vmax.f32 %v980_v13, %v981_v12 }
0x10f5   : > { %2434 = vpush %v982_v23 }
0x1126   : > { %s2435_s7 = spop %2434 }
0x1127   : > { %v984_v53 = vstv %s2435_s7 }
0x1128   : > { %v3202_v24 = vsel %vm966_vm4, %v984_v53, %v3120_v54  ;;  %v3205_v25 = vsel %vm967_vm5, %v984_v53, %v3123_v17  ;;  %v3208_v5 = vsel %vm968_vm6, %v984_v53, %v3126_v19  ;;  %v3211_v27 = vsel %vm969_vm7, %v984_v53, %v3129_v55 }
0x1129   : > { %v3214_v28 = vsel %vm970_vm8, %v984_v53, %v3132_v56  ;;  %v3217_v39 = vsel %vm971_vm9, %v984_v53, %v3135_v46  ;;  %v3220_v40 = vsel %vm972_vm10, %v984_v53, %v3138_v16  ;;  %v3223_v54 = vsel %vm973_vm11, %v984_v53, %v3141_v49 }
0x112a   : > { %v993_v17 = vmax.f32 %v3202_v24, %v3214_v28  ;;  %v994_v19 = vmax.f32 %v3205_v25, %v3217_v39  ;;  %v995_v55 = vmax.f32 %v3208_v5, %v3220_v40  ;;  %v996_v56 = vmax.f32 %v3211_v27, %v3223_v54 }
0x112c   : > { %v997_v46 = vmax.f32 %v993_v17, %v994_v19  ;;  %v998_v41 = vmax.f32 %v995_v55, %v996_v56 }
0x112e   : > { %v999_v42 = vmax.f32 %v997_v46, %v998_v41 }
0x1130   : > { %v1000_v16 = vrot.slane %v999_v42, 4 }
0x1132   : > { %v1001_v43 = vmax.f32 %v999_v42, %v1000_v16 }
0x1134   : > { %v1002_v44 = vrot.slane %v1001_v43, 2 }
0x1136   : > { %v1003_v49 = vmax.f32 %v1001_v43, %v1002_v44 }
0x1138   : > { %v1004_v6 = vrot.slane %v1003_v49, 1 }
0x113a   : > { %v1005_v7 = vmax.f32 %v1003_v49, %v1004_v6 }
0x113c   : > { %2436 = vpush %v1005_v7 }
0x116d   : > { %s2437_s11 = spop %2436 }
0x116e   : > { %v3233_v14 = vstv %s2437_s11 }
0x116f   : > { %vm1008_vm12 = vcmp.eq.f32.partialorder %v3202_v24, %v3233_v14  ;;  %vm1009_vm13 = vcmp.eq.f32.partialorder %v3205_v25, %v3233_v14  ;;  %vm1010_vm14 = vcmp.eq.f32.partialorder %v3208_v5, %v3233_v14  ;;  %vm1011_vm15 = vcmp.eq.f32.partialorder %v3211_v27, %v3233_v14 }
0x1170   : > { %vm1012_vm0 = vcmp.eq.f32.partialorder %v3214_v28, %v3233_v14  ;;  %vm1013_vm1 = vcmp.eq.f32.partialorder %v3217_v39, %v3233_v14  ;;  %vm1014_vm3 = vcmp.eq.f32.partialorder %v3220_v40, %v3233_v14  ;;  %vm1015_vm4 = vcmp.eq.f32.partialorder %v3223_v54, %v3233_v14 }
0x1171   : > { %v1016_v15 = vsel %vm1008_vm12, %v2716_v30, 64  ;;  %v1017_v18 = vsel %vm1009_vm13, %v2719_v31, 64  ;;  %v1018_v50 = vsel %vm1010_vm14, %v2722_v32, 64  ;;  %v1019_v51 = vsel %vm1011_vm15, %v2725_v33, 64 }
0x1172   : > { %v1020_v20 = vsel %vm1012_vm0, %v2728_v34, 64  ;;  %v1021_v21 = vsel %vm1013_vm1, %v2733_v36, 64  ;;  %v1022_v52 = vsel %vm1014_vm3, %v2736_v37, 64  ;;  %v1023_v57 = vsel %vm1015_vm4, %v2739_v38, 64 }
0x1173   : > { %vm1024_vm5 = vcmp.lt.s32.totalorder %v1016_v15, %v1020_v20  ;;  %vm1026_vm6 = vcmp.lt.s32.totalorder %v1017_v18, %v1021_v21  ;;  %vm1028_vm7 = vcmp.lt.s32.totalorder %v1018_v50, %v1022_v52  ;;  %vm1030_vm8 = vcmp.lt.s32.totalorder %v1019_v51, %v1023_v57 }
0x1174   : > { %v1025_v61 = vsel %vm1024_vm5, %v1016_v15, %v1020_v20  ;;  %v1027_v22 = vsel %vm1026_vm6, %v1017_v18, %v1021_v21  ;;  %v1029_v62 = vsel %vm1028_vm7, %v1018_v50, %v1022_v52  ;;  %v1031_v63 = vsel %vm1030_vm8, %v1019_v51, %v1023_v57 }
0x1175   : > { %vm1032_vm9 = vcmp.lt.s32.totalorder %v1025_v61, %v1027_v22  ;;  %vm1034_vm10 = vcmp.lt.s32.totalorder %v1029_v62, %v1031_v63 }
0x1176   : > { %v1033_v45 = vsel %vm1032_vm9, %v1025_v61, %v1027_v22  ;;  %v1035_v0 = vsel %vm1034_vm10, %v1029_v62, %v1031_v63 }
0x1177   : > { %vm1036_vm11 = vcmp.lt.s32.totalorder %v1033_v45, %v1035_v0 }
0x1178   : > { %v1037_v1 = vsel %vm1036_vm11, %v1033_v45, %v1035_v0 }
0x1179   : > { %v1038_v3 = vrot.slane %v1037_v1, 4 }
0x117b   : > { %vm1039_vm12 = vcmp.lt.s32.totalorder %v1037_v1, %v1038_v3 }
0x117c   : > { %v1040_v4 = vsel %vm1039_vm12, %v1037_v1, %v1038_v3 }
0x117d   : > { %v1041_v47 = vrot.slane %v1040_v4, 2 }
0x117f   : > { %vm1042_vm13 = vcmp.lt.s32.totalorder %v1040_v4, %v1041_v47 }
0x1180   : > { %v1043_v48 = vsel %vm1042_vm13, %v1040_v4, %v1041_v47 }
0x1181   : > { %v1044_v11 = vrot.slane %v1043_v48, 1 }
0x1183   : > { %vm1045_vm14 = vcmp.lt.s32.totalorder %v1043_v48, %v1044_v11 }
0x1184   : > { %v1046_v8 = vsel %vm1045_vm14, %v1043_v48, %v1044_v11 }
0x1185   : > { %2438 = vpush %v1046_v8 }
0x11b6   : > { %s3259_s20 = spop %2438 }
0x11b7   : > { %s1048_s26 = scalar_lea.vmem [#allocation2], %s3259_s20  ;;  %v1091_v63 = vstv %s3259_s20 }
0x11b8   : > { %v1049_v10 = vld [vmem:[%s1048_s26] sm:$0x1]  ;;  %vm1092_vm6 = vcmp.eq.s32.totalorder %v2716_v30, %v1091_v63  ;;  %vm1093_vm7 = vcmp.eq.s32.totalorder %v2719_v31, %v1091_v63  ;;  %vm1094_vm8 = vcmp.eq.s32.totalorder %v2722_v32, %v1091_v63  ;;  %vm1095_vm9 = vcmp.eq.s32.totalorder %v2725_v33, %v1091_v63 }
0x11b9   : > { %vm1050_vm15 = vcmp.eq.f32.partialorder %v1049_v10, %v3233_v14  ;;  %vm1096_vm10 = vcmp.eq.s32.totalorder %v2728_v34, %v1091_v63  ;;  %vm1097_vm11 = vcmp.eq.s32.totalorder %v2733_v36, %v1091_v63  ;;  %vm1098_vm12 = vcmp.eq.s32.totalorder %v2736_v37, %v1091_v63 }
0x11ba   : > { %v1051_v13 = vsel %vm1050_vm15, %v2767_v60, 128  ;;  %vm1099_vm13 = vcmp.eq.s32.totalorder %v2739_v38, %v1091_v63 }
0x11bb   : > { %v1052_v12 = vsel %vm295_vm2, %v1051_v13, 2147483647 }
0x11bc   : > { %v1054_v23 = vshra.s32 %v1052_v12, 16  ;;  %v1053_v53 = vand.u32 65535, %v1052_v12 }
0x11be   : > { %v1056_v9 = vcvt.s32.f32 %v1054_v23  ;;  %v1055_v19 = vcvt.s32.f32 %v1053_v53 }
0x11c0   : > { %1057 = vmin.xlane.f32.xlu0 %v1056_v9 }
0x1249   : > { %v1058_v17 = vpop.xlane.xlu0 %1057 }
0x124a   : > { %vm1059_vm0 = vcmp.eq.f32.partialorder %v1056_v9, %v1058_v17  ;;  %v1064_v56 = vcvt.f32.s32 %v1058_v17 }
0x124b   : > { %v1060_v55 = vsel %vm1059_vm0, %v1055_v19, inf }
0x124c   : > { %1061 = vmin.xlane.f32.xlu1 %v1060_v55  ;;  %v1065_v41 = vshll.u32 %v1064_v56, 16 }
0x12d5   : > { %v1062_v46 = vpop.xlane.xlu1 %1061 }
0x12d6   : > { %v1063_v42 = vcvt.f32.s32 %v1062_v46 }
0x12d8   : > { %v1066_v16 = vadd.s32 %v1065_v41, %v1063_v42 }
0x12da   : > { %v1067_v43 = vrot.slane %v1066_v16, 4 }
0x12dc   : > { %vm1068_vm1 = vcmp.lt.s32.totalorder %v1066_v16, %v1067_v43 }
0x12dd   : > { %v1069_v44 = vsel %vm1068_vm1, %v1066_v16, %v1067_v43 }
0x12de   : > { %v1070_v49 = vrot.slane %v1069_v44, 2 }
0x12e0   : > { %vm1071_vm3 = vcmp.lt.s32.totalorder %v1069_v44, %v1070_v49 }
0x12e1   : > { %v1072_v6 = vsel %vm1071_vm3, %v1069_v44, %v1070_v49 }
0x12e2   : > { %v1073_v7 = vrot.slane %v1072_v6, 1 }
0x12e4   : > { %vm1074_vm4 = vcmp.lt.s32.totalorder %v1072_v6, %v1073_v7 }
0x12e5   : > { %v1075_v15 = vsel %vm1074_vm4, %v1072_v6, %v1073_v7 }
0x12e6   : > { %2440 = vpush %v1075_v15 }
0x1317   : > { %s3267_s29 = spop %2440 }
0x1318   : > { %v1087_v18 = vstv %s3267_s29 }
0x1319   : > { %vm1088_vm5 = vcmp.eq.s32.totalorder %v2767_v60, %v1087_v18 }
0x131a   : > { %v1089_v50 = vsel %vm1088_vm5, -inf, %v1049_v10 }
0x131b   : > { %v1100_v51 = vsel %vm295_vm2, %v1089_v50, -inf  ;;  %1090 = vst [vmem:[%s1048_s26] sm:$0x1] %v1089_v50 }
0x131c   : > { %1101 = vmax.xlane.f32.xlu0 %v1100_v51 }
0x13a5   : > { %v1102_v20 = vpop.xlane.xlu0 %1101 }
0x13a6   : > { %v1103_v21 = vrot.slane %v1102_v20, 4 }
0x13a8   : > { %v1104_v52 = vmax.f32 %v1102_v20, %v1103_v21 }
0x13aa   : > { %v1105_v57 = vrot.slane %v1104_v52, 2 }
0x13ac   : > { %v1106_v61 = vmax.f32 %v1104_v52, %v1105_v57 }
0x13ae   : > { %v1107_v22 = vrot.slane %v1106_v61, 1 }
0x13b0   : > { %v1108_v62 = vmax.f32 %v1106_v61, %v1107_v22 }
0x13b2   : > { %2442 = vpush %v1108_v62 }
0x13e3   : > { %s2443_s7 = spop %2442 }
0x13e4   : > { %v1110_v45 = vstv %s2443_s7 }
0x13e5   : > { %v3284_v0 = vsel %vm1092_vm6, %v1110_v45, %v3202_v24  ;;  %v3287_v1 = vsel %vm1093_vm7, %v1110_v45, %v3205_v25  ;;  %v3290_v3 = vsel %vm1094_vm8, %v1110_v45, %v3208_v5  ;;  %v3293_v4 = vsel %vm1095_vm9, %v1110_v45, %v3211_v27 }
0x13e6   : > { %v3296_v47 = vsel %vm1096_vm10, %v1110_v45, %v3214_v28  ;;  %v3299_v48 = vsel %vm1097_vm11, %v1110_v45, %v3217_v39  ;;  %v3302_v11 = vsel %vm1098_vm12, %v1110_v45, %v3220_v40  ;;  %v3305_v24 = vsel %vm1099_vm13, %v1110_v45, %v3223_v54 }
0x13e7   : > { %v1119_v25 = vmax.f32 %v3284_v0, %v3296_v47  ;;  %v1120_v5 = vmax.f32 %v3287_v1, %v3299_v48  ;;  %v1121_v27 = vmax.f32 %v3290_v3, %v3302_v11  ;;  %v1122_v28 = vmax.f32 %v3293_v4, %v3305_v24 }
0x13e9   : > { %v1123_v39 = vmax.f32 %v1119_v25, %v1120_v5  ;;  %v1124_v8 = vmax.f32 %v1121_v27, %v1122_v28 }
0x13eb   : > { %v1125_v10 = vmax.f32 %v1123_v39, %v1124_v8 }
0x13ed   : > { %v1126_v40 = vrot.slane %v1125_v10, 4 }
0x13ef   : > { %v1127_v13 = vmax.f32 %v1125_v10, %v1126_v40 }
0x13f1   : > { %v1128_v12 = vrot.slane %v1127_v13, 2 }
0x13f3   : > { %v1129_v54 = vmax.f32 %v1127_v13, %v1128_v12 }
0x13f5   : > { %v1130_v23 = vrot.slane %v1129_v54, 1 }
0x13f7   : > { %v1131_v9 = vmax.f32 %v1129_v54, %v1130_v23 }
0x13f9   : > { %2444 = vpush %v1131_v9 }
0x142a   : > { %s2445_s11 = spop %2444 }
0x142b   : > { %v3315_v53 = vstv %s2445_s11 }
0x142c   : > { %vm1134_vm14 = vcmp.eq.f32.partialorder %v3284_v0, %v3315_v53  ;;  %vm1135_vm15 = vcmp.eq.f32.partialorder %v3287_v1, %v3315_v53  ;;  %vm1136_vm0 = vcmp.eq.f32.partialorder %v3290_v3, %v3315_v53  ;;  %vm1137_vm1 = vcmp.eq.f32.partialorder %v3293_v4, %v3315_v53 }
0x142d   : > { %vm1138_vm3 = vcmp.eq.f32.partialorder %v3296_v47, %v3315_v53  ;;  %vm1139_vm4 = vcmp.eq.f32.partialorder %v3299_v48, %v3315_v53  ;;  %vm1140_vm5 = vcmp.eq.f32.partialorder %v3302_v11, %v3315_v53  ;;  %vm1141_vm6 = vcmp.eq.f32.partialorder %v3305_v24, %v3315_v53 }
0x142e   : > { %v1142_v17 = vsel %vm1134_vm14, %v2716_v30, 64  ;;  %v1143_v19 = vsel %vm1135_vm15, %v2719_v31, 64  ;;  %v1144_v55 = vsel %vm1136_vm0, %v2722_v32, 64  ;;  %v1145_v56 = vsel %vm1137_vm1, %v2725_v33, 64 }
0x142f   : > { %v1146_v46 = vsel %vm1138_vm3, %v2728_v34, 64  ;;  %v1147_v41 = vsel %vm1139_vm4, %v2733_v36, 64  ;;  %v1148_v42 = vsel %vm1140_vm5, %v2736_v37, 64  ;;  %v1149_v16 = vsel %vm1141_vm6, %v2739_v38, 64 }
0x1430   : > { %vm1150_vm7 = vcmp.lt.s32.totalorder %v1142_v17, %v1146_v46  ;;  %vm1152_vm8 = vcmp.lt.s32.totalorder %v1143_v19, %v1147_v41  ;;  %vm1154_vm9 = vcmp.lt.s32.totalorder %v1144_v55, %v1148_v42  ;;  %vm1156_vm10 = vcmp.lt.s32.totalorder %v1145_v56, %v1149_v16 }
0x1431   : > { %v1151_v43 = vsel %vm1150_vm7, %v1142_v17, %v1146_v46  ;;  %v1153_v44 = vsel %vm1152_vm8, %v1143_v19, %v1147_v41  ;;  %v1155_v49 = vsel %vm1154_vm9, %v1144_v55, %v1148_v42  ;;  %v1157_v6 = vsel %vm1156_vm10, %v1145_v56, %v1149_v16 }
0x1432   : > { %vm1158_vm11 = vcmp.lt.s32.totalorder %v1151_v43, %v1153_v44  ;;  %vm1160_vm12 = vcmp.lt.s32.totalorder %v1155_v49, %v1157_v6 }
0x1433   : > { %v1159_v7 = vsel %vm1158_vm11, %v1151_v43, %v1153_v44  ;;  %v1161_v15 = vsel %vm1160_vm12, %v1155_v49, %v1157_v6 }
0x1434   : > { %vm1162_vm13 = vcmp.lt.s32.totalorder %v1159_v7, %v1161_v15 }
0x1435   : > { %v1163_v18 = vsel %vm1162_vm13, %v1159_v7, %v1161_v15 }
0x1436   : > { %v1164_v50 = vrot.slane %v1163_v18, 4 }
0x1438   : > { %vm1165_vm14 = vcmp.lt.s32.totalorder %v1163_v18, %v1164_v50 }
0x1439   : > { %v1166_v51 = vsel %vm1165_vm14, %v1163_v18, %v1164_v50 }
0x143a   : > { %v1167_v20 = vrot.slane %v1166_v51, 2 }
0x143c   : > { %vm1168_vm15 = vcmp.lt.s32.totalorder %v1166_v51, %v1167_v20 }
0x143d   : > { %v1169_v21 = vsel %vm1168_vm15, %v1166_v51, %v1167_v20 }
0x143e   : > { %v1170_v52 = vrot.slane %v1169_v21, 1 }
0x1440   : > { %vm1171_vm0 = vcmp.lt.s32.totalorder %v1169_v21, %v1170_v52 }
0x1441   : > { %v1172_v57 = vsel %vm1171_vm0, %v1169_v21, %v1170_v52 }
0x1442   : > { %2446 = vpush %v1172_v57 }
0x1473   : > { %s3341_s26 = spop %2446 }
0x1474   : > { %s1174_s7 = scalar_lea.vmem [#allocation2], %s3341_s26  ;;  %v1217_v7 = vstv %s3341_s26 }
0x1475   : > { %v1175_v61 = vld [vmem:[%s1174_s7] sm:$0x1]  ;;  %vm1218_vm8 = vcmp.eq.s32.totalorder %v2716_v30, %v1217_v7  ;;  %vm1219_vm9 = vcmp.eq.s32.totalorder %v2719_v31, %v1217_v7  ;;  %vm1220_vm10 = vcmp.eq.s32.totalorder %v2722_v32, %v1217_v7  ;;  %vm1221_vm11 = vcmp.eq.s32.totalorder %v2725_v33, %v1217_v7 }
0x1476   : > { %vm1176_vm1 = vcmp.eq.f32.partialorder %v1175_v61, %v3315_v53  ;;  %vm1222_vm12 = vcmp.eq.s32.totalorder %v2728_v34, %v1217_v7  ;;  %vm1223_vm13 = vcmp.eq.s32.totalorder %v2733_v36, %v1217_v7  ;;  %vm1224_vm14 = vcmp.eq.s32.totalorder %v2736_v37, %v1217_v7 }
0x1477   : > { %v1177_v22 = vsel %vm1176_vm1, %v2767_v60, 128  ;;  %vm1225_vm15 = vcmp.eq.s32.totalorder %v2739_v38, %v1217_v7 }
0x1478   : > { %v1178_v62 = vsel %vm295_vm2, %v1177_v22, 2147483647 }
0x1479   : > { %v1180_v63 = vshra.s32 %v1178_v62, 16  ;;  %v1179_v25 = vand.u32 65535, %v1178_v62 }
0x147b   : > { %v1182_v45 = vcvt.s32.f32 %v1180_v63  ;;  %v1181_v27 = vcvt.s32.f32 %v1179_v25 }
0x147d   : > { %1183 = vmin.xlane.f32.xlu1 %v1182_v45 }
0x1506   : > { %v1184_v5 = vpop.xlane.xlu1 %1183 }
0x1507   : > { %vm1185_vm3 = vcmp.eq.f32.partialorder %v1182_v45, %v1184_v5  ;;  %v1190_v39 = vcvt.f32.s32 %v1184_v5 }
0x1508   : > { %v1186_v28 = vsel %vm1185_vm3, %v1181_v27, inf }
0x1509   : > { %1187 = vmin.xlane.f32.xlu0 %v1186_v28  ;;  %v1191_v10 = vshll.u32 %v1190_v39, 16 }
0x1592   : > { %v1188_v8 = vpop.xlane.xlu0 %1187 }
0x1593   : > { %v1189_v40 = vcvt.f32.s32 %v1188_v8 }
0x1595   : > { %v1192_v13 = vadd.s32 %v1191_v10, %v1189_v40 }
0x1597   : > { %v1193_v12 = vrot.slane %v1192_v13, 4 }
0x1599   : > { %vm1194_vm4 = vcmp.lt.s32.totalorder %v1192_v13, %v1193_v12 }
0x159a   : > { %v1195_v54 = vsel %vm1194_vm4, %v1192_v13, %v1193_v12 }
0x159b   : > { %v1196_v23 = vrot.slane %v1195_v54, 2 }
0x159d   : > { %vm1197_vm5 = vcmp.lt.s32.totalorder %v1195_v54, %v1196_v23 }
0x159e   : > { %v1198_v9 = vsel %vm1197_vm5, %v1195_v54, %v1196_v23 }
0x159f   : > { %v1199_v17 = vrot.slane %v1198_v9, 1 }
0x15a1   : > { %vm1200_vm6 = vcmp.lt.s32.totalorder %v1198_v9, %v1199_v17 }
0x15a2   : > { %v1201_v19 = vsel %vm1200_vm6, %v1198_v9, %v1199_v17 }
0x15a3   : > { %2448 = vpush %v1201_v19 }
0x15d4   : > { %s3349_s11 = spop %2448 }
0x15d5   : > { %v1213_v55 = vstv %s3349_s11 }
0x15d6   : > { %vm1214_vm7 = vcmp.eq.s32.totalorder %v2767_v60, %v1213_v55 }
0x15d7   : > { %v1215_v56 = vsel %vm1214_vm7, -inf, %v1175_v61 }
0x15d8   : > { %v1226_v46 = vsel %vm295_vm2, %v1215_v56, -inf  ;;  %1216 = vst [vmem:[%s1174_s7] sm:$0x1] %v1215_v56 }
0x15d9   : > { %1227 = vmax.xlane.f32.xlu1 %v1226_v46 }
0x1662   : > { %v1228_v41 = vpop.xlane.xlu1 %1227 }
0x1663   : > { %v1229_v42 = vrot.slane %v1228_v41, 4 }
0x1665   : > { %v1230_v16 = vmax.f32 %v1228_v41, %v1229_v42 }
0x1667   : > { %v1231_v43 = vrot.slane %v1230_v16, 2 }
0x1669   : > { %v1232_v44 = vmax.f32 %v1230_v16, %v1231_v43 }
0x166b   : > { %v1233_v49 = vrot.slane %v1232_v44, 1 }
0x166d   : > { %v1234_v6 = vmax.f32 %v1232_v44, %v1233_v49 }
0x166f   : > { %2450 = vpush %v1234_v6 }
0x16a0   : > { %s2451_s0 = spop %2450 }
0x16a1   : > { %v1236_v15 = vstv %s2451_s0 }
0x16a2   : > { %v3366_v18 = vsel %vm1218_vm8, %v1236_v15, %v3284_v0  ;;  %v3369_v50 = vsel %vm1219_vm9, %v1236_v15, %v3287_v1  ;;  %v3372_v51 = vsel %vm1220_vm10, %v1236_v15, %v3290_v3  ;;  %v3375_v20 = vsel %vm1221_vm11, %v1236_v15, %v3293_v4 }
0x16a3   : > { %v3378_v21 = vsel %vm1222_vm12, %v1236_v15, %v3296_v47  ;;  %v3381_v52 = vsel %vm1223_vm13, %v1236_v15, %v3299_v48  ;;  %v3384_v57 = vsel %vm1224_vm14, %v1236_v15, %v3302_v11  ;;  %v3387_v0 = vsel %vm1225_vm15, %v1236_v15, %v3305_v24 }
0x16a4   : > { %v1245_v1 = vmax.f32 %v3366_v18, %v3378_v21  ;;  %v1246_v3 = vmax.f32 %v3369_v50, %v3381_v52  ;;  %v1247_v4 = vmax.f32 %v3372_v51, %v3384_v57  ;;  %v1248_v47 = vmax.f32 %v3375_v20, %v3387_v0 }
0x16a6   : > { %v1249_v48 = vmax.f32 %v1245_v1, %v1246_v3  ;;  %v1250_v61 = vmax.f32 %v1247_v4, %v1248_v47 }
0x16a8   : > { %v1251_v22 = vmax.f32 %v1249_v48, %v1250_v61 }
0x16aa   : > { %v1252_v11 = vrot.slane %v1251_v22, 4 }
0x16ac   : > { %v1253_v62 = vmax.f32 %v1251_v22, %v1252_v11 }
0x16ae   : > { %v1254_v63 = vrot.slane %v1253_v62, 2 }
0x16b0   : > { %v1255_v24 = vmax.f32 %v1253_v62, %v1254_v63 }
0x16b2   : > { %v1256_v45 = vrot.slane %v1255_v24, 1 }
0x16b4   : > { %v1257_v25 = vmax.f32 %v1255_v24, %v1256_v45 }
0x16b6   : > { %2452 = vpush %v1257_v25 }
0x16e7   : > { %s2453_s0 = spop %2452 }
0x16e8   : > { %v3397_v5 = vstv %s2453_s0 }
0x16e9   : > { %vm1260_vm0 = vcmp.eq.f32.partialorder %v3366_v18, %v3397_v5  ;;  %vm1261_vm1 = vcmp.eq.f32.partialorder %v3369_v50, %v3397_v5  ;;  %vm1262_vm3 = vcmp.eq.f32.partialorder %v3372_v51, %v3397_v5  ;;  %vm1263_vm4 = vcmp.eq.f32.partialorder %v3375_v20, %v3397_v5 }
0x16ea   : > { %vm1264_vm5 = vcmp.eq.f32.partialorder %v3378_v21, %v3397_v5  ;;  %vm1265_vm6 = vcmp.eq.f32.partialorder %v3381_v52, %v3397_v5  ;;  %vm1266_vm7 = vcmp.eq.f32.partialorder %v3384_v57, %v3397_v5  ;;  %vm1267_vm8 = vcmp.eq.f32.partialorder %v3387_v0, %v3397_v5 }
0x16eb   : > { %v1268_v27 = vsel %vm1260_vm0, %v2716_v30, 64  ;;  %v1269_v28 = vsel %vm1261_vm1, %v2719_v31, 64  ;;  %v1270_v39 = vsel %vm1262_vm3, %v2722_v32, 64  ;;  %v1271_v8 = vsel %vm1263_vm4, %v2725_v33, 64 }
0x16ec   : > { %v1272_v10 = vsel %vm1264_vm5, %v2728_v34, 64  ;;  %v1273_v40 = vsel %vm1265_vm6, %v2733_v36, 64  ;;  %v1274_v13 = vsel %vm1266_vm7, %v2736_v37, 64  ;;  %v1275_v12 = vsel %vm1267_vm8, %v2739_v38, 64 }
0x16ed   : > { %vm1276_vm9 = vcmp.lt.s32.totalorder %v1268_v27, %v1272_v10  ;;  %vm1278_vm10 = vcmp.lt.s32.totalorder %v1269_v28, %v1273_v40  ;;  %vm1280_vm11 = vcmp.lt.s32.totalorder %v1270_v39, %v1274_v13  ;;  %vm1282_vm12 = vcmp.lt.s32.totalorder %v1271_v8, %v1275_v12 }
0x16ee   : > { %v1277_v54 = vsel %vm1276_vm9, %v1268_v27, %v1272_v10  ;;  %v1279_v23 = vsel %vm1278_vm10, %v1269_v28, %v1273_v40  ;;  %v1281_v9 = vsel %vm1280_vm11, %v1270_v39, %v1274_v13  ;;  %v1283_v17 = vsel %vm1282_vm12, %v1271_v8, %v1275_v12 }
0x16ef   : > { %vm1284_vm13 = vcmp.lt.s32.totalorder %v1277_v54, %v1279_v23  ;;  %vm1286_vm14 = vcmp.lt.s32.totalorder %v1281_v9, %v1283_v17 }
0x16f0   : > { %v1285_v19 = vsel %vm1284_vm13, %v1277_v54, %v1279_v23  ;;  %v1287_v55 = vsel %vm1286_vm14, %v1281_v9, %v1283_v17 }
0x16f1   : > { %vm1288_vm15 = vcmp.lt.s32.totalorder %v1285_v19, %v1287_v55 }
0x16f2   : > { %v1289_v56 = vsel %vm1288_vm15, %v1285_v19, %v1287_v55 }
0x16f3   : > { %v1290_v46 = vrot.slane %v1289_v56, 4 }
0x16f5   : > { %vm1291_vm0 = vcmp.lt.s32.totalorder %v1289_v56, %v1290_v46 }
0x16f6   : > { %v1292_v41 = vsel %vm1291_vm0, %v1289_v56, %v1290_v46 }
0x16f7   : > { %v1293_v42 = vrot.slane %v1292_v41, 2 }
0x16f9   : > { %vm1294_vm1 = vcmp.lt.s32.totalorder %v1292_v41, %v1293_v42 }
0x16fa   : > { %v1295_v16 = vsel %vm1294_vm1, %v1292_v41, %v1293_v42 }
0x16fb   : > { %v1296_v43 = vrot.slane %v1295_v16, 1 }
0x16fd   : > { %vm1297_vm3 = vcmp.lt.s32.totalorder %v1295_v16, %v1296_v43 }
0x16fe   : > { %v1298_v44 = vsel %vm1297_vm3, %v1295_v16, %v1296_v43 }
0x16ff   : > { %2454 = vpush %v1298_v44 }
0x1730   : > { %s3423_s7 = spop %2454 }
0x1731   : > { %s4327_s0 = scalar_lea.vmem [#allocation2], %s3423_s7  ;;  %s4388_s21 = scalar_lea.vmem [#allocation2], %s3423_s7  ;;  %v1343_v55 = vstv %s3423_s7 }
0x1732   : > { %v1301_v49 = vld [vmem:[%s4327_s0] sm:$0x1]  ;;  %vm1344_vm10 = vcmp.eq.s32.totalorder %v2716_v30, %v1343_v55  ;;  %vm1345_vm11 = vcmp.eq.s32.totalorder %v2719_v31, %v1343_v55  ;;  %vm1346_vm12 = vcmp.eq.s32.totalorder %v2722_v32, %v1343_v55  ;;  %vm1347_vm13 = vcmp.eq.s32.totalorder %v2725_v33, %v1343_v55 }
0x1733   : > { %vm1302_vm4 = vcmp.eq.f32.partialorder %v1301_v49, %v3397_v5  ;;  %vm1348_vm14 = vcmp.eq.s32.totalorder %v2728_v34, %v1343_v55  ;;  %vm1349_vm15 = vcmp.eq.s32.totalorder %v2733_v36, %v1343_v55  ;;  %vm1350_vm0 = vcmp.eq.s32.totalorder %v2736_v37, %v1343_v55 }
0x1734   : > { %v1303_v6 = vsel %vm1302_vm4, %v2767_v60, 128  ;;  %vm1351_vm1 = vcmp.eq.s32.totalorder %v2739_v38, %v1343_v55 }
0x1735   : > { %v1304_v7 = vsel %vm295_vm2, %v1303_v6, 2147483647 }
0x1736   : > { %v1306_v15 = vshra.s32 %v1304_v7, 16  ;;  %v1305_v3 = vand.u32 65535, %v1304_v7 }
0x1738   : > { %v1308_v1 = vcvt.s32.f32 %v1306_v15  ;;  %v1307_v47 = vcvt.s32.f32 %v1305_v3 }
0x173a   : > { %1309 = vmin.xlane.f32.xlu0 %v1308_v1 }
0x17c3   : > { %v1310_v4 = vpop.xlane.xlu0 %1309 }
0x17c4   : > { %vm1311_vm5 = vcmp.eq.f32.partialorder %v1308_v1, %v1310_v4  ;;  %v1316_v61 = vcvt.f32.s32 %v1310_v4 }
0x17c5   : > { %v1312_v48 = vsel %vm1311_vm5, %v1307_v47, inf }
0x17c6   : > { %1313 = vmin.xlane.f32.xlu1 %v1312_v48  ;;  %v1317_v11 = vshll.u32 %v1316_v61, 16 }
0x184f   : > { %v1314_v22 = vpop.xlane.xlu1 %1313 }
0x1850   : > { %v1315_v62 = vcvt.f32.s32 %v1314_v22 }
0x1852   : > { %v1318_v63 = vadd.s32 %v1317_v11, %v1315_v62 }
0x1854   : > { %v1319_v24 = vrot.slane %v1318_v63, 4 }
0x1856   : > { %vm1320_vm6 = vcmp.lt.s32.totalorder %v1318_v63, %v1319_v24 }
0x1857   : > { %v1321_v45 = vsel %vm1320_vm6, %v1318_v63, %v1319_v24 }
0x1858   : > { %v1322_v25 = vrot.slane %v1321_v45, 2 }
0x185a   : > { %vm1323_vm7 = vcmp.lt.s32.totalorder %v1321_v45, %v1322_v25 }
0x185b   : > { %v1324_v27 = vsel %vm1323_vm7, %v1321_v45, %v1322_v25 }
0x185c   : > { %v1325_v28 = vrot.slane %v1324_v27, 1 }
0x185e   : > { %vm1326_vm8 = vcmp.lt.s32.totalorder %v1324_v27, %v1325_v28 }
0x185f   : > { %v1327_v39 = vsel %vm1326_vm8, %v1324_v27, %v1325_v28 }
0x1860   : > { %2456 = vpush %v1327_v39 }
0x1891   : > { %s3431_s0 = spop %2456 }
0x1892   : > { %v1339_v8 = vstv %s3431_s0 }
0x1893   : > { %vm1340_vm9 = vcmp.eq.s32.totalorder %v2767_v60, %v1339_v8 }
0x1894   : > { %v1341_v10 = vsel %vm1340_vm9, -inf, %v1301_v49 }
0x1895   : > { %v1352_v40 = vsel %vm295_vm2, %v1341_v10, -inf  ;;  %1342 = vst [vmem:[%s4388_s21] sm:$0x1] %v1341_v10 }
0x1896   : > { %1353 = vmax.xlane.f32.xlu0 %v1352_v40 }
0x191f   : > { %v1354_v13 = vpop.xlane.xlu0 %1353 }
0x1920   : > { %v1355_v12 = vrot.slane %v1354_v13, 4 }
0x1922   : > { %v1356_v54 = vmax.f32 %v1354_v13, %v1355_v12 }
0x1924   : > { %v1357_v23 = vrot.slane %v1356_v54, 2 }
0x1926   : > { %v1358_v9 = vmax.f32 %v1356_v54, %v1357_v23 }
0x1928   : > { %v1359_v17 = vrot.slane %v1358_v9, 1 }
0x192a   : > { %v1360_v19 = vmax.f32 %v1358_v9, %v1359_v17 }
0x192c   : > { %2458 = vpush %v1360_v19 }
0x195d   : > { %s2459_s14 = spop %2458 }
0x195e   : > { %v1362_v56 = vstv %s2459_s14 }
0x195f   : > { %v3448_v46 = vsel %vm1344_vm10, %v1362_v56, %v3366_v18  ;;  %v3451_v41 = vsel %vm1345_vm11, %v1362_v56, %v3369_v50  ;;  %v3454_v42 = vsel %vm1346_vm12, %v1362_v56, %v3372_v51  ;;  %v3457_v16 = vsel %vm1347_vm13, %v1362_v56, %v3375_v20 }
0x1960   : > { %v3460_v43 = vsel %vm1348_vm14, %v1362_v56, %v3378_v21  ;;  %v3463_v44 = vsel %vm1349_vm15, %v1362_v56, %v3381_v52  ;;  %v3466_v49 = vsel %vm1350_vm0, %v1362_v56, %v3384_v57  ;;  %v3469_v18 = vsel %vm1351_vm1, %v1362_v56, %v3387_v0 }
0x1961   : > { %v1371_v50 = vmax.f32 %v3448_v46, %v3460_v43  ;;  %v1372_v51 = vmax.f32 %v3451_v41, %v3463_v44  ;;  %v1373_v20 = vmax.f32 %v3454_v42, %v3466_v49  ;;  %v1374_v21 = vmax.f32 %v3457_v16, %v3469_v18 }
0x1963   : > { %v1375_v52 = vmax.f32 %v1371_v50, %v1372_v51  ;;  %v1376_v6 = vmax.f32 %v1373_v20, %v1374_v21 }
0x1965   : > { %v1377_v7 = vmax.f32 %v1375_v52, %v1376_v6 }
0x1967   : > { %v1378_v57 = vrot.slane %v1377_v7, 4 }
0x1969   : > { %v1379_v15 = vmax.f32 %v1377_v7, %v1378_v57 }
0x196b   : > { %v1380_v1 = vrot.slane %v1379_v15, 2 }
0x196d   : > { %v1381_v0 = vmax.f32 %v1379_v15, %v1380_v1 }
0x196f   : > { %v1382_v3 = vrot.slane %v1381_v0, 1 }
0x1971   : > { %v1383_v4 = vmax.f32 %v1381_v0, %v1382_v3 }
0x1973   : > { %2460 = vpush %v1383_v4 }
0x19a4   : > { %s2461_s14 = spop %2460 }
0x19a5   : > { %v3479_v47 = vstv %s2461_s14 }
0x19a6   : > { %vm1386_vm3 = vcmp.eq.f32.partialorder %v3448_v46, %v3479_v47  ;;  %vm1387_vm4 = vcmp.eq.f32.partialorder %v3451_v41, %v3479_v47  ;;  %vm1388_vm5 = vcmp.eq.f32.partialorder %v3454_v42, %v3479_v47  ;;  %vm1389_vm6 = vcmp.eq.f32.partialorder %v3457_v16, %v3479_v47 }
0x19a7   : > { %vm1390_vm7 = vcmp.eq.f32.partialorder %v3460_v43, %v3479_v47  ;;  %vm1391_vm8 = vcmp.eq.f32.partialorder %v3463_v44, %v3479_v47  ;;  %vm1392_vm9 = vcmp.eq.f32.partialorder %v3466_v49, %v3479_v47  ;;  %vm1393_vm10 = vcmp.eq.f32.partialorder %v3469_v18, %v3479_v47 }
0x19a8   : > { %v1394_v48 = vsel %vm1386_vm3, %v2716_v30, 64  ;;  %v1395_v61 = vsel %vm1387_vm4, %v2719_v31, 64  ;;  %v1396_v22 = vsel %vm1388_vm5, %v2722_v32, 64  ;;  %v1397_v11 = vsel %vm1389_vm6, %v2725_v33, 64 }
0x19a9   : > { %v1398_v62 = vsel %vm1390_vm7, %v2728_v34, 64  ;;  %v1399_v63 = vsel %vm1391_vm8, %v2733_v36, 64  ;;  %v1400_v24 = vsel %vm1392_vm9, %v2736_v37, 64  ;;  %v1401_v45 = vsel %vm1393_vm10, %v2739_v38, 64 }
0x19aa   : > { %vm1402_vm11 = vcmp.lt.s32.totalorder %v1394_v48, %v1398_v62  ;;  %vm1404_vm12 = vcmp.lt.s32.totalorder %v1395_v61, %v1399_v63  ;;  %vm1406_vm13 = vcmp.lt.s32.totalorder %v1396_v22, %v1400_v24  ;;  %vm1408_vm14 = vcmp.lt.s32.totalorder %v1397_v11, %v1401_v45 }
0x19ab   : > { %v1403_v25 = vsel %vm1402_vm11, %v1394_v48, %v1398_v62  ;;  %v1405_v27 = vsel %vm1404_vm12, %v1395_v61, %v1399_v63  ;;  %v1407_v28 = vsel %vm1406_vm13, %v1396_v22, %v1400_v24  ;;  %v1409_v39 = vsel %vm1408_vm14, %v1397_v11, %v1401_v45 }
0x19ac   : > { %vm1410_vm15 = vcmp.lt.s32.totalorder %v1403_v25, %v1405_v27  ;;  %vm1412_vm0 = vcmp.lt.s32.totalorder %v1407_v28, %v1409_v39 }
0x19ad   : > { %v1411_v8 = vsel %vm1410_vm15, %v1403_v25, %v1405_v27  ;;  %v1413_v10 = vsel %vm1412_vm0, %v1407_v28, %v1409_v39 }
0x19ae   : > { %vm1414_vm1 = vcmp.lt.s32.totalorder %v1411_v8, %v1413_v10 }
0x19af   : > { %v1415_v40 = vsel %vm1414_vm1, %v1411_v8, %v1413_v10 }
0x19b0   : > { %v1416_v13 = vrot.slane %v1415_v40, 4 }
0x19b2   : > { %vm1417_vm3 = vcmp.lt.s32.totalorder %v1415_v40, %v1416_v13 }
0x19b3   : > { %v1418_v12 = vsel %vm1417_vm3, %v1415_v40, %v1416_v13 }
0x19b4   : > { %v1419_v54 = vrot.slane %v1418_v12, 2 }
0x19b6   : > { %vm1420_vm4 = vcmp.lt.s32.totalorder %v1418_v12, %v1419_v54 }
0x19b7   : > { %v1421_v23 = vsel %vm1420_vm4, %v1418_v12, %v1419_v54 }
0x19b8   : > { %v1422_v9 = vrot.slane %v1421_v23, 1 }
0x19ba   : > { %vm1423_vm5 = vcmp.lt.s32.totalorder %v1421_v23, %v1422_v9 }
0x19bb   : > { %v1424_v17 = vsel %vm1423_vm5, %v1421_v23, %v1422_v9 }
0x19bc   : > { %2462 = vpush %v1424_v17 }
0x19ed   : > { %s3505_s21 = spop %2462 }
0x19ee   : > { %s4329_s14 = scalar_lea.vmem [#allocation2], %s3505_s21  ;;  %s4389_s18 = scalar_lea.vmem [#allocation2], %s3505_s21  ;;  %v1469_v40 = vstv %s3505_s21 }
0x19ef   : > { %v1427_v19 = vld [vmem:[%s4329_s14] sm:$0x1]  ;;  %vm1470_vm12 = vcmp.eq.s32.totalorder %v2716_v30, %v1469_v40  ;;  %vm1471_vm13 = vcmp.eq.s32.totalorder %v2719_v31, %v1469_v40  ;;  %vm1472_vm14 = vcmp.eq.s32.totalorder %v2722_v32, %v1469_v40  ;;  %vm1473_vm15 = vcmp.eq.s32.totalorder %v2725_v33, %v1469_v40 }
0x19f0   : > { %vm1428_vm6 = vcmp.eq.f32.partialorder %v1427_v19, %v3479_v47  ;;  %vm1474_vm0 = vcmp.eq.s32.totalorder %v2728_v34, %v1469_v40  ;;  %vm1475_vm1 = vcmp.eq.s32.totalorder %v2733_v36, %v1469_v40  ;;  %vm1476_vm3 = vcmp.eq.s32.totalorder %v2736_v37, %v1469_v40 }
0x19f1   : > { %v1429_v55 = vsel %vm1428_vm6, %v2767_v60, 128  ;;  %vm1477_vm4 = vcmp.eq.s32.totalorder %v2739_v38, %v1469_v40 }
0x19f2   : > { %v1430_v56 = vsel %vm295_vm2, %v1429_v55, 2147483647 }
0x19f3   : > { %v1432_v50 = vshra.s32 %v1430_v56, 16  ;;  %v1431_v20 = vand.u32 65535, %v1430_v56 }
0x19f5   : > { %v1434_v51 = vcvt.s32.f32 %v1432_v50  ;;  %v1433_v52 = vcvt.s32.f32 %v1431_v20 }
0x19f7   : > { %1435 = vmin.xlane.f32.xlu1 %v1434_v51 }
0x1a80   : > { %v1436_v21 = vpop.xlane.xlu1 %1435 }
0x1a81   : > { %vm1437_vm7 = vcmp.eq.f32.partialorder %v1434_v51, %v1436_v21  ;;  %v1442_v7 = vcvt.f32.s32 %v1436_v21 }
0x1a82   : > { %v1438_v6 = vsel %vm1437_vm7, %v1433_v52, inf }
0x1a83   : > { %1439 = vmin.xlane.f32.xlu0 %v1438_v6  ;;  %v1443_v15 = vshll.u32 %v1442_v7, 16 }
0x1b0c   : > { %v1440_v57 = vpop.xlane.xlu0 %1439 }
0x1b0d   : > { %v1441_v1 = vcvt.f32.s32 %v1440_v57 }
0x1b0f   : > { %v1444_v0 = vadd.s32 %v1443_v15, %v1441_v1 }
0x1b11   : > { %v1445_v3 = vrot.slane %v1444_v0, 4 }
0x1b13   : > { %vm1446_vm8 = vcmp.lt.s32.totalorder %v1444_v0, %v1445_v3 }
0x1b14   : > { %v1447_v4 = vsel %vm1446_vm8, %v1444_v0, %v1445_v3 }
0x1b15   : > { %v1448_v48 = vrot.slane %v1447_v4, 2 }
0x1b17   : > { %vm1449_vm9 = vcmp.lt.s32.totalorder %v1447_v4, %v1448_v48 }
0x1b18   : > { %v1450_v61 = vsel %vm1449_vm9, %v1447_v4, %v1448_v48 }
0x1b19   : > { %v1451_v22 = vrot.slane %v1450_v61, 1 }
0x1b1b   : > { %vm1452_vm10 = vcmp.lt.s32.totalorder %v1450_v61, %v1451_v22 }
0x1b1c   : > { %v1453_v11 = vsel %vm1452_vm10, %v1450_v61, %v1451_v22 }
0x1b1d   : > { %2464 = vpush %v1453_v11 }
0x1b4e   : > { %s3513_s14 = spop %2464 }
0x1b4f   : > { %v1465_v62 = vstv %s3513_s14 }
0x1b50   : > { %vm1466_vm11 = vcmp.eq.s32.totalorder %v2767_v60, %v1465_v62 }
0x1b51   : > { %v1467_v63 = vsel %vm1466_vm11, -inf, %v1427_v19 }
0x1b52   : > { %v1478_v24 = vsel %vm295_vm2, %v1467_v63, -inf  ;;  %1468 = vst [vmem:[%s4389_s18] sm:$0x1] %v1467_v63 }
0x1b53   : > { %1479 = vmax.xlane.f32.xlu1 %v1478_v24 }
0x1bdc   : > { %v1480_v45 = vpop.xlane.xlu1 %1479 }
0x1bdd   : > { %v1481_v25 = vrot.slane %v1480_v45, 4 }
0x1bdf   : > { %v1482_v27 = vmax.f32 %v1480_v45, %v1481_v25 }
0x1be1   : > { %v1483_v28 = vrot.slane %v1482_v27, 2 }
0x1be3   : > { %v1484_v39 = vmax.f32 %v1482_v27, %v1483_v28 }
0x1be5   : > { %v1485_v8 = vrot.slane %v1484_v39, 1 }
0x1be7   : > { %v1486_v10 = vmax.f32 %v1484_v39, %v1485_v8 }
0x1be9   : > { %2466 = vpush %v1486_v10 }
0x1c1a   : > { %s2467_s23 = spop %2466 }
0x1c1b   : > { %v1488_v13 = vstv %s2467_s23 }
0x1c1c   : > { %v3530_v12 = vsel %vm1470_vm12, %v1488_v13, %v3448_v46  ;;  %v3533_v54 = vsel %vm1471_vm13, %v1488_v13, %v3451_v41  ;;  %v3536_v23 = vsel %vm1472_vm14, %v1488_v13, %v3454_v42  ;;  %v3539_v9 = vsel %vm1473_vm15, %v1488_v13, %v3457_v16 }
0x1c1d   : > { %v3542_v17 = vsel %vm1474_vm0, %v1488_v13, %v3460_v43  ;;  %v3545_v19 = vsel %vm1475_vm1, %v1488_v13, %v3463_v44  ;;  %v3548_v55 = vsel %vm1476_vm3, %v1488_v13, %v3466_v49  ;;  %v3551_v46 = vsel %vm1477_vm4, %v1488_v13, %v3469_v18 }
0x1c1e   : > { %v1497_v41 = vmax.f32 %v3530_v12, %v3542_v17  ;;  %v1498_v42 = vmax.f32 %v3533_v54, %v3545_v19  ;;  %v1499_v16 = vmax.f32 %v3536_v23, %v3548_v55  ;;  %v1500_v43 = vmax.f32 %v3539_v9, %v3551_v46 }
0x1c20   : > { %v1501_v44 = vmax.f32 %v1497_v41, %v1498_v42  ;;  %v1502_v56 = vmax.f32 %v1499_v16, %v1500_v43 }
0x1c22   : > { %v1503_v50 = vmax.f32 %v1501_v44, %v1502_v56 }
0x1c24   : > { %v1504_v49 = vrot.slane %v1503_v50, 4 }
0x1c26   : > { %v1505_v51 = vmax.f32 %v1503_v50, %v1504_v49 }
0x1c28   : > { %v1506_v20 = vrot.slane %v1505_v51, 2 }
0x1c2a   : > { %v1507_v18 = vmax.f32 %v1505_v51, %v1506_v20 }
0x1c2c   : > { %v1508_v21 = vrot.slane %v1507_v18, 1 }
0x1c2e   : > { %v1509_v52 = vmax.f32 %v1507_v18, %v1508_v21 }
0x1c30   : > { %2468 = vpush %v1509_v52 }
0x1c61   : > { %s2469_s18 = spop %2468 }
0x1c62   : > { %v3561_v6 = vstv %s2469_s18 }
0x1c63   : > { %vm1512_vm5 = vcmp.eq.f32.partialorder %v3530_v12, %v3561_v6  ;;  %vm1513_vm6 = vcmp.eq.f32.partialorder %v3533_v54, %v3561_v6  ;;  %vm1514_vm7 = vcmp.eq.f32.partialorder %v3536_v23, %v3561_v6  ;;  %vm1515_vm8 = vcmp.eq.f32.partialorder %v3539_v9, %v3561_v6 }
0x1c64   : > { %vm1516_vm9 = vcmp.eq.f32.partialorder %v3542_v17, %v3561_v6  ;;  %vm1517_vm10 = vcmp.eq.f32.partialorder %v3545_v19, %v3561_v6  ;;  %vm1518_vm11 = vcmp.eq.f32.partialorder %v3548_v55, %v3561_v6  ;;  %vm1519_vm12 = vcmp.eq.f32.partialorder %v3551_v46, %v3561_v6 }
0x1c65   : > { %v1520_v7 = vsel %vm1512_vm5, %v2716_v30, 64  ;;  %v1521_v57 = vsel %vm1513_vm6, %v2719_v31, 64  ;;  %v1522_v15 = vsel %vm1514_vm7, %v2722_v32, 64  ;;  %v1523_v1 = vsel %vm1515_vm8, %v2725_v33, 64 }
0x1c66   : > { %v1524_v0 = vsel %vm1516_vm9, %v2728_v34, 64  ;;  %v1525_v3 = vsel %vm1517_vm10, %v2733_v36, 64  ;;  %v1526_v4 = vsel %vm1518_vm11, %v2736_v37, 64  ;;  %v1527_v48 = vsel %vm1519_vm12, %v2739_v38, 64 }
0x1c67   : > { %vm1528_vm13 = vcmp.lt.s32.totalorder %v1520_v7, %v1524_v0  ;;  %vm1530_vm14 = vcmp.lt.s32.totalorder %v1521_v57, %v1525_v3  ;;  %vm1532_vm15 = vcmp.lt.s32.totalorder %v1522_v15, %v1526_v4  ;;  %vm1534_vm0 = vcmp.lt.s32.totalorder %v1523_v1, %v1527_v48 }
0x1c68   : > { %v1529_v61 = vsel %vm1528_vm13, %v1520_v7, %v1524_v0  ;;  %v1531_v22 = vsel %vm1530_vm14, %v1521_v57, %v1525_v3  ;;  %v1533_v11 = vsel %vm1532_vm15, %v1522_v15, %v1526_v4  ;;  %v1535_v62 = vsel %vm1534_vm0, %v1523_v1, %v1527_v48 }
0x1c69   : > { %vm1536_vm1 = vcmp.lt.s32.totalorder %v1529_v61, %v1531_v22  ;;  %vm1538_vm3 = vcmp.lt.s32.totalorder %v1533_v11, %v1535_v62 }
0x1c6a   : > { %v1537_v63 = vsel %vm1536_vm1, %v1529_v61, %v1531_v22  ;;  %v1539_v24 = vsel %vm1538_vm3, %v1533_v11, %v1535_v62 }
0x1c6b   : > { %vm1540_vm4 = vcmp.lt.s32.totalorder %v1537_v63, %v1539_v24 }
0x1c6c   : > { %v1541_v45 = vsel %vm1540_vm4, %v1537_v63, %v1539_v24 }
0x1c6d   : > { %v1542_v25 = vrot.slane %v1541_v45, 4 }
0x1c6f   : > { %vm1543_vm5 = vcmp.lt.s32.totalorder %v1541_v45, %v1542_v25 }
0x1c70   : > { %v1544_v27 = vsel %vm1543_vm5, %v1541_v45, %v1542_v25 }
0x1c71   : > { %v1545_v28 = vrot.slane %v1544_v27, 2 }
0x1c73   : > { %vm1546_vm6 = vcmp.lt.s32.totalorder %v1544_v27, %v1545_v28 }
0x1c74   : > { %v1547_v39 = vsel %vm1546_vm6, %v1544_v27, %v1545_v28 }
0x1c75   : > { %v1548_v8 = vrot.slane %v1547_v39, 1 }
0x1c77   : > { %vm1549_vm7 = vcmp.lt.s32.totalorder %v1547_v39, %v1548_v8 }
0x1c78   : > { %v1550_v10 = vsel %vm1549_vm7, %v1547_v39, %v1548_v8 }
0x1c79   : > { %2470 = vpush %v1550_v10 }
0x1caa   : > { %s3587_s23 = spop %2470 }
0x1cab   : > { %s4333_s18 = scalar_lea.vmem [#allocation2], %s3587_s23  ;;  %s4390_s12 = scalar_lea.vmem [#allocation2], %s3587_s23  ;;  %v1595_v25 = vstv %s3587_s23 }
0x1cac   : > { %v1553_v40 = vld [vmem:[%s4333_s18] sm:$0x1]  ;;  %vm1596_vm14 = vcmp.eq.s32.totalorder %v2716_v30, %v1595_v25  ;;  %vm1597_vm15 = vcmp.eq.s32.totalorder %v2719_v31, %v1595_v25  ;;  %vm1598_vm0 = vcmp.eq.s32.totalorder %v2722_v32, %v1595_v25  ;;  %vm1599_vm1 = vcmp.eq.s32.totalorder %v2725_v33, %v1595_v25 }
0x1cad   : > { %vm1554_vm8 = vcmp.eq.f32.partialorder %v1553_v40, %v3561_v6  ;;  %vm1600_vm3 = vcmp.eq.s32.totalorder %v2728_v34, %v1595_v25  ;;  %vm1601_vm4 = vcmp.eq.s32.totalorder %v2733_v36, %v1595_v25  ;;  %vm1602_vm5 = vcmp.eq.s32.totalorder %v2736_v37, %v1595_v25 }
0x1cae   : > { %v1555_v13 = vsel %vm1554_vm8, %v2767_v60, 128  ;;  %vm1603_vm6 = vcmp.eq.s32.totalorder %v2739_v38, %v1595_v25 }
0x1caf   : > { %v1556_v41 = vsel %vm295_vm2, %v1555_v13, 2147483647 }
0x1cb0   : > { %v1558_v42 = vshra.s32 %v1556_v41, 16  ;;  %v1557_v43 = vand.u32 65535, %v1556_v41 }
0x1cb2   : > { %v1560_v16 = vcvt.s32.f32 %v1558_v42  ;;  %v1559_v56 = vcvt.s32.f32 %v1557_v43 }
0x1cb4   : > { %1561 = vmin.xlane.f32.xlu0 %v1560_v16 }
0x1d3d   : > { %v1562_v44 = vpop.xlane.xlu0 %1561 }
0x1d3e   : > { %vm1563_vm9 = vcmp.eq.f32.partialorder %v1560_v16, %v1562_v44  ;;  %v1568_v49 = vcvt.f32.s32 %v1562_v44 }
0x1d3f   : > { %v1564_v50 = vsel %vm1563_vm9, %v1559_v56, inf }
0x1d40   : > { %1565 = vmin.xlane.f32.xlu1 %v1564_v50  ;;  %v1569_v20 = vshll.u32 %v1568_v49, 16 }
0x1dc9   : > { %v1566_v51 = vpop.xlane.xlu1 %1565 }
0x1dca   : > { %v1567_v18 = vcvt.f32.s32 %v1566_v51 }
0x1dcc   : > { %v1570_v21 = vadd.s32 %v1569_v20, %v1567_v18 }
0x1dce   : > { %v1571_v52 = vrot.slane %v1570_v21, 4 }
0x1dd0   : > { %vm1572_vm10 = vcmp.lt.s32.totalorder %v1570_v21, %v1571_v52 }
0x1dd1   : > { %v1573_v7 = vsel %vm1572_vm10, %v1570_v21, %v1571_v52 }
0x1dd2   : > { %v1574_v57 = vrot.slane %v1573_v7, 2 }
0x1dd4   : > { %vm1575_vm11 = vcmp.lt.s32.totalorder %v1573_v7, %v1574_v57 }
0x1dd5   : > { %v1576_v15 = vsel %vm1575_vm11, %v1573_v7, %v1574_v57 }
0x1dd6   : > { %v1577_v1 = vrot.slane %v1576_v15, 1 }
0x1dd8   : > { %vm1578_vm12 = vcmp.lt.s32.totalorder %v1576_v15, %v1577_v1 }
0x1dd9   : > { %v1579_v0 = vsel %vm1578_vm12, %v1576_v15, %v1577_v1 }
0x1dda   : > { %2472 = vpush %v1579_v0 }
0x1e0b   : > { %s3595_s18 = spop %2472 }
0x1e0c   : > { %v1591_v3 = vstv %s3595_s18 }
0x1e0d   : > { %vm1592_vm13 = vcmp.eq.s32.totalorder %v2767_v60, %v1591_v3 }
0x1e0e   : > { %v1593_v4 = vsel %vm1592_vm13, -inf, %v1553_v40 }
0x1e0f   : > { %v1604_v48 = vsel %vm295_vm2, %v1593_v4, -inf  ;;  %1594 = vst [vmem:[%s4390_s12] sm:$0x1] %v1593_v4 }
0x1e10   : > { %1605 = vmax.xlane.f32.xlu0 %v1604_v48 }
0x1e99   : > { %v1606_v61 = vpop.xlane.xlu0 %1605 }
0x1e9a   : > { %v1607_v22 = vrot.slane %v1606_v61, 4 }
0x1e9c   : > { %v1608_v11 = vmax.f32 %v1606_v61, %v1607_v22 }
0x1e9e   : > { %v1609_v62 = vrot.slane %v1608_v11, 2 }
0x1ea0   : > { %v1610_v63 = vmax.f32 %v1608_v11, %v1609_v62 }
0x1ea2   : > { %v1611_v24 = vrot.slane %v1610_v63, 1 }
0x1ea4   : > { %v1612_v45 = vmax.f32 %v1610_v63, %v1611_v24 }
0x1ea6   : > { %2474 = vpush %v1612_v45 }
0x1ed7   : > { %s2475_s15 = spop %2474 }
0x1ed8   : > { %v1614_v27 = vstv %s2475_s15 }
0x1ed9   : > { %v3612_v28 = vsel %vm1596_vm14, %v1614_v27, %v3530_v12  ;;  %v3615_v39 = vsel %vm1597_vm15, %v1614_v27, %v3533_v54  ;;  %v3618_v8 = vsel %vm1598_vm0, %v1614_v27, %v3536_v23  ;;  %v3621_v10 = vsel %vm1599_vm1, %v1614_v27, %v3539_v9 }
0x1eda   : > { %v3624_v40 = vsel %vm1600_vm3, %v1614_v27, %v3542_v17  ;;  %v3627_v13 = vsel %vm1601_vm4, %v1614_v27, %v3545_v19  ;;  %v3630_v41 = vsel %vm1602_vm5, %v1614_v27, %v3548_v55  ;;  %v3633_v12 = vsel %vm1603_vm6, %v1614_v27, %v3551_v46 }
0x1edb   : > { %v1623_v54 = vmax.f32 %v3612_v28, %v3624_v40  ;;  %v1624_v23 = vmax.f32 %v3615_v39, %v3627_v13  ;;  %v1625_v9 = vmax.f32 %v3618_v8, %v3630_v41  ;;  %v1626_v17 = vmax.f32 %v3621_v10, %v3633_v12 }
0x1edd   : > { %v1627_v19 = vmax.f32 %v1623_v54, %v1624_v23  ;;  %v1628_v42 = vmax.f32 %v1625_v9, %v1626_v17 }
0x1edf   : > { %v1629_v16 = vmax.f32 %v1627_v19, %v1628_v42 }
0x1ee1   : > { %v1630_v55 = vrot.slane %v1629_v16, 4 }
0x1ee3   : > { %v1631_v43 = vmax.f32 %v1629_v16, %v1630_v55 }
0x1ee5   : > { %v1632_v44 = vrot.slane %v1631_v43, 2 }
0x1ee7   : > { %v1633_v46 = vmax.f32 %v1631_v43, %v1632_v44 }
0x1ee9   : > { %v1634_v56 = vrot.slane %v1633_v46, 1 }
0x1eeb   : > { %v1635_v50 = vmax.f32 %v1633_v46, %v1634_v56 }
0x1eed   : > { %2476 = vpush %v1635_v50 }
0x1f1e   : > { %s2477_s12 = spop %2476 }
0x1f1f   : > { %v3643_v49 = vstv %s2477_s12 }
0x1f20   : > { %vm1638_vm7 = vcmp.eq.f32.partialorder %v3612_v28, %v3643_v49  ;;  %vm1639_vm8 = vcmp.eq.f32.partialorder %v3615_v39, %v3643_v49  ;;  %vm1640_vm9 = vcmp.eq.f32.partialorder %v3618_v8, %v3643_v49  ;;  %vm1641_vm10 = vcmp.eq.f32.partialorder %v3621_v10, %v3643_v49 }
0x1f21   : > { %vm1642_vm11 = vcmp.eq.f32.partialorder %v3624_v40, %v3643_v49  ;;  %vm1643_vm12 = vcmp.eq.f32.partialorder %v3627_v13, %v3643_v49  ;;  %vm1644_vm13 = vcmp.eq.f32.partialorder %v3630_v41, %v3643_v49  ;;  %vm1645_vm14 = vcmp.eq.f32.partialorder %v3633_v12, %v3643_v49 }
0x1f22   : > { %v1646_v51 = vsel %vm1638_vm7, %v2716_v30, 64  ;;  %v1647_v20 = vsel %vm1639_vm8, %v2719_v31, 64  ;;  %v1648_v18 = vsel %vm1640_vm9, %v2722_v32, 64  ;;  %v1649_v21 = vsel %vm1641_vm10, %v2725_v33, 64 }
0x1f23   : > { %v1650_v52 = vsel %vm1642_vm11, %v2728_v34, 64  ;;  %v1651_v7 = vsel %vm1643_vm12, %v2733_v36, 64  ;;  %v1652_v57 = vsel %vm1644_vm13, %v2736_v37, 64  ;;  %v1653_v15 = vsel %vm1645_vm14, %v2739_v38, 64 }
0x1f24   : > { %vm1654_vm15 = vcmp.lt.s32.totalorder %v1646_v51, %v1650_v52  ;;  %vm1656_vm0 = vcmp.lt.s32.totalorder %v1647_v20, %v1651_v7  ;;  %vm1658_vm1 = vcmp.lt.s32.totalorder %v1648_v18, %v1652_v57  ;;  %vm1660_vm3 = vcmp.lt.s32.totalorder %v1649_v21, %v1653_v15 }
0x1f25   : > { %v1655_v1 = vsel %vm1654_vm15, %v1646_v51, %v1650_v52  ;;  %v1657_v0 = vsel %vm1656_vm0, %v1647_v20, %v1651_v7  ;;  %v1659_v3 = vsel %vm1658_vm1, %v1648_v18, %v1652_v57  ;;  %v1661_v4 = vsel %vm1660_vm3, %v1649_v21, %v1653_v15 }
0x1f26   : > { %vm1662_vm4 = vcmp.lt.s32.totalorder %v1655_v1, %v1657_v0  ;;  %vm1664_vm5 = vcmp.lt.s32.totalorder %v1659_v3, %v1661_v4 }
0x1f27   : > { %v1663_v48 = vsel %vm1662_vm4, %v1655_v1, %v1657_v0  ;;  %v1665_v61 = vsel %vm1664_vm5, %v1659_v3, %v1661_v4 }
0x1f28   : > { %vm1666_vm6 = vcmp.lt.s32.totalorder %v1663_v48, %v1665_v61 }
0x1f29   : > { %v1667_v22 = vsel %vm1666_vm6, %v1663_v48, %v1665_v61 }
0x1f2a   : > { %v1668_v11 = vrot.slane %v1667_v22, 4 }
0x1f2c   : > { %vm1669_vm7 = vcmp.lt.s32.totalorder %v1667_v22, %v1668_v11 }
0x1f2d   : > { %v1670_v62 = vsel %vm1669_vm7, %v1667_v22, %v1668_v11 }
0x1f2e   : > { %v1671_v63 = vrot.slane %v1670_v62, 2 }
0x1f30   : > { %vm1672_vm8 = vcmp.lt.s32.totalorder %v1670_v62, %v1671_v63 }
0x1f31   : > { %v1673_v24 = vsel %vm1672_vm8, %v1670_v62, %v1671_v63 }
0x1f32   : > { %v1674_v45 = vrot.slane %v1673_v24, 1 }
0x1f34   : > { %vm1675_vm9 = vcmp.lt.s32.totalorder %v1673_v24, %v1674_v45 }
0x1f35   : > { %v1676_v25 = vsel %vm1675_vm9, %v1673_v24, %v1674_v45 }
0x1f36   : > { %2478 = vpush %v1676_v25 }
0x1f67   : > { %s3669_s15 = spop %2478 }
0x1f68   : > { %4391 = sst [smem:[#allocation16_spill]] %s3669_s15  ;;  %s4336_s12 = scalar_lea.vmem [#allocation2], %s3669_s15  ;;  %v1721_v62 = vstv %s3669_s15 }
0x1f69   : > { %v1679_v27 = vld [vmem:[%s4336_s12] sm:$0x1]  ;;  %s4393_s3 = scalar_lea.vmem [#allocation2], %s3669_s15  ;;  %vm1722_vm0 = vcmp.eq.s32.totalorder %v2716_v30, %v1721_v62  ;;  %vm1723_vm1 = vcmp.eq.s32.totalorder %v2719_v31, %v1721_v62  ;;  %vm1724_vm3 = vcmp.eq.s32.totalorder %v2722_v32, %v1721_v62  ;;  %vm1725_vm4 = vcmp.eq.s32.totalorder %v2725_v33, %v1721_v62 }
0x1f6a   : > { %vm1680_vm10 = vcmp.eq.f32.partialorder %v1679_v27, %v3643_v49  ;;  %vm1726_vm5 = vcmp.eq.s32.totalorder %v2728_v34, %v1721_v62  ;;  %vm1727_vm6 = vcmp.eq.s32.totalorder %v2733_v36, %v1721_v62  ;;  %vm1728_vm7 = vcmp.eq.s32.totalorder %v2736_v37, %v1721_v62 }
0x1f6b   : > { %v1681_v54 = vsel %vm1680_vm10, %v2767_v60, 128  ;;  %vm1729_vm8 = vcmp.eq.s32.totalorder %v2739_v38, %v1721_v62 }
0x1f6c   : > { %v1682_v23 = vsel %vm295_vm2, %v1681_v54, 2147483647 }
0x1f6d   : > { %v1684_v9 = vshra.s32 %v1682_v23, 16  ;;  %v1683_v19 = vand.u32 65535, %v1682_v23 }
0x1f6f   : > { %v1686_v17 = vcvt.s32.f32 %v1684_v9  ;;  %v1685_v16 = vcvt.s32.f32 %v1683_v19 }
0x1f71   : > { %1687 = vmin.xlane.f32.xlu1 %v1686_v17 }
0x1ffa   : > { %v1688_v42 = vpop.xlane.xlu1 %1687 }
0x1ffb   : > { %vm1689_vm11 = vcmp.eq.f32.partialorder %v1686_v17, %v1688_v42  ;;  %v1694_v43 = vcvt.f32.s32 %v1688_v42 }
0x1ffc   : > { %v1690_v55 = vsel %vm1689_vm11, %v1685_v16, inf }
0x1ffd   : > { %1691 = vmin.xlane.f32.xlu0 %v1690_v55  ;;  %v1695_v46 = vshll.u32 %v1694_v43, 16 }
0x2086   : > { %v1692_v44 = vpop.xlane.xlu0 %1691 }
0x2087   : > { %v1693_v56 = vcvt.f32.s32 %v1692_v44 }
0x2089   : > { %v1696_v50 = vadd.s32 %v1695_v46, %v1693_v56 }
0x208b   : > { %v1697_v51 = vrot.slane %v1696_v50, 4 }
0x208d   : > { %vm1698_vm12 = vcmp.lt.s32.totalorder %v1696_v50, %v1697_v51 }
0x208e   : > { %v1699_v20 = vsel %vm1698_vm12, %v1696_v50, %v1697_v51 }
0x208f   : > { %v1700_v18 = vrot.slane %v1699_v20, 2 }
0x2091   : > { %vm1701_vm13 = vcmp.lt.s32.totalorder %v1699_v20, %v1700_v18 }
0x2092   : > { %v1702_v21 = vsel %vm1701_vm13, %v1699_v20, %v1700_v18 }
0x2093   : > { %v1703_v52 = vrot.slane %v1702_v21, 1 }
0x2095   : > { %vm1704_vm14 = vcmp.lt.s32.totalorder %v1702_v21, %v1703_v52 }
0x2096   : > { %v1705_v7 = vsel %vm1704_vm14, %v1702_v21, %v1703_v52 }
0x2097   : > { %2480 = vpush %v1705_v7 }
0x20c8   : > { %s3677_s12 = spop %2480 }
0x20c9   : > { %4392 = sst [smem:[#allocation17_spill]] %s3677_s12  ;;  %v1717_v57 = vstv %s3677_s12 }
0x20ca   : > { %vm1718_vm15 = vcmp.eq.s32.totalorder %v2767_v60, %v1717_v57 }
0x20cb   : > { %v1719_v15 = vsel %vm1718_vm15, -inf, %v1679_v27 }
0x20cc   : > { %v1730_v1 = vsel %vm295_vm2, %v1719_v15, -inf  ;;  %1720 = vst [vmem:[%s4393_s3] sm:$0x1] %v1719_v15 }
0x20cd   : > { %1731 = vmax.xlane.f32.xlu1 %v1730_v1 }
0x2156   : > { %v1732_v0 = vpop.xlane.xlu1 %1731 }
0x2157   : > { %v1733_v3 = vrot.slane %v1732_v0, 4 }
0x2159   : > { %v1734_v4 = vmax.f32 %v1732_v0, %v1733_v3 }
0x215b   : > { %v1735_v48 = vrot.slane %v1734_v4, 2 }
0x215d   : > { %v1736_v61 = vmax.f32 %v1734_v4, %v1735_v48 }
0x215f   : > { %v1737_v22 = vrot.slane %v1736_v61, 1 }
0x2161   : > { %v1738_v11 = vmax.f32 %v1736_v61, %v1737_v22 }
0x2163   : > { %2482 = vpush %v1738_v11 }
0x2194   : > { %s2483_s22 = spop %2482 }
0x2195   : > { %v1740_v63 = vstv %s2483_s22 }
0x2196   : > { %v3694_v24 = vsel %vm1722_vm0, %v1740_v63, %v3612_v28  ;;  %v3697_v45 = vsel %vm1723_vm1, %v1740_v63, %v3615_v39  ;;  %v3700_v25 = vsel %vm1724_vm3, %v1740_v63, %v3618_v8  ;;  %v3703_v27 = vsel %vm1725_vm4, %v1740_v63, %v3621_v10 }
0x2197   : > { %v3706_v54 = vsel %vm1726_vm5, %v1740_v63, %v3624_v40  ;;  %v3709_v23 = vsel %vm1727_vm6, %v1740_v63, %v3627_v13  ;;  %v3712_v9 = vsel %vm1728_vm7, %v1740_v63, %v3630_v41  ;;  %v3715_v28 = vsel %vm1729_vm8, %v1740_v63, %v3633_v12 }
0x2198   : > { %v1749_v39 = vmax.f32 %v3694_v24, %v3706_v54  ;;  %v1750_v8 = vmax.f32 %v3697_v45, %v3709_v23  ;;  %v1751_v10 = vmax.f32 %v3700_v25, %v3712_v9  ;;  %v1752_v40 = vmax.f32 %v3703_v27, %v3715_v28 }
0x219a   : > { %v1753_v13 = vmax.f32 %v1749_v39, %v1750_v8  ;;  %v1754_v17 = vmax.f32 %v1751_v10, %v1752_v40 }
0x219c   : > { %v1755_v19 = vmax.f32 %v1753_v13, %v1754_v17 }
0x219e   : > { %v1756_v41 = vrot.slane %v1755_v19, 4 }
0x21a0   : > { %v1757_v42 = vmax.f32 %v1755_v19, %v1756_v41 }
0x21a2   : > { %v1758_v16 = vrot.slane %v1757_v42, 2 }
0x21a4   : > { %v1759_v12 = vmax.f32 %v1757_v42, %v1758_v16 }
0x21a6   : > { %v1760_v55 = vrot.slane %v1759_v12, 1 }
0x21a8   : > { %v1761_v43 = vmax.f32 %v1759_v12, %v1760_v55 }
0x21aa   : > { %2484 = vpush %v1761_v43 }
0x21db   : > { %s2485_s3 = spop %2484 }
0x21dc   : > { %v3725_v44 = vstv %s2485_s3 }
0x21dd   : > { %vm1764_vm9 = vcmp.eq.f32.partialorder %v3694_v24, %v3725_v44  ;;  %vm1765_vm10 = vcmp.eq.f32.partialorder %v3697_v45, %v3725_v44  ;;  %vm1766_vm11 = vcmp.eq.f32.partialorder %v3700_v25, %v3725_v44  ;;  %vm1767_vm12 = vcmp.eq.f32.partialorder %v3703_v27, %v3725_v44 }
0x21de   : > { %vm1768_vm13 = vcmp.eq.f32.partialorder %v3706_v54, %v3725_v44  ;;  %vm1769_vm14 = vcmp.eq.f32.partialorder %v3709_v23, %v3725_v44  ;;  %vm1770_vm15 = vcmp.eq.f32.partialorder %v3712_v9, %v3725_v44  ;;  %vm1771_vm0 = vcmp.eq.f32.partialorder %v3715_v28, %v3725_v44 }
0x21df   : > { %v1772_v46 = vsel %vm1764_vm9, %v2716_v30, 64  ;;  %v1773_v56 = vsel %vm1765_vm10, %v2719_v31, 64  ;;  %v1774_v50 = vsel %vm1766_vm11, %v2722_v32, 64  ;;  %v1775_v51 = vsel %vm1767_vm12, %v2725_v33, 64 }
0x21e0   : > { %v1776_v20 = vsel %vm1768_vm13, %v2728_v34, 64  ;;  %v1777_v18 = vsel %vm1769_vm14, %v2733_v36, 64  ;;  %v1778_v21 = vsel %vm1770_vm15, %v2736_v37, 64  ;;  %v1779_v52 = vsel %vm1771_vm0, %v2739_v38, 64 }
0x21e1   : > { %vm1780_vm1 = vcmp.lt.s32.totalorder %v1772_v46, %v1776_v20  ;;  %vm1782_vm3 = vcmp.lt.s32.totalorder %v1773_v56, %v1777_v18  ;;  %vm1784_vm4 = vcmp.lt.s32.totalorder %v1774_v50, %v1778_v21  ;;  %vm1786_vm5 = vcmp.lt.s32.totalorder %v1775_v51, %v1779_v52 }
0x21e2   : > { %v1781_v7 = vsel %vm1780_vm1, %v1772_v46, %v1776_v20  ;;  %v1783_v57 = vsel %vm1782_vm3, %v1773_v56, %v1777_v18  ;;  %v1785_v15 = vsel %vm1784_vm4, %v1774_v50, %v1778_v21  ;;  %v1787_v1 = vsel %vm1786_vm5, %v1775_v51, %v1779_v52 }
0x21e3   : > { %vm1788_vm6 = vcmp.lt.s32.totalorder %v1781_v7, %v1783_v57  ;;  %vm1790_vm7 = vcmp.lt.s32.totalorder %v1785_v15, %v1787_v1 }
0x21e4   : > { %v1789_v0 = vsel %vm1788_vm6, %v1781_v7, %v1783_v57  ;;  %v1791_v3 = vsel %vm1790_vm7, %v1785_v15, %v1787_v1 }
0x21e5   : > { %vm1792_vm8 = vcmp.lt.s32.totalorder %v1789_v0, %v1791_v3 }
0x21e6   : > { %v1793_v4 = vsel %vm1792_vm8, %v1789_v0, %v1791_v3 }
0x21e7   : > { %v1794_v48 = vrot.slane %v1793_v4, 4 }
0x21e9   : > { %vm1795_vm9 = vcmp.lt.s32.totalorder %v1793_v4, %v1794_v48 }
0x21ea   : > { %v1796_v61 = vsel %vm1795_vm9, %v1793_v4, %v1794_v48 }
0x21eb   : > { %v1797_v22 = vrot.slane %v1796_v61, 2 }
0x21ed   : > { %vm1798_vm10 = vcmp.lt.s32.totalorder %v1796_v61, %v1797_v22 }
0x21ee   : > { %v1799_v11 = vsel %vm1798_vm10, %v1796_v61, %v1797_v22 }
0x21ef   : > { %v1800_v62 = vrot.slane %v1799_v11, 1 }
0x21f1   : > { %vm1801_vm11 = vcmp.lt.s32.totalorder %v1799_v11, %v1800_v62 }
0x21f2   : > { %v1802_v63 = vsel %vm1801_vm11, %v1799_v11, %v1800_v62 }
0x21f3   : > { %2486 = vpush %v1802_v63 }
0x2224   : > { %s3751_s22 = spop %2486 }
0x2225   : > { %4394 = sst [smem:[#allocation18_spill]] %s3751_s22  ;;  %s4340_s3 = scalar_lea.vmem [#allocation2], %s3751_s22  ;;  %v1847_v22 = vstv %s3751_s22 }
0x2226   : > { %v1805_v39 = vld [vmem:[%s4340_s3] sm:$0x1]  ;;  %s4396_s2 = scalar_lea.vmem [#allocation2], %s3751_s22  ;;  %vm1848_vm3 = vcmp.eq.s32.totalorder %v2716_v30, %v1847_v22  ;;  %vm1849_vm4 = vcmp.eq.s32.totalorder %v2719_v31, %v1847_v22  ;;  %vm1850_vm5 = vcmp.eq.s32.totalorder %v2722_v32, %v1847_v22  ;;  %vm1851_vm6 = vcmp.eq.s32.totalorder %v2725_v33, %v1847_v22 }
0x2227   : > { %vm1806_vm12 = vcmp.eq.f32.partialorder %v1805_v39, %v3725_v44  ;;  %vm1852_vm7 = vcmp.eq.s32.totalorder %v2728_v34, %v1847_v22  ;;  %vm1853_vm8 = vcmp.eq.s32.totalorder %v2733_v36, %v1847_v22  ;;  %vm1854_vm9 = vcmp.eq.s32.totalorder %v2736_v37, %v1847_v22 }
0x2228   : > { %v1807_v8 = vsel %vm1806_vm12, %v2767_v60, 128  ;;  %vm1855_vm10 = vcmp.eq.s32.totalorder %v2739_v38, %v1847_v22 }
0x2229   : > { %v1808_v10 = vsel %vm295_vm2, %v1807_v8, 2147483647 }
0x222a   : > { %v1810_v40 = vshra.s32 %v1808_v10, 16  ;;  %v1809_v17 = vand.u32 65535, %v1808_v10 }
0x222c   : > { %v1812_v13 = vcvt.s32.f32 %v1810_v40  ;;  %v1811_v41 = vcvt.s32.f32 %v1809_v17 }
0x222e   : > { %1813 = vmin.xlane.f32.xlu0 %v1812_v13 }
0x22b7   : > { %v1814_v19 = vpop.xlane.xlu0 %1813 }
0x22b8   : > { %vm1815_vm13 = vcmp.eq.f32.partialorder %v1812_v13, %v1814_v19  ;;  %v1820_v16 = vcvt.f32.s32 %v1814_v19 }
0x22b9   : > { %v1816_v42 = vsel %vm1815_vm13, %v1811_v41, inf }
0x22ba   : > { %1817 = vmin.xlane.f32.xlu1 %v1816_v42  ;;  %v1821_v55 = vshll.u32 %v1820_v16, 16 }
0x2343   : > { %v1818_v12 = vpop.xlane.xlu1 %1817 }
0x2344   : > { %v1819_v43 = vcvt.f32.s32 %v1818_v12 }
0x2346   : > { %v1822_v46 = vadd.s32 %v1821_v55, %v1819_v43 }
0x2348   : > { %v1823_v56 = vrot.slane %v1822_v46, 4 }
0x234a   : > { %vm1824_vm14 = vcmp.lt.s32.totalorder %v1822_v46, %v1823_v56 }
0x234b   : > { %v1825_v50 = vsel %vm1824_vm14, %v1822_v46, %v1823_v56 }
0x234c   : > { %v1826_v51 = vrot.slane %v1825_v50, 2 }
0x234e   : > { %vm1827_vm15 = vcmp.lt.s32.totalorder %v1825_v50, %v1826_v51 }
0x234f   : > { %v1828_v20 = vsel %vm1827_vm15, %v1825_v50, %v1826_v51 }
0x2350   : > { %v1829_v18 = vrot.slane %v1828_v20, 1 }
0x2352   : > { %vm1830_vm0 = vcmp.lt.s32.totalorder %v1828_v20, %v1829_v18 }
0x2353   : > { %v1831_v21 = vsel %vm1830_vm0, %v1828_v20, %v1829_v18 }
0x2354   : > { %2488 = vpush %v1831_v21 }
0x2385   : > { %s3759_s3 = spop %2488 }
0x2386   : > { %4395 = sst [smem:[#allocation19_spill]] %s3759_s3  ;;  %v1843_v52 = vstv %s3759_s3 }
0x2387   : > { %vm1844_vm1 = vcmp.eq.s32.totalorder %v2767_v60, %v1843_v52 }
0x2388   : > { %v1845_v7 = vsel %vm1844_vm1, -inf, %v1805_v39 }
0x2389   : > { %v1856_v57 = vsel %vm295_vm2, %v1845_v7, -inf  ;;  %1846 = vst [vmem:[%s4396_s2] sm:$0x1] %v1845_v7 }
0x238a   : > { %1857 = vmax.xlane.f32.xlu0 %v1856_v57 }
0x2413   : > { %v1858_v15 = vpop.xlane.xlu0 %1857 }
0x2414   : > { %v1859_v1 = vrot.slane %v1858_v15, 4 }
0x2416   : > { %v1860_v0 = vmax.f32 %v1858_v15, %v1859_v1 }
0x2418   : > { %v1861_v3 = vrot.slane %v1860_v0, 2 }
0x241a   : > { %v1862_v4 = vmax.f32 %v1860_v0, %v1861_v3 }
0x241c   : > { %v1863_v48 = vrot.slane %v1862_v4, 1 }
0x241e   : > { %v1864_v61 = vmax.f32 %v1862_v4, %v1863_v48 }
0x2420   : > { %2490 = vpush %v1864_v61 }
0x2451   : > { %s2491_s16 = spop %2490 }
0x2452   : > { %v1866_v11 = vstv %s2491_s16 }
0x2453   : > { %v3776_v62 = vsel %vm1848_vm3, %v1866_v11, %v3694_v24  ;;  %v3779_v63 = vsel %vm1849_vm4, %v1866_v11, %v3697_v45  ;;  %v3782_v39 = vsel %vm1850_vm5, %v1866_v11, %v3700_v25  ;;  %v3785_v8 = vsel %vm1851_vm6, %v1866_v11, %v3703_v27 }
0x2454   : > { %v3788_v10 = vsel %vm1852_vm7, %v1866_v11, %v3706_v54  ;;  %v3791_v40 = vsel %vm1853_vm8, %v1866_v11, %v3709_v23  ;;  %v3794_v13 = vsel %vm1854_vm9, %v1866_v11, %v3712_v9  ;;  %v3797_v24 = vsel %vm1855_vm10, %v1866_v11, %v3715_v28 }
0x2455   : > { %v1875_v45 = vmax.f32 %v3776_v62, %v3788_v10  ;;  %v1876_v25 = vmax.f32 %v3779_v63, %v3791_v40  ;;  %v1877_v27 = vmax.f32 %v3782_v39, %v3794_v13  ;;  %v1878_v54 = vmax.f32 %v3785_v8, %v3797_v24 }
0x2457   : > { %v1879_v23 = vmax.f32 %v1875_v45, %v1876_v25  ;;  %v1880_v17 = vmax.f32 %v1877_v27, %v1878_v54 }
0x2459   : > { %v1881_v19 = vmax.f32 %v1879_v23, %v1880_v17 }
0x245b   : > { %v1882_v9 = vrot.slane %v1881_v19, 4 }
0x245d   : > { %v1883_v41 = vmax.f32 %v1881_v19, %v1882_v9 }
0x245f   : > { %v1884_v42 = vrot.slane %v1883_v41, 2 }
0x2461   : > { %v1885_v28 = vmax.f32 %v1883_v41, %v1884_v42 }
0x2463   : > { %v1886_v16 = vrot.slane %v1885_v28, 1 }
0x2465   : > { %v1887_v12 = vmax.f32 %v1885_v28, %v1886_v16 }
0x2467   : > { %2492 = vpush %v1887_v12 }
0x2498   : > { %s2493_s2 = spop %2492 }
0x2499   : > { %v3807_v55 = vstv %s2493_s2 }
0x249a   : > { %vm1890_vm11 = vcmp.eq.f32.partialorder %v3776_v62, %v3807_v55  ;;  %vm1891_vm12 = vcmp.eq.f32.partialorder %v3779_v63, %v3807_v55  ;;  %vm1892_vm13 = vcmp.eq.f32.partialorder %v3782_v39, %v3807_v55  ;;  %vm1893_vm14 = vcmp.eq.f32.partialorder %v3785_v8, %v3807_v55 }
0x249b   : > { %vm1894_vm15 = vcmp.eq.f32.partialorder %v3788_v10, %v3807_v55  ;;  %vm1895_vm0 = vcmp.eq.f32.partialorder %v3791_v40, %v3807_v55  ;;  %vm1896_vm1 = vcmp.eq.f32.partialorder %v3794_v13, %v3807_v55  ;;  %vm1897_vm3 = vcmp.eq.f32.partialorder %v3797_v24, %v3807_v55 }
0x249c   : > { %v1898_v43 = vsel %vm1890_vm11, %v2716_v30, 64  ;;  %v1899_v46 = vsel %vm1891_vm12, %v2719_v31, 64  ;;  %v1900_v56 = vsel %vm1892_vm13, %v2722_v32, 64  ;;  %v1901_v50 = vsel %vm1893_vm14, %v2725_v33, 64 }
0x249d   : > { %v1902_v51 = vsel %vm1894_vm15, %v2728_v34, 64  ;;  %v1903_v20 = vsel %vm1895_vm0, %v2733_v36, 64  ;;  %v1904_v18 = vsel %vm1896_vm1, %v2736_v37, 64  ;;  %v1905_v21 = vsel %vm1897_vm3, %v2739_v38, 64 }
0x249e   : > { %vm1906_vm4 = vcmp.lt.s32.totalorder %v1898_v43, %v1902_v51  ;;  %vm1908_vm5 = vcmp.lt.s32.totalorder %v1899_v46, %v1903_v20  ;;  %vm1910_vm6 = vcmp.lt.s32.totalorder %v1900_v56, %v1904_v18  ;;  %vm1912_vm7 = vcmp.lt.s32.totalorder %v1901_v50, %v1905_v21 }
0x249f   : > { %v1907_v52 = vsel %vm1906_vm4, %v1898_v43, %v1902_v51  ;;  %v1909_v7 = vsel %vm1908_vm5, %v1899_v46, %v1903_v20  ;;  %v1911_v57 = vsel %vm1910_vm6, %v1900_v56, %v1904_v18  ;;  %v1913_v15 = vsel %vm1912_vm7, %v1901_v50, %v1905_v21 }
0x24a0   : > { %vm1914_vm8 = vcmp.lt.s32.totalorder %v1907_v52, %v1909_v7  ;;  %vm1916_vm9 = vcmp.lt.s32.totalorder %v1911_v57, %v1913_v15 }
0x24a1   : > { %v1915_v1 = vsel %vm1914_vm8, %v1907_v52, %v1909_v7  ;;  %v1917_v0 = vsel %vm1916_vm9, %v1911_v57, %v1913_v15 }
0x24a2   : > { %vm1918_vm10 = vcmp.lt.s32.totalorder %v1915_v1, %v1917_v0 }
0x24a3   : > { %v1919_v3 = vsel %vm1918_vm10, %v1915_v1, %v1917_v0 }
0x24a4   : > { %v1920_v4 = vrot.slane %v1919_v3, 4 }
0x24a6   : > { %vm1921_vm11 = vcmp.lt.s32.totalorder %v1919_v3, %v1920_v4 }
0x24a7   : > { %v1922_v48 = vsel %vm1921_vm11, %v1919_v3, %v1920_v4 }
0x24a8   : > { %v1923_v61 = vrot.slane %v1922_v48, 2 }
0x24aa   : > { %vm1924_vm12 = vcmp.lt.s32.totalorder %v1922_v48, %v1923_v61 }
0x24ab   : > { %v1925_v22 = vsel %vm1924_vm12, %v1922_v48, %v1923_v61 }
0x24ac   : > { %v1926_v11 = vrot.slane %v1925_v22, 1 }
0x24ae   : > { %vm1927_vm13 = vcmp.lt.s32.totalorder %v1925_v22, %v1926_v11 }
0x24af   : > { %v1928_v45 = vsel %vm1927_vm13, %v1925_v22, %v1926_v11 }
0x24b0   : > { %2494 = vpush %v1928_v45 }
0x24e1   : > { %s3833_s16 = spop %2494 }
0x24e2   : > { %4397 = sst [smem:[#allocation20_spill]] %s3833_s16  ;;  %s4342_s2 = scalar_lea.vmem [#allocation2], %s3833_s16  ;;  %v1973_v22 = vstv %s3833_s16 }
0x24e3   : > { %v1931_v25 = vld [vmem:[%s4342_s2] sm:$0x1]  ;;  %s4399_s13 = scalar_lea.vmem [#allocation2], %s3833_s16  ;;  %vm1974_vm5 = vcmp.eq.s32.totalorder %v2716_v30, %v1973_v22  ;;  %vm1975_vm6 = vcmp.eq.s32.totalorder %v2719_v31, %v1973_v22  ;;  %vm1976_vm7 = vcmp.eq.s32.totalorder %v2722_v32, %v1973_v22  ;;  %vm1977_vm8 = vcmp.eq.s32.totalorder %v2725_v33, %v1973_v22 }
0x24e4   : > { %vm1932_vm14 = vcmp.eq.f32.partialorder %v1931_v25, %v3807_v55  ;;  %vm1978_vm9 = vcmp.eq.s32.totalorder %v2728_v34, %v1973_v22  ;;  %vm1979_vm10 = vcmp.eq.s32.totalorder %v2733_v36, %v1973_v22  ;;  %vm1980_vm11 = vcmp.eq.s32.totalorder %v2736_v37, %v1973_v22 }
0x24e5   : > { %v1933_v27 = vsel %vm1932_vm14, %v2767_v60, 128  ;;  %vm1981_vm12 = vcmp.eq.s32.totalorder %v2739_v38, %v1973_v22 }
0x24e6   : > { %v1934_v54 = vsel %vm295_vm2, %v1933_v27, 2147483647 }
0x24e7   : > { %v1936_v23 = vshra.s32 %v1934_v54, 16  ;;  %v1935_v19 = vand.u32 65535, %v1934_v54 }
0x24e9   : > { %v1938_v17 = vcvt.s32.f32 %v1936_v23  ;;  %v1937_v41 = vcvt.s32.f32 %v1935_v19 }
0x24eb   : > { %1939 = vmin.xlane.f32.xlu1 %v1938_v17 }
0x2574   : > { %v1940_v9 = vpop.xlane.xlu1 %1939 }
0x2575   : > { %vm1941_vm15 = vcmp.eq.f32.partialorder %v1938_v17, %v1940_v9  ;;  %v1946_v28 = vcvt.f32.s32 %v1940_v9 }
0x2576   : > { %v1942_v42 = vsel %vm1941_vm15, %v1937_v41, inf }
0x2577   : > { %1943 = vmin.xlane.f32.xlu0 %v1942_v42  ;;  %v1947_v12 = vshll.u32 %v1946_v28, 16 }
0x2600   : > { %v1944_v16 = vpop.xlane.xlu0 %1943 }
0x2601   : > { %v1945_v43 = vcvt.f32.s32 %v1944_v16 }
0x2603   : > { %v1948_v46 = vadd.s32 %v1947_v12, %v1945_v43 }
0x2605   : > { %v1949_v56 = vrot.slane %v1948_v46, 4 }
0x2607   : > { %vm1950_vm0 = vcmp.lt.s32.totalorder %v1948_v46, %v1949_v56 }
0x2608   : > { %v1951_v50 = vsel %vm1950_vm0, %v1948_v46, %v1949_v56 }
0x2609   : > { %v1952_v51 = vrot.slane %v1951_v50, 2 }
0x260b   : > { %vm1953_vm1 = vcmp.lt.s32.totalorder %v1951_v50, %v1952_v51 }
0x260c   : > { %v1954_v20 = vsel %vm1953_vm1, %v1951_v50, %v1952_v51 }
0x260d   : > { %v1955_v18 = vrot.slane %v1954_v20, 1 }
0x260f   : > { %vm1956_vm3 = vcmp.lt.s32.totalorder %v1954_v20, %v1955_v18 }
0x2610   : > { %v1957_v21 = vsel %vm1956_vm3, %v1954_v20, %v1955_v18 }
0x2611   : > { %2496 = vpush %v1957_v21 }
0x2642   : > { %s3841_s2 = spop %2496 }
0x2643   : > { %4398 = sst [smem:[#allocation21_spill]] %s3841_s2  ;;  %v1969_v52 = vstv %s3841_s2 }
0x2644   : > { %vm1970_vm4 = vcmp.eq.s32.totalorder %v2767_v60, %v1969_v52 }
0x2645   : > { %v1971_v7 = vsel %vm1970_vm4, -inf, %v1931_v25 }
0x2646   : > { %v1982_v57 = vsel %vm295_vm2, %v1971_v7, -inf  ;;  %1972 = vst [vmem:[%s4399_s13] sm:$0x1] %v1971_v7 }
0x2647   : > { %1983 = vmax.xlane.f32.xlu1 %v1982_v57 }
0x26d0   : > { %v1984_v15 = vpop.xlane.xlu1 %1983 }
0x26d1   : > { %v1985_v1 = vrot.slane %v1984_v15, 4 }
0x26d3   : > { %v1986_v0 = vmax.f32 %v1984_v15, %v1985_v1 }
0x26d5   : > { %v1987_v3 = vrot.slane %v1986_v0, 2 }
0x26d7   : > { %v1988_v4 = vmax.f32 %v1986_v0, %v1987_v3 }
0x26d9   : > { %v1989_v48 = vrot.slane %v1988_v4, 1 }
0x26db   : > { %v1990_v61 = vmax.f32 %v1988_v4, %v1989_v48 }
0x26dd   : > { %2498 = vpush %v1990_v61 }
0x270e   : > { %s2499_s2 = spop %2498 }
0x270f   : > { %v1992_v11 = vstv %s2499_s2 }
0x2710   : > { %v3858_v45 = vsel %vm1974_vm5, %v1992_v11, %v3776_v62  ;;  %v3861_v25 = vsel %vm1975_vm6, %v1992_v11, %v3779_v63  ;;  %v3864_v27 = vsel %vm1976_vm7, %v1992_v11, %v3782_v39  ;;  %v3867_v54 = vsel %vm1977_vm8, %v1992_v11, %v3785_v8 }
0x2711   : > { %v3870_v23 = vsel %vm1978_vm9, %v1992_v11, %v3788_v10  ;;  %v3873_v17 = vsel %vm1979_vm10, %v1992_v11, %v3791_v40  ;;  %v3876_v19 = vsel %vm1980_vm11, %v1992_v11, %v3794_v13  ;;  %v3879_v62 = vsel %vm1981_vm12, %v1992_v11, %v3797_v24 }
0x2712   : > { %v2001_v63 = vmax.f32 %v3858_v45, %v3870_v23  ;;  %v2002_v39 = vmax.f32 %v3861_v25, %v3873_v17  ;;  %v2003_v8 = vmax.f32 %v3864_v27, %v3876_v19  ;;  %v2004_v10 = vmax.f32 %v3867_v54, %v3879_v62 }
0x2714   : > { %v2005_v40 = vmax.f32 %v2001_v63, %v2002_v39  ;;  %v2006_v9 = vmax.f32 %v2003_v8, %v2004_v10 }
0x2716   : > { %v2007_v41 = vmax.f32 %v2005_v40, %v2006_v9 }
0x2718   : > { %v2008_v13 = vrot.slane %v2007_v41, 4 }
0x271a   : > { %v2009_v42 = vmax.f32 %v2007_v41, %v2008_v13 }
0x271c   : > { %v2010_v28 = vrot.slane %v2009_v42, 2 }
0x271e   : > { %v2011_v24 = vmax.f32 %v2009_v42, %v2010_v28 }
0x2720   : > { %v2012_v16 = vrot.slane %v2011_v24, 1 }
0x2722   : > { %v2013_v12 = vmax.f32 %v2011_v24, %v2012_v16 }
0x2724   : > { %2500 = vpush %v2013_v12 }
0x2755   : > { %s2501_s13 = spop %2500 }
0x2756   : > { %v3889_v43 = vstv %s2501_s13 }
0x2757   : > { %vm2016_vm13 = vcmp.eq.f32.partialorder %v3858_v45, %v3889_v43  ;;  %vm2017_vm14 = vcmp.eq.f32.partialorder %v3861_v25, %v3889_v43  ;;  %vm2018_vm15 = vcmp.eq.f32.partialorder %v3864_v27, %v3889_v43  ;;  %vm2019_vm0 = vcmp.eq.f32.partialorder %v3867_v54, %v3889_v43 }
0x2758   : > { %vm2020_vm1 = vcmp.eq.f32.partialorder %v3870_v23, %v3889_v43  ;;  %vm2021_vm3 = vcmp.eq.f32.partialorder %v3873_v17, %v3889_v43  ;;  %vm2022_vm4 = vcmp.eq.f32.partialorder %v3876_v19, %v3889_v43  ;;  %vm2023_vm5 = vcmp.eq.f32.partialorder %v3879_v62, %v3889_v43 }
0x2759   : > { %v2024_v46 = vsel %vm2016_vm13, %v2716_v30, 64  ;;  %v2025_v56 = vsel %vm2017_vm14, %v2719_v31, 64  ;;  %v2026_v50 = vsel %vm2018_vm15, %v2722_v32, 64  ;;  %v2027_v51 = vsel %vm2019_vm0, %v2725_v33, 64 }
0x275a   : > { %v2028_v20 = vsel %vm2020_vm1, %v2728_v34, 64  ;;  %v2029_v18 = vsel %vm2021_vm3, %v2733_v36, 64  ;;  %v2030_v21 = vsel %vm2022_vm4, %v2736_v37, 64  ;;  %v2031_v52 = vsel %vm2023_vm5, %v2739_v38, 64 }
0x275b   : > { %vm2032_vm6 = vcmp.lt.s32.totalorder %v2024_v46, %v2028_v20  ;;  %vm2034_vm7 = vcmp.lt.s32.totalorder %v2025_v56, %v2029_v18  ;;  %vm2036_vm8 = vcmp.lt.s32.totalorder %v2026_v50, %v2030_v21  ;;  %vm2038_vm9 = vcmp.lt.s32.totalorder %v2027_v51, %v2031_v52 }
0x275c   : > { %v2033_v7 = vsel %vm2032_vm6, %v2024_v46, %v2028_v20  ;;  %v2035_v57 = vsel %vm2034_vm7, %v2025_v56, %v2029_v18  ;;  %v2037_v15 = vsel %vm2036_vm8, %v2026_v50, %v2030_v21  ;;  %v2039_v1 = vsel %vm2038_vm9, %v2027_v51, %v2031_v52 }
0x275d   : > { %vm2040_vm10 = vcmp.lt.s32.totalorder %v2033_v7, %v2035_v57  ;;  %vm2042_vm11 = vcmp.lt.s32.totalorder %v2037_v15, %v2039_v1 }
0x275e   : > { %v2041_v0 = vsel %vm2040_vm10, %v2033_v7, %v2035_v57  ;;  %v2043_v3 = vsel %vm2042_vm11, %v2037_v15, %v2039_v1 }
0x275f   : > { %vm2044_vm12 = vcmp.lt.s32.totalorder %v2041_v0, %v2043_v3 }
0x2760   : > { %v2045_v4 = vsel %vm2044_vm12, %v2041_v0, %v2043_v3 }
0x2761   : > { %v2046_v48 = vrot.slane %v2045_v4, 4 }
0x2763   : > { %vm2047_vm13 = vcmp.lt.s32.totalorder %v2045_v4, %v2046_v48 }
0x2764   : > { %v2048_v61 = vsel %vm2047_vm13, %v2045_v4, %v2046_v48 }
0x2765   : > { %v2049_v22 = vrot.slane %v2048_v61, 2 }
0x2767   : > { %vm2050_vm14 = vcmp.lt.s32.totalorder %v2048_v61, %v2049_v22 }
0x2768   : > { %v2051_v11 = vsel %vm2050_vm14, %v2048_v61, %v2049_v22 }
0x2769   : > { %v2052_v63 = vrot.slane %v2051_v11, 1 }
0x276b   : > { %vm2053_vm15 = vcmp.lt.s32.totalorder %v2051_v11, %v2052_v63 }
0x276c   : > { %v2054_v39 = vsel %vm2053_vm15, %v2051_v11, %v2052_v63  ;;  %vm325_vm15 = vcmp.eq.s32.totalorder %v2767_v60, 0 }
0x276d   : > { %2502 = vpush %v2054_v39 }
0x279e   : > { %s3915_s2 = spop %2502 }
0x279f   : > { %4400 = sst [smem:[#allocation22_spill]] %s3915_s2  ;;  %s4346_s13 = scalar_lea.vmem [#allocation2], %s3915_s2  ;;  %v2099_v63 = vstv %s3915_s2 }
0x27a0   : > { %v2057_v8 = vld [vmem:[%s4346_s13] sm:$0x1]  ;;  %s4402_s16 = scalar_lea.vmem [#allocation2], %s3915_s2  ;;  %vm2100_vm7 = vcmp.eq.s32.totalorder %v2716_v30, %v2099_v63  ;;  %vm2101_vm8 = vcmp.eq.s32.totalorder %v2719_v31, %v2099_v63  ;;  %vm2102_vm9 = vcmp.eq.s32.totalorder %v2722_v32, %v2099_v63  ;;  %vm2103_vm10 = vcmp.eq.s32.totalorder %v2725_v33, %v2099_v63  ;;  %s181_s2 = scalar_lea.vmem %s4403_s1, %s2686_s24 }
0x27a1   : > { %vm2058_vm0 = vcmp.eq.f32.partialorder %v2057_v8, %v3889_v43  ;;  %vm2104_vm11 = vcmp.eq.s32.totalorder %v2728_v34, %v2099_v63  ;;  %vm2105_vm12 = vcmp.eq.s32.totalorder %v2733_v36, %v2099_v63  ;;  %vm2106_vm13 = vcmp.eq.s32.totalorder %v2736_v37, %v2099_v63  ;;  %s2369_s1 = sshll.u32 %s2849_s8, 7  ;;  %s2372_s8 = sshll.u32 %s3095_s9, 7 }
0x27a2   : > { %v2059_v10 = vsel %vm2058_vm0, %v2767_v60, 128  ;;  %vm2107_vm14 = vcmp.eq.s32.totalorder %v2739_v38, %v2099_v63  ;;  %vm451_vm0 = vcmp.eq.s32.totalorder %v2767_v60, 1  ;;  %s4070_s24 = sadd.s32 %s2857_s10, %s2369_s1  ;;  %s4087_s10 = sadd.s32 %s3103_s17, %s2372_s8 }
0x27a3   : > { %v2060_v40 = vsel %vm295_vm2, %v2059_v10, 2147483647  ;;  %s449_s15 = sshra.s32 %s4070_s24, 3  ;;  %s2374_s9 = sshll.u32 %s3259_s20, 7 }
0x27a4   : > { %v2062_v9 = vshra.s32 %v2060_v40, 16  ;;  %v2061_v13 = vand.u32 65535, %v2060_v40  ;;  %s4101_s17 = sadd.s32 %s3267_s29, %s2374_s9  ;;  %s4405_s8 = sld [smem:[#allocation16_spill]] }
0x27a5   : > { %s1079_s20 = sshra.s32 %s4101_s17, 3  ;;  %s4406_s29 = sld [smem:[#allocation17_spill]] }
0x27a6   : > { %v2064_v41 = vcvt.s32.f32 %v2062_v9  ;;  %v2063_v28 = vcvt.s32.f32 %v2061_v13  ;;  %s1080_s9 = sand.u32 7, %s4101_s17 }
0x27a8   : > { %2065 = vmin.xlane.f32.xlu0 %v2064_v41 }
0x2831   : > { %v2066_v42 = vpop.xlane.xlu0 %2065 }
0x2832   : > { %vm2067_vm1 = vcmp.eq.f32.partialorder %v2064_v41, %v2066_v42  ;;  %v2072_v16 = vcvt.f32.s32 %v2066_v42 }
0x2833   : > { %v2068_v24 = vsel %vm2067_vm1, %v2063_v28, inf  ;;  %vm4361_vm1 = vcmp.eq.s32.totalorder %v2767_v60, 2 }
0x2834   : > { %2069 = vmin.xlane.f32.xlu1 %v2068_v24  ;;  %v2073_v46 = vshll.u32 %v2072_v16, 16 }
0x28bd   : > { %v2070_v12 = vpop.xlane.xlu1 %2069 }
0x28be   : > { %v2071_v56 = vcvt.f32.s32 %v2070_v12 }
0x28c0   : > { %v2074_v50 = vadd.s32 %v2073_v46, %v2071_v56 }
0x28c2   : > { %v2075_v51 = vrot.slane %v2074_v50, 4 }
0x28c4   : > { %vm2076_vm3 = vcmp.lt.s32.totalorder %v2074_v50, %v2075_v51 }
0x28c5   : > { %v2077_v20 = vsel %vm2076_vm3, %v2074_v50, %v2075_v51  ;;  %v326_v50 = vsel %vm325_vm15, %v2730_v35, 0.0  ;;  %vm4360_vm3 = vcmp.eq.s32.totalorder %v2767_v60, 3 }
0x28c6   : > { %v2078_v18 = vrot.slane %v2077_v20, 2  ;;  %v452_v51 = vsel %vm451_vm0, %v2823_v59, %v326_v50 }
0x28c8   : > { %vm2079_vm4 = vcmp.lt.s32.totalorder %v2077_v20, %v2078_v18 }
0x28c9   : > { %v2080_v21 = vsel %vm2079_vm4, %v2077_v20, %v2078_v18  ;;  %vm4359_vm4 = vcmp.eq.s32.totalorder %v2767_v60, 4  ;;  %v578_v20 = vsel %vm4361_vm1, %v2905_v26, %v452_v51 }
0x28ca   : > { %v2081_v52 = vrot.slane %v2080_v21, 1  ;;  %v704_v18 = vsel %vm4360_vm3, %v2987_v58, %v578_v20 }
0x28cb   : > { %v830_v35 = vsel %vm4359_vm4, %v3069_v29, %v704_v18 }
0x28cc   : > { %vm2082_vm5 = vcmp.lt.s32.totalorder %v2080_v21, %v2081_v52 }
0x28cd   : > { %v2083_v7 = vsel %vm2082_vm5, %v2080_v21, %v2081_v52  ;;  %vm4358_vm5 = vcmp.eq.s32.totalorder %v2767_v60, 5 }
0x28ce   : > { %2504 = vpush %v2083_v7  ;;  %v956_v59 = vsel %vm4358_vm5, %v3151_v2, %v830_v35 }
0x28ff   : > { %s3923_s13 = spop %2504 }
0x2900   : > { %4401 = sst [smem:[#allocation23_spill]] %s3923_s13  ;;  %v2095_v57 = vstv %s3923_s13 }
0x2901   : > { %vm2096_vm6 = vcmp.eq.s32.totalorder %v2767_v60, %v2095_v57 }
0x2902   : > { %v2097_v15 = vsel %vm2096_vm6, -inf, %v2057_v8  ;;  %vm4356_vm6 = vcmp.eq.s32.totalorder %v2767_v60, 6 }
0x2903   : > { %v2108_v1 = vsel %vm295_vm2, %v2097_v15, -inf  ;;  %2098 = vst [vmem:[%s4402_s16] sm:$0x1] %v2097_v15  ;;  %v1082_v26 = vsel %vm4356_vm6, %v3233_v14, %v956_v59 }
0x2904   : > { %2109 = vmax.xlane.f32.xlu0 %v2108_v1 }
0x298d   : > { %v2110_v0 = vpop.xlane.xlu0 %2109 }
0x298e   : > { %v2111_v3 = vrot.slane %v2110_v0, 4 }
0x2990   : > { %v2112_v4 = vmax.f32 %v2110_v0, %v2111_v3 }
0x2992   : > { %v2113_v48 = vrot.slane %v2112_v4, 2 }
0x2994   : > { %v2114_v61 = vmax.f32 %v2112_v4, %v2113_v48 }
0x2996   : > { %v2115_v22 = vrot.slane %v2114_v61, 1 }
0x2998   : > { %v2116_v11 = vmax.f32 %v2114_v61, %v2115_v22 }
0x299a   : > { %2506 = vpush %v2116_v11 }
0x29cb   : > { %s2507_s13 = spop %2506 }
0x29cc   : > { %v2118_v39 = vstv %s2507_s13 }
0x29cd   : > { %v3940_v8 = vsel %vm2100_vm7, %v2118_v39, %v3858_v45  ;;  %v3943_v10 = vsel %vm2101_vm8, %v2118_v39, %v3861_v25  ;;  %v3946_v40 = vsel %vm2102_vm9, %v2118_v39, %v3864_v27  ;;  %v3949_v9 = vsel %vm2103_vm10, %v2118_v39, %v3867_v54 }
0x29ce   : > { %v3952_v41 = vsel %vm2104_vm11, %v2118_v39, %v3870_v23  ;;  %v3955_v13 = vsel %vm2105_vm12, %v2118_v39, %v3873_v17  ;;  %v3958_v42 = vsel %vm2106_vm13, %v2118_v39, %v3876_v19  ;;  %v3961_v45 = vsel %vm2107_vm14, %v2118_v39, %v3879_v62 }
0x29cf   : > { %v2127_v25 = vmax.f32 %v3940_v8, %v3952_v41  ;;  %v2128_v27 = vmax.f32 %v3943_v10, %v3955_v13  ;;  %v2129_v54 = vmax.f32 %v3946_v40, %v3958_v42  ;;  %v2130_v23 = vmax.f32 %v3949_v9, %v3961_v45 }
0x29d0   : > { %vm4354_vm7 = vcmp.eq.s32.totalorder %v2767_v60, 7  ;;  %vm4352_vm8 = vcmp.eq.s32.totalorder %v2767_v60, 8  ;;  %vm4351_vm9 = vcmp.eq.s32.totalorder %v2767_v60, 9  ;;  %vm4349_vm10 = vcmp.eq.s32.totalorder %v2767_v60, 10 }
0x29d1   : > { %v2131_v17 = vmax.f32 %v2127_v25, %v2128_v27  ;;  %v2132_v28 = vmax.f32 %v2129_v54, %v2130_v23  ;;  %v1208_v58 = vsel %vm4354_vm7, %v3315_v53, %v1082_v26  ;;  %vm4350_vm11 = vcmp.eq.s32.totalorder %v2767_v60, 11 }
0x29d2   : > { %v1334_v29 = vsel %vm4352_vm8, %v3397_v5, %v1208_v58  ;;  %vm4353_vm12 = vcmp.eq.s32.totalorder %v2767_v60, 12  ;;  %vm4355_vm13 = vcmp.eq.s32.totalorder %v2767_v60, 13  ;;  %vm4357_vm14 = vcmp.eq.s32.totalorder %v2767_v60, 14 }
0x29d3   : > { %v2133_v24 = vmax.f32 %v2131_v17, %v2132_v28  ;;  %v1460_v2 = vsel %vm4351_vm9, %v3479_v47, %v1334_v29 }
0x29d4   : > { %v1586_v14 = vsel %vm4349_vm10, %v3561_v6, %v1460_v2  ;;  %vm2215_vm10 = vcmp.eq.s32.totalorder %v2767_v60, 15 }
0x29d5   : > { %v2134_v19 = vrot.slane %v2133_v24, 4  ;;  %v1712_v53 = vsel %vm4350_vm11, %v3643_v49, %v1586_v14 }
0x29d6   : > { %v1838_v5 = vsel %vm4353_vm12, %v3725_v44, %v1712_v53 }
0x29d7   : > { %v2135_v16 = vmax.f32 %v2133_v24, %v2134_v19  ;;  %v1964_v47 = vsel %vm4355_vm13, %v3807_v55, %v1838_v5 }
0x29d8   : > { %v2090_v6 = vsel %vm4357_vm14, %v3889_v43, %v1964_v47 }
0x29d9   : > { %v2136_v12 = vrot.slane %v2135_v16, 2 }
0x29db   : > { %v2137_v62 = vmax.f32 %v2135_v16, %v2136_v12 }
0x29dd   : > { %v2138_v46 = vrot.slane %v2137_v62, 1 }
0x29df   : > { %v2139_v56 = vmax.f32 %v2137_v62, %v2138_v46  ;;  %v453_v62 = vstv %s449_s15  ;;  %s4410_s15 = sld [smem:[#allocation19_spill]] }
0x29e1   : > { %2508 = vpush %v2139_v56 }
0x2a12   : > { %s2509_s16 = spop %2508 }
0x2a13   : > { %v2141_v21 = vstv %s2509_s16 }
0x2a14   : > { %vm2142_vm11 = vcmp.eq.f32.partialorder %v3940_v8, %v2141_v21  ;;  %vm2143_vm9 = vcmp.eq.f32.partialorder %v3943_v10, %v2141_v21  ;;  %vm2144_vm8 = vcmp.eq.f32.partialorder %v3946_v40, %v2141_v21  ;;  %vm2145_vm12 = vcmp.eq.f32.partialorder %v3949_v9, %v2141_v21 }
0x2a15   : > { %vm2146_vm7 = vcmp.eq.f32.partialorder %v3952_v41, %v2141_v21  ;;  %vm2147_vm13 = vcmp.eq.f32.partialorder %v3955_v13, %v2141_v21  ;;  %vm2148_vm6 = vcmp.eq.f32.partialorder %v3958_v42, %v2141_v21  ;;  %vm2149_vm14 = vcmp.eq.f32.partialorder %v3961_v45, %v2141_v21 }
0x2a16   : > { %v2150_v49 = vsel %vm2142_vm11, %v2716_v30, 64  ;;  %v2151_v44 = vsel %vm2143_vm9, %v2719_v31, 64  ;;  %v2152_v55 = vsel %vm2144_vm8, %v2722_v32, 64  ;;  %v2153_v43 = vsel %vm2145_vm12, %v2725_v33, 64 }
0x2a17   : > { %v2154_v52 = vsel %vm2146_vm7, %v2728_v34, 64  ;;  %v2155_v7 = vsel %vm2147_vm13, %v2733_v36, 64  ;;  %v2156_v57 = vsel %vm2148_vm6, %v2736_v37, 64  ;;  %v2157_v15 = vsel %vm2149_vm14, %v2739_v38, 64 }
0x2a18   : > { %vm2158_vm5 = vcmp.lt.s32.totalorder %v2150_v49, %v2154_v52  ;;  %vm2160_vm4 = vcmp.lt.s32.totalorder %v2151_v44, %v2155_v7  ;;  %vm2162_vm3 = vcmp.lt.s32.totalorder %v2152_v55, %v2156_v57  ;;  %vm2164_vm1 = vcmp.lt.s32.totalorder %v2153_v43, %v2157_v15 }
0x2a19   : > { %v2159_v30 = vsel %vm2158_vm5, %v2150_v49, %v2154_v52  ;;  %v2161_v31 = vsel %vm2160_vm4, %v2151_v44, %v2155_v7  ;;  %v2163_v32 = vsel %vm2162_vm3, %v2152_v55, %v2156_v57  ;;  %v2165_v33 = vsel %vm2164_vm1, %v2153_v43, %v2157_v15 }
0x2a1a   : > { %vm2166_vm8 = vcmp.lt.s32.totalorder %v2159_v30, %v2161_v31  ;;  %vm2168_vm7 = vcmp.lt.s32.totalorder %v2163_v32, %v2165_v33  ;;  %v2216_v34 = vsel %vm2215_vm10, %v2141_v21, %v2090_v6  ;;  %vm4414_vm13 = vcmp.eq.s32.totalorder %v2767_v60, 2 }
0x2a1b   : > { %v2167_v36 = vsel %vm2166_vm8, %v2159_v30, %v2161_v31  ;;  %v2169_v37 = vsel %vm2168_vm7, %v2163_v32, %v2165_v33  ;;  %2225 = vst [vmem:[%s181_s2] sm:$0x1] %v2216_v34  ;;  %s2368_s2 = sshll.u32 %s2765_s30, 7  ;;  %vm4420_vm14 = vcmp.eq.s32.totalorder %v2767_v60, 3  ;;  %v1083_v6 = vstv %s1079_s20 }
0x2a1c   : > { %vm2170_vm6 = vcmp.lt.s32.totalorder %v2167_v36, %v2169_v37  ;;  %vm4423_vm8 = vcmp.eq.s32.totalorder %v2767_v60, 4  ;;  %v1085_v44 = vstv %s1080_s9 }
0x2a1d   : > { %v2171_v38 = vsel %vm2170_vm6, %v2167_v36, %v2169_v37  ;;  %vm4425_vm7 = vmmov %vm4423_vm8  ;;  %vm4426_vm6 = vcmp.eq.s32.totalorder %v2767_v60, 5 }
0x2a1e   : > { %v2172_v1 = vrot.slane %v2171_v38, 4 }
0x2a20   : > { %vm2173_vm9 = vcmp.lt.s32.totalorder %v2171_v38, %v2172_v1 }
0x2a21   : > { %v2174_v0 = vsel %vm2173_vm9, %v2171_v38, %v2172_v1  ;;  %vm4428_vm9 = vmmov %vm4426_vm6 }
0x2a22   : > { %v2175_v3 = vrot.slane %v2174_v0, 2 }
0x2a24   : > { %vm2176_vm11 = vcmp.lt.s32.totalorder %v2174_v0, %v2175_v3 }
0x2a25   : > { %v2177_v4 = vsel %vm2176_vm11, %v2174_v0, %v2175_v3  ;;  %vm4429_vm11 = vcmp.eq.s32.totalorder %v2767_v60, 6 }
0x2a26   : > { %v2178_v48 = vrot.slane %v2177_v4, 1 }
0x2a28   : > { %vm2179_vm4 = vcmp.lt.s32.totalorder %v2177_v4, %v2178_v48 }
0x2a29   : > { %v2180_v61 = vsel %vm2179_vm4, %v2177_v4, %v2178_v48  ;;  %vm4430_vm4 = vmmov %vm4429_vm11 }
0x2a2a   : > { %2510 = vpush %v2180_v61 }
0x2a5b   : > { %s4054_s13 = spop %2510 }
0x2a5c   : > { %4404 = sst [smem:[#allocation24_spill]] %s4054_s13  ;;  %s4363_s16 = scalar_lea.vmem [#allocation2], %s4054_s13 }
0x2a5d   : > { %v4059_v22 = vld [vmem:[%s4363_s16] sm:$0x1]  ;;  %s4066_s16 = sadd.s32 %s2775_s5, %s2368_s2  ;;  %s2370_s13 = sshll.u32 %s2931_s19, 7 }
0x2a5e   : > { %vm2184_vm1 = vcmp.eq.f32.partialorder %v4059_v22, %v2141_v21  ;;  %s4074_s3 = sadd.s32 %s2939_s25, %s2370_s13  ;;  %s323_s22 = sshra.s32 %s4066_s16, 3 }
0x2a5f   : > { %v2185_v11 = vsel %vm2184_vm1, %v2767_v60, 128  ;;  %s324_s12 = sand.u32 7, %s4066_s16  ;;  %s2371_s2 = sshll.u32 %s3013_s28, 7  ;;  %v327_v16 = vstv %s323_s22  ;;  %vm4431_vm1 = vcmp.eq.s32.totalorder %v2767_v60, 7 }
0x2a60   : > { %v2186_v63 = vsel %vm295_vm2, %v2185_v11, 2147483647  ;;  %s4083_s1 = sadd.s32 %s3021_s4, %s2371_s2  ;;  %s2373_s19 = sshll.u32 %s3177_s27, 7  ;;  %v329_v12 = vstv %s324_s12  ;;  %v328_v50 = vsel %vm325_vm15, %v327_v16, 0 }
0x2a61   : > { %v2188_v39 = vshra.s32 %v2186_v63, 16  ;;  %v2187_v10 = vand.u32 65535, %v2186_v63  ;;  %s576_s25 = sand.u32 7, %s4074_s3  ;;  %s4092_s13 = sadd.s32 %s3185_s6, %s2373_s19  ;;  %v330_v18 = vsel %vm325_vm15, %v329_v12, 0  ;;  %v454_v35 = vsel %vm451_vm0, %v453_v62, %v328_v50  ;;  %vm4419_vm15 = vmmov %vm4414_vm13 }
0x2a62   : > { %s701_s5 = sshra.s32 %s4083_s1, 3  ;;  %s2375_s27 = sshll.u32 %s3341_s26, 7  ;;  %v581_v51 = vstv %s576_s25 }
0x2a63   : > { %v2190_v8 = vcvt.s32.f32 %v2188_v39  ;;  %v2189_v9 = vcvt.s32.f32 %v2187_v10  ;;  %s4105_s6 = sadd.s32 %s3349_s11, %s2375_s27  ;;  %s2376_s19 = sshll.u32 %s3423_s7, 7  ;;  %v705_v20 = vstv %s701_s5 }
0x2a64   : > { %s954_s4 = sand.u32 7, %s4092_s13  ;;  %s4110_s2 = sadd.s32 %s3431_s0, %s2376_s19 }
0x2a65   : > { %2191 = vmin.xlane.f32.xlu1 %v2190_v8  ;;  %s1205_s28 = sshra.s32 %s4105_s6, 3  ;;  %s1206_s26 = sand.u32 7, %s4105_s6  ;;  %v959_v47 = vstv %s954_s4 }
0x2a66   : > { %s2377_s27 = sshll.u32 %s3505_s21, 7  ;;  %s2378_s7 = sshll.u32 %s3587_s23, 7  ;;  %v1209_v55 = vstv %s1205_s28  ;;  %v1211_v7 = vstv %s1206_s26 }
0x2a67   : > { %s4121_s30 = sadd.s32 %s3513_s14, %s2377_s27  ;;  %s4129_s0 = sadd.s32 %s3595_s18, %s2378_s7 }
0x2a68   : > { %s2379_s19 = sshll.u32 %s4405_s8, 7  ;;  %s4407_s11 = sand.u32 7, %s4070_s24 }
0x2a69   : > { %v455_v46 = vstv %s4407_s11  ;;  %s4408_s21 = sshra.s32 %s4074_s3, 3  ;;  %s1332_s14 = sand.u32 7, %s4110_s2 }
0x2a6a   : > { %v579_v56 = vstv %s4408_s21  ;;  %s4138_s22 = sadd.s32 %s4406_s29, %s2379_s19  ;;  %s4409_s23 = sld [smem:[#allocation18_spill]]  ;;  %v456_v58 = vsel %vm451_vm0, %v455_v46, %v330_v18  ;;  %vm4422_vm0 = vmmov %vm4420_vm14  ;;  %v1337_v31 = vstv %s1332_s14 }
0x2a6b   : > { %s1457_s18 = sshra.s32 %s4121_s30, 3  ;;  %s1458_s24 = sand.u32 7, %s4121_s30  ;;  %v580_v29 = vsel %vm4414_vm13, %v579_v56, %v454_v35  ;;  %v582_v53 = vsel %vm4419_vm15, %v581_v51, %v456_v58  ;;  %vm4440_vm15 = vcmp.eq.s32.totalorder %v2767_v60, 10 }
0x2a6c   : > { %s4411_s12 = sand.u32 7, %s4083_s1  ;;  %s4412_s16 = sld [smem:[#allocation20_spill]]  ;;  %v706_v5 = vsel %vm4420_vm14, %v705_v20, %v580_v29  ;;  %v1461_v32 = vstv %s1457_s18  ;;  %v1463_v36 = vstv %s1458_s24  ;;  %vm4441_vm14 = vmmov %vm4440_vm15 }
0x2a6d   : > { %v707_v59 = vstv %s4411_s12  ;;  %s4413_s8 = sshra.s32 %s4087_s10, 3  ;;  %s1583_s3 = sshra.s32 %s4129_s0, 3 }
0x2a6e   : > { %v831_v26 = vstv %s4413_s8  ;;  %s1584_s25 = sand.u32 7, %s4129_s0  ;;  %s4415_s5 = sld [smem:[#allocation21_spill]]  ;;  %v708_v21 = vsel %vm4422_vm0, %v707_v59, %v582_v53  ;;  %v1587_v37 = vstv %s1583_s3  ;;  %vm4442_vm0 = vcmp.eq.s32.totalorder %v2767_v60, 11 }
0x2a6f   : > { %s4416_s29 = sand.u32 7, %s4087_s10  ;;  %s4417_s11 = sld [smem:[#allocation22_spill]]  ;;  %v832_v49 = vsel %vm4423_vm8, %v831_v26, %v706_v5  ;;  %v1589_v0 = vstv %s1584_s25  ;;  %vm4444_vm8 = vmmov %vm4442_vm0 }
0x2a70   : > { %v833_v2 = vstv %s4416_s29  ;;  %s4418_s27 = sshra.s32 %s4092_s13, 3  ;;  %s1709_s1 = sshra.s32 %s4138_s22, 3 }
0x2a71   : > { %v957_v14 = vstv %s4418_s27  ;;  %s2380_s7 = sshll.u32 %s4409_s23, 7  ;;  %s4421_s19 = sld [smem:[#allocation23_spill]]  ;;  %v834_v43 = vsel %vm4425_vm7, %v833_v2, %v708_v21  ;;  %v1713_v3 = vstv %s1709_s1  ;;  %vm4445_vm7 = vcmp.eq.s32.totalorder %v2767_v60, 12 }
0x2a72   : > { %s4177_s10 = sadd.s32 %s4410_s15, %s2380_s7  ;;  %s2381_s21 = sshll.u32 %s4412_s16, 7  ;;  %v958_v52 = vsel %vm4426_vm6, %v957_v14, %v832_v49  ;;  %v960_v15 = vsel %vm4428_vm9, %v959_v47, %v834_v43  ;;  %vm4446_vm6 = vmmov %vm4445_vm7  ;;  %vm4447_vm9 = vcmp.eq.s32.totalorder %v2767_v60, 13 }
0x2a73   : > { %s4424_s23 = sld [smem:[#allocation7_spill]]  ;;  %s4427_s17 = sshra.s32 %s4110_s2, 3  ;;  %v1084_v30 = vsel %vm4429_vm11, %v1083_v6, %v958_v52  ;;  %v1086_v33 = vsel %vm4430_vm4, %v1085_v44, %v960_v15  ;;  %vm4448_vm11 = vmmov %vm4447_vm9  ;;  %vm4449_vm4 = vcmp.eq.s32.totalorder %v2767_v60, 14 }
0x2a74   : > { %s4189_s13 = sadd.s32 %s4415_s5, %s2381_s21  ;;  %v1335_v57 = vstv %s4427_s17  ;;  %s1710_s20 = sand.u32 7, %s4138_s22  ;;  %v1210_v34 = vsel %vm4431_vm1, %v1209_v55, %v1084_v30 }
0x2a75   : > { %s2382_s4 = sshll.u32 %s4417_s11, 7  ;;  %s1835_s6 = sshra.s32 %s4177_s10, 3  ;;  %v1715_v61 = vstv %s1710_s20 }
0x2a76   : > { %s1836_s26 = sand.u32 7, %s4177_s10  ;;  %s1961_s15 = sshra.s32 %s4189_s13, 3  ;;  %v1839_v11 = vstv %s1835_s6 }
0x2a77   : > { %s4202_s28 = sadd.s32 %s4421_s19, %s2382_s4  ;;  %s4433_s2 = sld [smem:[#allocation24_spill]]  ;;  %v1965_v10 = vstv %s1961_s15 }
0x2a78   : > { %s1962_s14 = sand.u32 7, %s4189_s13  ;;  %s4435_s18 = sld [smem:[#allocation15_spill]] }
0x2a79   : > { %s172_s9 = sand.u32 1, %s4424_s23   ;;  %s2087_s12 = sshra.s32 %s4202_s28, 3 }
0x2a7a   : > { %s4437_s30 = sld [smem:[#allocation10_spill]]  ;;  %s2088_s24 = sand.u32 7, %s4202_s28 }
0x2a7b   : > { %s4443_s8 = sld [smem:[#allocation27_spill]]  ;;  %s173_s29 = scalar_lea.vmem [#allocation3], %s172_s9 }
0x2a7c   : > { %s2253_s11 = sshll.u32 %s173_s29, 4  ;;  %s4452_s13 = sld [smem:[#allocation28_spill]]  ;;  %s4276_s11 = int_to_ptr.vmem [resolvable:$true] %s2253_s11 }
0x2a7d   : > { %s2383_s0 = sshll.u32 %s4433_s2, 7  ;;  %s4454_s20 = scalar_lea.vmem [#allocation2], %s4433_s2 }
0x2a7e   : > { %s2235_s28 = scalar_lea.sflag [#allocation4], %s172_s9  ;;  %s2553_s6 = scalar_lea.vmem %s4276_s11, 16 }
0x2a7f   : > { %p2554_p11 = scmp.ne.s32.totalorder %s4276_s11, %s2553_s6 }
0x2a80   : > { %s2384_s25 = sshll.u32 %s4437_s30, 4 }
0x2a81   : > { %s184_s3 = scalar_lea.vmem %s4443_s8, %s4435_s18  ;;  %p2555_p12 = pnand %p2554_p11, %p2674_p5 }
0x2a82   : > { %s4453_s4 = smov %s4452_s13  ;;  %s4274_s17 = scalar_lea.hbm %s4452_s13, %s2384_s25 }
0x2a83   : > { %p2556_p13 = pneg %p2555_p12 }
0x2aee   : > { %v2192_v40 = vpop.xlane.xlu1 %2191 }
0x2aef   : > { %vm2193_vm3 = vcmp.eq.f32.partialorder %v2190_v8, %v2192_v40  ;;  %v2198_v13 = vcvt.f32.s32 %v2192_v40  ;;  %v1841_v8 = vstv %s1836_s26  ;;  %s2615_s26 = smov [#allocation3]  }
0x2af0   : > { %v2194_v41 = vsel %vm2193_vm3, %v2189_v9, inf  ;;  %vm4432_vm3 = vmmov %vm4431_vm1  ;;  %s2557_s15 = sshll.u32 %s2615_s26, 4  ;;  %s2558_s15 = int_to_ptr.vmem [resolvable:$false] %s2557_s15 }
0x2af1   : > { %2195 = vmin.xlane.f32.xlu0 %v2194_v41  ;;  %v2199_v45 = vshll.u32 %v2198_v13, 16  ;;  %v1212_v38 = vsel %vm4432_vm3, %v1211_v7, %v1086_v33  ;;  %v1967_v41 = vstv %s1962_s14  ;;  %v2091_v13 = vstv %s2087_s12  ;;  %vm4451_vm3 = vmmov %vm4449_vm4  ;;  %s2559_s14 = scalar_lea.vmem %s2558_s15, 32  ;;  %p2560_p0 = scmp.lt.s32.totalorder %s4276_s11, %s2558_s15 }
0x2af2   : > { %p2561_p1 = scmp.lt.s32.totalorder %s2559_s14, %s2553_s6 }
0x2af4   : > { %p2562_p2 = por %p2561_p1, %p2560_p0 }
0x2af6   : > { %p2563_p3 = pnand %p2562_p2, %p2556_p13 }
0x2b7a   : > { %v2196_v42 = vpop.xlane.xlu0 %2195 }
0x2b7b   : > { %v2197_v25 = vcvt.f32.s32 %v2196_v42 }
0x2b7d   : > { %v2200_v27 = vadd.s32 %v2199_v45, %v2197_v25  ;;  %v2093_v25 = vstv %s2088_s24 }
0x2b7f   : > { %v2201_v54 = vrot.slane %v2200_v27, 4 }
0x2b81   : > { %vm2202_vm2 = vcmp.lt.s32.totalorder %v2200_v27, %v2201_v54 }
0x2b82   : > { %v2203_v23 = vsel %vm2202_vm2, %v2200_v27, %v2201_v54  ;;  %vm4434_vm2 = vcmp.eq.s32.totalorder %v2767_v60, 8 }
0x2b83   : > { %v2204_v17 = vrot.slane %v2203_v23, 2  ;;  %v1336_v1 = vsel %vm4434_vm2, %v1335_v57, %v1210_v34 }
0x2b85   : > { %vm2205_vm5 = vcmp.lt.s32.totalorder %v2203_v23, %v2204_v17 }
0x2b86   : > { %v2206_v28 = vsel %vm2205_vm5, %v2203_v23, %v2204_v17  ;;  %vm4436_vm5 = vmmov %vm4434_vm2 }
0x2b87   : > { %v2207_v24 = vrot.slane %v2206_v28, 1  ;;  %v1338_v4 = vsel %vm4436_vm5, %v1337_v31, %v1212_v38 }
0x2b89   : > { %vm2208_vm12 = vcmp.lt.s32.totalorder %v2206_v28, %v2207_v24 }
0x2b8a   : > { %v2209_v19 = vsel %vm2208_vm12, %v2206_v28, %v2207_v24  ;;  %vm4438_vm12 = vcmp.eq.s32.totalorder %v2767_v60, 9 }
0x2b8b   : > { %2512 = vpush %v2209_v19  ;;  %v1462_v48 = vsel %vm4438_vm12, %v1461_v32, %v1336_v1  ;;  %vm4439_vm13 = vmmov %vm4438_vm12 }
0x2b8c   : > { %v1464_v63 = vsel %vm4439_vm13, %v1463_v36, %v1338_v4  ;;  %v1588_v39 = vsel %vm4440_vm15, %v1587_v37, %v1462_v48 }
0x2b8d   : > { %v1590_v40 = vsel %vm4441_vm14, %v1589_v0, %v1464_v63  ;;  %v1714_v9 = vsel %vm4442_vm0, %v1713_v3, %v1588_v39 }
0x2b8e   : > { %v1716_v42 = vsel %vm4444_vm8, %v1715_v61, %v1590_v40  ;;  %v1840_v45 = vsel %vm4445_vm7, %v1839_v11, %v1714_v9 }
0x2b8f   : > { %v1842_v27 = vsel %vm4446_vm6, %v1841_v8, %v1716_v42  ;;  %v1966_v54 = vsel %vm4447_vm9, %v1965_v10, %v1840_v45 }
0x2b90   : > { %v1968_v17 = vsel %vm4448_vm11, %v1967_v41, %v1842_v27  ;;  %v2092_v28 = vsel %vm4449_vm4, %v2091_v13, %v1966_v54 }
0x2b91   : > { %v2094_v24 = vsel %vm4451_vm3, %v2093_v25, %v1968_v17 }
0x2bbc   : > { %s2513_s5 = spop %2512 }
0x2bbd   : > { %s2212_s27 = sadd.s32 %s2513_s5, %s2383_s0  ;;  %v2221_v23 = vstv %s2513_s5 }
0x2bbe   : > { %s2213_s1 = sshra.s32 %s2212_s27, 3  ;;  %s2214_s7 = sand.u32 7, %s2212_s27  ;;  %vm2222_vm1 = vcmp.eq.s32.totalorder %v2767_v60, %v2221_v23 }
0x2bbf   : > { %v2217_v19 = vstv %s2213_s1  ;;  %v2219_v16 = vstv %s2214_s7  ;;  %v2223_v12 = vsel %vm2222_vm1, -inf, %v4059_v22 }
0x2bc0   : > { %v2218_v62 = vsel %vm2215_vm10, %v2217_v19, %v2092_v28  ;;  %v2220_v46 = vsel %vm2215_vm10, %v2219_v16, %v2094_v24  ;;  %2224 = vst [vmem:[%s4454_s20] sm:$0x1] %v2223_v12 }
0x2bc1   : > { %2226 = vst [vmem:[%s184_s3] sm:$0x1] %v2218_v62  ;;  %2227 = vst [vmem:[%s173_s29] sm:$0x1] %v2220_v46 }
0x2bc2   : > { %2566 = shalt.err (!%p2563_p3)
}
0x2bc3   : > { %s2567_s23 = scalar_lea.hbm %s4274_s17, 16  ;;  %s2571_s18 = scalar_lea.hbm %s4453_s4, 32 }
0x2bc4   : > { %p2568_p4 = scmp.ne.s32.totalorder %s4274_s17, %s2567_s23  ;;  %p2572_p9 = scmp.lt.s32.totalorder %s4274_s17, %s4453_s4 }
0x2bc5   : > { %p2573_p10 = scmp.lt.s32.totalorder %s2571_s18, %s2567_s23 }
0x2bc6   : > { %p2569_p7 = pnand %p2568_p4, %p2674_p5 }
0x2bc7   : > { %p2574_p11 = por %p2573_p10, %p2572_p9 }
0x2bc8   : > { %p2570_p8 = pneg %p2569_p7 }
0x2bca   : > { %p2575_p12 = pnand %p2574_p11, %p2570_p8 }
0x2bcc   : > { %2578 = shalt.err (!%p2575_p12)
}
0x2bcd   : > { %2514 = dma.vmem_to_hbm [thread:$0]  (%p2674_p5), %s4276_s11, 16, %s4274_s17, %s2235_s28  }
0x2bce PF: > { %s4455_s24 = sld [smem:[#allocation9_spill]] }
0x2bcf   : > { %s4456_s0 = sld [smem:[#allocation6_spill]] }
0x2bd4   : > { %p2520_p13 = scmp.ge.s32.totalorder %s4455_s24, 2 }
0x2bd5   : > { %s2277_s16 = sand.u32 1, %s4456_s0  }
0x2bd6   : > { %p2517_p0 = pnand %p2520_p13, %p2678_p6  ;;  %s2278_s8 = scalar_lea.sflag [#allocation4], %s2277_s16 }
0x2bd8   : > { %p2518_p1 = pneg %p2517_p0 }
0x2bda   : > { %2596 = dma.done.wait (%p2518_p1), %s2278_s8, 16  }
0x2bdb   : > { %2598 = vsyncadd (%p2518_p1), %s2278_s8, 4294967280  ;;  %s4458_s15 = sld [smem:[#allocation11_spill]] }
0x2bdc   : > { %s4459_s12 = sld [smem:[#allocation7_spill]] }
0x2bdd   : > { %s4460_s13 = sld [smem:[#allocation8_spill]] }
0x2bde   : > { %s4461_s14 = sld [smem:[#allocation12_spill]] }
0x2be1   : > { %p14_p2 = scmp.ge.s32.totalorder %s4458_s15, 4  }
0x2be3   :  { %16 = sbr.rel (!%p14_p2) target bundleno = 8 (0x8), region = 99 }
0x2be8   :  { %2282 = vsyncpa [#allocation4], 1 }
0x2be9   :  { %2284 = vsyncpa [#allocation4 + $0x1], 1 }

</bundles_post_ra>
